<compile_context>
chip_gen: v7x
topology: tpu7x:2x2x1
jax: 0.10.0
libtpu: 0.0.40
codegen_flags: <defaults>
</compile_context>

<pallas_src>
import jax
import jax.numpy as jnp
from jax.experimental import pallas as pl
from jax.experimental.pallas import tpu as pltpu

HIDDEN = 256        # hidden_sizes = [256, 256]
STATE = 64          # stateSize
MSG = 64            # messageSize
INPUT = 20          # inputSize
NUM_MP_ITERS = 6    # numMessagePassingIterations
EPS = 1e-5          # torch.nn.LayerNorm default eps
IN_PAD = 128        # padded K for inputNetwork  (input 20 | zero pad)
MSG_IN_PAD = 128    # padded K for messageNetwork (state 64 | edge 1 | input 20 | pad)


# ------------------------------ kernel helpers ------------------------------

def _layernorm(h, g, b):
    mu = jnp.mean(h, axis=-1, keepdims=True)
    var = jnp.mean((h - mu) ** 2, axis=-1, keepdims=True)
    return (h - mu) * jax.lax.rsqrt(var + EPS) * g + b


def _hidden(x, w1, b1, g1, be1, w2, b2, g2, be2):
    """Linear -> LayerNorm -> ReLU -> Linear -> LayerNorm -> ReLU.

    bf16 matmul operands, f32 accumulation, f32 element-wise math."""
    h = jnp.dot(x.astype(jnp.bfloat16), w1[...],
                preferred_element_type=jnp.float32) + b1[...]
    h = jnp.maximum(_layernorm(h, g1[...], be1[...]), 0.0)
    h = jnp.dot(h.astype(jnp.bfloat16), w2[...],
                preferred_element_type=jnp.float32) + b2[...]
    h = jnp.maximum(_layernorm(h, g2[...], be2[...]), 0.0)
    return h


# ------------------------------ fused GNN kernel ----------------------------

def _gnn_kernel(
    # graph-constant tensors
    node_in_ref, msg_tail_ref, gather_ref, scatter_ref, inv_deg_ref,
    # input network
    iw1, ib1, ig1, ibe1, iw2, ib2, ig2, ibe2, iwo, ibo,
    # message network
    mw1, mb1, mg1, mbe1, mw2, mb2, mg2, mbe2, mwo, mbo,
    # update network
    uw1, ub1, ug1, ube1, uw2, ub2, ug2, ube2, uwo, ubo,
    # output network (tanh + sigmoid heads fused into one (256, 2) matmul)
    ow1, ob1, og1, obe1, ow2, ob2, og2, obe2, owh, obh,
    # output
    out_ref,
    # VMEM-resident node state, persists across grid iterations
    state_ref,
):
    it = pl.program_id(0)

    # ---- iteration 0: inputNetwork initialises the node state ----
    @pl.when(it == 0)
    def _():
        h = _hidden(node_in_ref[...], iw1, ib1, ig1, ibe1, iw2, ib2, ig2, ibe2)
        state_ref[...] = (jnp.dot(h.astype(jnp.bfloat16), iwo[...],
                                  preferred_element_type=jnp.float32) + ibo[...])

    # ---- one message-passing step per grid iteration ----
    # edge-source gather as a one-hot matmul (stays on-chip, no HBM round trip)
    src_state = jnp.dot(gather_ref[...], state_ref[...].astype(jnp.bfloat16),
                        preferred_element_type=jnp.float32)          # (E*B, 64)
    msg_in = jnp.concatenate([src_state, msg_tail_ref[...]], axis=-1)  # (E*B, 128)
    hm = _hidden(msg_in, mw1, mb1, mg1, mbe1, mw2, mb2, mg2, mbe2)
    m = jnp.tanh(jnp.dot(hm.astype(jnp.bfloat16), mwo[...],
                         preferred_element_type=jnp.float32) + mbo[...])  # (E*B, 64)

    # mean aggregation == dgl.function.mean('m', 'm_hat'):
    # one-hot scatter matmul + f32 1/deg scaling (exact 0/1 values in bf16)
    m_hat = jnp.dot(scatter_ref[...], m.astype(jnp.bfloat16),
                    preferred_element_type=jnp.float32) * inv_deg_ref[...]

    upd_in = jnp.concatenate([m_hat, state_ref[...]], axis=-1)        # (N*B, 128)
    hu = _hidden(upd_in, uw1, ub1, ug1, ube1, uw2, ub2, ug2, ube2)
    state_ref[...] = (jnp.dot(hu.astype(jnp.bfloat16), uwo[...],
                              preferred_element_type=jnp.float32) + ubo[...])

    # ---- last iteration: outputNetwork with fused tanh/sigmoid heads ----
    @pl.when(it == pl.num_programs(0) - 1)
    def _():
        h = _hidden(state_ref[...], ow1, ob1, og1, obe1, ow2, ob2, og2, obe2)
        y = jnp.dot(h.astype(jnp.bfloat16), owh[...],
                    preferred_element_type=jnp.float32) + obh[...]    # (N*B, 2)
        col = jax.lax.broadcasted_iota(jnp.int32, y.shape, 1)
        out_ref[...] = jnp.where(col == 0, jnp.tanh(y), jax.nn.sigmoid(y))


# ------------------------- parameter initialization -------------------------

def init_linear(key, din, dout):
    kw, kb = jax.random.split(key)
    bound = 1.0 / (din ** 0.5)
    w = jax.random.uniform(kw, (din, dout), jnp.float32, -bound, bound)
    b = jax.random.uniform(kb, (1, dout), jnp.float32, -bound, bound)
    return w, b


def init_network(key, din, dout, hidden=HIDDEN, with_sigmoid=False):
    keys = jax.random.split(key, 4)
    w1, b1 = init_linear(keys[0], din, hidden)
    g1, be1 = jnp.ones((1, hidden), jnp.float32), jnp.zeros((1, hidden), jnp.float32)
    w2, b2 = init_linear(keys[1], hidden, hidden)
    g2, be2 = jnp.ones((1, hidden), jnp.float32), jnp.zeros((1, hidden), jnp.float32)
    wo, bo = init_linear(keys[2], hidden, dout)
    params = [w1, b1, g1, be1, w2, b2, g2, be2, wo, bo]
    if with_sigmoid:
        ws, bs = init_linear(keys[3], hidden, 1)
        params += [ws, bs]
    return tuple(params)


def _pad_rows(w, k_pad):
    return jnp.zeros((k_pad, w.shape[1]), w.dtype).at[:w.shape[0]].set(w)


def _net_args(p, k_pad=None):
    w1, b1, g1, be1, w2, b2, g2, be2, wo, bo = p[:10]
    if k_pad is not None:
        w1 = _pad_rows(w1, k_pad)
    return [w1.astype(jnp.bfloat16), b1, g1, be1,
            w2.astype(jnp.bfloat16), b2, g2, be2,
            wo.astype(jnp.bfloat16), bo]


def _output_net_args(p):
    w1, b1, g1, be1, w2, b2, g2, be2, wo, bo, ws, bs = p
    wh = jnp.concatenate([wo, ws], axis=1).astype(jnp.bfloat16)   # (256, 2)
    bh = jnp.concatenate([bo, bs], axis=1)                        # (1, 2) f32
    return [w1.astype(jnp.bfloat16), b1, g1, be1,
            w2.astype(jnp.bfloat16), b2, g2, be2, wh, bh]


# ----------------------------- GNN forward pass -----------------------------

def gnn_forward(state, node_feat, edge_src, edge_dst, edge_feat, params,
                num_iters=NUM_MP_ITERS):
    # --- update_states_in_graph ---
    if state.ndim == 1:
        state = state[None, :]
    batch = state.shape[0]
    num_state_var = state.shape[1] // 2
    num_nodes = (num_state_var - 5) // 2
    num_edges = edge_src.shape[0]

    global_info = jnp.concatenate(
        [state[:, 0:5], state[:, num_state_var:num_state_var + 5]], axis=-1)  # (B,10)

    idx = jnp.arange(num_nodes)
    feat = jnp.broadcast_to(node_feat[:, None, :], (num_nodes, batch, 6))
    glob = jnp.broadcast_to(global_info[None, :, :], (num_nodes, batch, 10))
    loc16 = state[:, 5 + idx].T[:, :, None]
    loc17 = state[:, 5 + num_nodes + idx].T[:, :, None]
    loc18 = state[:, num_state_var + 5 + idx].T[:, :, None]
    loc19 = state[:, num_state_var + 5 + num_nodes + idx].T[:, :, None]
    node_input = jnp.concatenate(
        [feat, glob, loc16, loc17, loc18, loc19], axis=-1)  # (N, B, 20)

    rows_n = num_nodes * batch
    rows_e = num_edges * batch

    node_in_flat = node_input.reshape(rows_n, INPUT)
    node_in_pad = jnp.zeros((rows_n, IN_PAD), jnp.float32).at[:, :INPUT].set(node_in_flat)

    # constant half of the message-network input: [edge_feat | src_input | 0-pad]
    src_input = node_input[edge_src]                                   # (E, B, 20)
    edge_col = jnp.broadcast_to(edge_feat[:, None, None], (num_edges, batch, 1))
    msg_tail = jnp.concatenate(
        [edge_col, src_input,
         jnp.zeros((num_edges, batch, MSG_IN_PAD - STATE - 1 - INPUT), jnp.float32)],
        axis=-1).reshape(rows_e, MSG_IN_PAD - STATE)                   # (E*B, 64)

    # one-hot gather (edge source) / scatter (edge destination) matrices
    er = jnp.arange(rows_e)
    e_idx = er // batch
    b_idx = er % batch
    gather = jnp.zeros((rows_e, rows_n), jnp.float32).at[
        er, edge_src[e_idx] * batch + b_idx].set(1.0).astype(jnp.bfloat16)
    scatter = jnp.zeros((rows_n, rows_e), jnp.float32).at[
        edge_dst[e_idx] * batch + b_idx, er].set(1.0).astype(jnp.bfloat16)
    deg = jnp.zeros((num_nodes,), jnp.float32).at[edge_dst].add(1.0)
    inv_deg = jnp.repeat(1.0 / jnp.maximum(deg, 1.0), batch)[:, None]  # (N*B, 1) f32

    args = ([node_in_pad, msg_tail, gather, scatter, inv_deg]
            + _net_args(params['input'], k_pad=IN_PAD)
            + _net_args(params['message'], k_pad=MSG_IN_PAD)
            + _net_args(params['update'])
            + _output_net_args(params['output']))

    def full_spec(x):
        zeros = (0,) * x.ndim
        return pl.BlockSpec(x.shape, lambda i: zeros)   # block index constant
        # -> DMA'd into VMEM once, reused for every grid iteration

    out = pl.pallas_call(
        _gnn_kernel,
        grid=(num_iters,),
        in_specs=[full_spec(a) for a in args],
        out_specs=pl.BlockSpec((rows_n, 2), lambda i: (0, 0)),
        out_shape=jax.ShapeDtypeStruct((rows_n, 2), jnp.float32),
        scratch_shapes=[pltpu.VMEM((rows_n, STATE), jnp.float32)],
        compiler_params=pltpu.CompilerParams(
            dimension_semantics=("arbitrary",),      # sequential MP iterations
            vmem_limit_bytes=48 * 1024 * 1024),
    )(*args)

    out = out.reshape(num_nodes, batch, 2)
    out = jnp.transpose(out, (1, 0, 2))          # (B, N, 2)
    actions = out[:, :, 0]                       # (B, N)
    sigmoids = jnp.mean(out[:, :, 1], axis=-1)   # (B,)
    return actions, sigmoids


# ---------------------------------- main ------------------------------------

if __name__ == "__main__":
    key = jax.random.PRNGKey(0)
    k_state, k_feat, k_in, k_msg, k_upd, k_out = jax.random.split(key, 6)

    num_nodes = 4
    num_state_var = 2 * num_nodes + 5          # 13
    batch = 2
    state = jax.random.normal(k_state, (batch, 2 * num_state_var), jnp.float32)
    node_feat = jax.random.normal(k_feat, (num_nodes, 6), jnp.float32)

    # bidirectional ring: every node has in-degree 2 (no zero-degree nodes)
    edge_src = jnp.array([0, 1, 2, 3, 0, 1, 2, 3], dtype=jnp.int32)
    edge_dst = jnp.array([1, 2, 3, 0, 3, 0, 1, 2], dtype=jnp.int32)
    edge_feat = jnp.linspace(0.1, 0.8, edge_src.shape[0]).astype(jnp.float32)

    params = {
        'input':   init_network(k_in, INPUT, STATE),
        'message': init_network(k_msg, STATE + INPUT + 1, MSG),
        'update':  init_network(k_upd, STATE + MSG, STATE),
        'output':  init_network(k_out, STATE, 1, with_sigmoid=True),
    }

    actions, sigmoids = gnn_forward(state, node_feat, edge_src, edge_dst,
                                    edge_feat, params)
    (actions, sigmoids) = jax.block_until_ready((actions, sigmoids))

    assert actions.shape == (batch, num_nodes)
    assert sigmoids.shape == (batch,)
    assert bool(jnp.all(jnp.isfinite(actions))) and bool(jnp.all(jnp.isfinite(sigmoids)))
    assert bool(jnp.all(jnp.abs(actions) <= 1.0))
    assert bool(jnp.all((sigmoids >= 0.0) & (sigmoids <= 1.0)))
    print("KERNEL_OK")
</pallas_src>

<mosaic_0001>
module attributes {stable_mosaic.version = 11 : i64} {
  func.func @_gnn_kernel(%arg0: i32, %arg1: memref<8x128xf32, #tpu.memory_space<vmem>>, %arg2: memref<16x64xf32, #tpu.memory_space<vmem>>, %arg3: memref<16x8xbf16, #tpu.memory_space<vmem>>, %arg4: memref<8x16xbf16, #tpu.memory_space<vmem>>, %arg5: memref<8x1xf32, #tpu.memory_space<vmem>>, %arg6: memref<128x256xbf16, #tpu.memory_space<vmem>>, %arg7: memref<1x256xf32, #tpu.memory_space<vmem>>, %arg8: memref<1x256xf32, #tpu.memory_space<vmem>>, %arg9: memref<1x256xf32, #tpu.memory_space<vmem>>, %arg10: memref<256x256xbf16, #tpu.memory_space<vmem>>, %arg11: memref<1x256xf32, #tpu.memory_space<vmem>>, %arg12: memref<1x256xf32, #tpu.memory_space<vmem>>, %arg13: memref<1x256xf32, #tpu.memory_space<vmem>>, %arg14: memref<256x64xbf16, #tpu.memory_space<vmem>>, %arg15: memref<1x64xf32, #tpu.memory_space<vmem>>, %arg16: memref<128x256xbf16, #tpu.memory_space<vmem>>, %arg17: memref<1x256xf32, #tpu.memory_space<vmem>>, %arg18: memref<1x256xf32, #tpu.memory_space<vmem>>, %arg19: memref<1x256xf32, #tpu.memory_space<vmem>>, %arg20: memref<256x256xbf16, #tpu.memory_space<vmem>>, %arg21: memref<1x256xf32, #tpu.memory_space<vmem>>, %arg22: memref<1x256xf32, #tpu.memory_space<vmem>>, %arg23: memref<1x256xf32, #tpu.memory_space<vmem>>, %arg24: memref<256x64xbf16, #tpu.memory_space<vmem>>, %arg25: memref<1x64xf32, #tpu.memory_space<vmem>>, %arg26: memref<128x256xbf16, #tpu.memory_space<vmem>>, %arg27: memref<1x256xf32, #tpu.memory_space<vmem>>, %arg28: memref<1x256xf32, #tpu.memory_space<vmem>>, %arg29: memref<1x256xf32, #tpu.memory_space<vmem>>, %arg30: memref<256x256xbf16, #tpu.memory_space<vmem>>, %arg31: memref<1x256xf32, #tpu.memory_space<vmem>>, %arg32: memref<1x256xf32, #tpu.memory_space<vmem>>, %arg33: memref<1x256xf32, #tpu.memory_space<vmem>>, %arg34: memref<256x64xbf16, #tpu.memory_space<vmem>>, %arg35: memref<1x64xf32, #tpu.memory_space<vmem>>, %arg36: memref<64x256xbf16, #tpu.memory_space<vmem>>, %arg37: memref<1x256xf32, #tpu.memory_space<vmem>>, %arg38: memref<1x256xf32, #tpu.memory_space<vmem>>, %arg39: memref<1x256xf32, #tpu.memory_space<vmem>>, %arg40: memref<256x256xbf16, #tpu.memory_space<vmem>>, %arg41: memref<1x256xf32, #tpu.memory_space<vmem>>, %arg42: memref<1x256xf32, #tpu.memory_space<vmem>>, %arg43: memref<1x256xf32, #tpu.memory_space<vmem>>, %arg44: memref<256x2xbf16, #tpu.memory_space<vmem>>, %arg45: memref<1x2xf32, #tpu.memory_space<vmem>>, %arg46: memref<8x2xf32, #tpu.memory_space<vmem>>, %arg47: memref<8x64xf32, #tpu.memory_space<vmem>>) attributes {dimension_semantics = [#tpu.dimension_semantics<arbitrary>], iteration_bounds = array<i64: 6>, scalar_prefetch = 0 : i64, scratch_operands = 1 : i64, tpu.core_type = #tpu.core_type<tc>, window_params = [{pipeline_mode = #tpu.pipeline_mode<synchronous>, transform_indices = @transform_0, window_bounds = array<i64: 8, 128>}, {pipeline_mode = #tpu.pipeline_mode<synchronous>, transform_indices = @transform_1, window_bounds = array<i64: 16, 64>}, {pipeline_mode = #tpu.pipeline_mode<synchronous>, transform_indices = @transform_2, window_bounds = array<i64: 16, 8>}, {pipeline_mode = #tpu.pipeline_mode<synchronous>, transform_indices = @transform_3, window_bounds = array<i64: 8, 16>}, {pipeline_mode = #tpu.pipeline_mode<synchronous>, transform_indices = @transform_4, window_bounds = array<i64: 8, 1>}, {pipeline_mode = #tpu.pipeline_mode<synchronous>, transform_indices = @transform_5, window_bounds = array<i64: 128, 256>}, {pipeline_mode = #tpu.pipeline_mode<synchronous>, transform_indices = @transform_6, window_bounds = array<i64: 1, 256>}, {pipeline_mode = #tpu.pipeline_mode<synchronous>, transform_indices = @transform_7, window_bounds = array<i64: 1, 256>}, {pipeline_mode = #tpu.pipeline_mode<synchronous>, transform_indices = @transform_8, window_bounds = array<i64: 1, 256>}, {pipeline_mode = #tpu.pipeline_mode<synchronous>, transform_indices = @transform_9, window_bounds = array<i64: 256, 256>}, {pipeline_mode = #tpu.pipeline_mode<synchronous>, transform_indices = @transform_10, window_bounds = array<i64: 1, 256>}, {pipeline_mode = #tpu.pipeline_mode<synchronous>, transform_indices = @transform_11, window_bounds = array<i64: 1, 256>}, {pipeline_mode = #tpu.pipeline_mode<synchronous>, transform_indices = @transform_12, window_bounds = array<i64: 1, 256>}, {pipeline_mode = #tpu.pipeline_mode<synchronous>, transform_indices = @transform_13, window_bounds = array<i64: 256, 64>}, {pipeline_mode = #tpu.pipeline_mode<synchronous>, transform_indices = @transform_14, window_bounds = array<i64: 1, 64>}, {pipeline_mode = #tpu.pipeline_mode<synchronous>, transform_indices = @transform_15, window_bounds = array<i64: 128, 256>}, {pipeline_mode = #tpu.pipeline_mode<synchronous>, transform_indices = @transform_16, window_bounds = array<i64: 1, 256>}, {pipeline_mode = #tpu.pipeline_mode<synchronous>, transform_indices = @transform_17, window_bounds = array<i64: 1, 256>}, {pipeline_mode = #tpu.pipeline_mode<synchronous>, transform_indices = @transform_18, window_bounds = array<i64: 1, 256>}, {pipeline_mode = #tpu.pipeline_mode<synchronous>, transform_indices = @transform_19, window_bounds = array<i64: 256, 256>}, {pipeline_mode = #tpu.pipeline_mode<synchronous>, transform_indices = @transform_20, window_bounds = array<i64: 1, 256>}, {pipeline_mode = #tpu.pipeline_mode<synchronous>, transform_indices = @transform_21, window_bounds = array<i64: 1, 256>}, {pipeline_mode = #tpu.pipeline_mode<synchronous>, transform_indices = @transform_22, window_bounds = array<i64: 1, 256>}, {pipeline_mode = #tpu.pipeline_mode<synchronous>, transform_indices = @transform_23, window_bounds = array<i64: 256, 64>}, {pipeline_mode = #tpu.pipeline_mode<synchronous>, transform_indices = @transform_24, window_bounds = array<i64: 1, 64>}, {pipeline_mode = #tpu.pipeline_mode<synchronous>, transform_indices = @transform_25, window_bounds = array<i64: 128, 256>}, {pipeline_mode = #tpu.pipeline_mode<synchronous>, transform_indices = @transform_26, window_bounds = array<i64: 1, 256>}, {pipeline_mode = #tpu.pipeline_mode<synchronous>, transform_indices = @transform_27, window_bounds = array<i64: 1, 256>}, {pipeline_mode = #tpu.pipeline_mode<synchronous>, transform_indices = @transform_28, window_bounds = array<i64: 1, 256>}, {pipeline_mode = #tpu.pipeline_mode<synchronous>, transform_indices = @transform_29, window_bounds = array<i64: 256, 256>}, {pipeline_mode = #tpu.pipeline_mode<synchronous>, transform_indices = @transform_30, window_bounds = array<i64: 1, 256>}, {pipeline_mode = #tpu.pipeline_mode<synchronous>, transform_indices = @transform_31, window_bounds = array<i64: 1, 256>}, {pipeline_mode = #tpu.pipeline_mode<synchronous>, transform_indices = @transform_32, window_bounds = array<i64: 1, 256>}, {pipeline_mode = #tpu.pipeline_mode<synchronous>, transform_indices = @transform_33, window_bounds = array<i64: 256, 64>}, {pipeline_mode = #tpu.pipeline_mode<synchronous>, transform_indices = @transform_34, window_bounds = array<i64: 1, 64>}, {pipeline_mode = #tpu.pipeline_mode<synchronous>, transform_indices = @transform_35, window_bounds = array<i64: 64, 256>}, {pipeline_mode = #tpu.pipeline_mode<synchronous>, transform_indices = @transform_36, window_bounds = array<i64: 1, 256>}, {pipeline_mode = #tpu.pipeline_mode<synchronous>, transform_indices = @transform_37, window_bounds = array<i64: 1, 256>}, {pipeline_mode = #tpu.pipeline_mode<synchronous>, transform_indices = @transform_38, window_bounds = array<i64: 1, 256>}, {pipeline_mode = #tpu.pipeline_mode<synchronous>, transform_indices = @transform_39, window_bounds = array<i64: 256, 256>}, {pipeline_mode = #tpu.pipeline_mode<synchronous>, transform_indices = @transform_40, window_bounds = array<i64: 1, 256>}, {pipeline_mode = #tpu.pipeline_mode<synchronous>, transform_indices = @transform_41, window_bounds = array<i64: 1, 256>}, {pipeline_mode = #tpu.pipeline_mode<synchronous>, transform_indices = @transform_42, window_bounds = array<i64: 1, 256>}, {pipeline_mode = #tpu.pipeline_mode<synchronous>, transform_indices = @transform_43, window_bounds = array<i64: 256, 2>}, {pipeline_mode = #tpu.pipeline_mode<synchronous>, transform_indices = @transform_44, window_bounds = array<i64: 1, 2>}, {pipeline_mode = #tpu.pipeline_mode<synchronous>, transform_indices = @transform_45, window_bounds = array<i64: 8, 2>}]} {
    %c0_i32 = arith.constant 0 : i32
    %0 = arith.cmpi eq, %arg0, %c0_i32 : i32
    %1 = arith.extui %0 : i1 to i32
    %c0_i32_0 = arith.constant 0 : i32
    %2 = arith.cmpi ne, %1, %c0_i32_0 : i32
    scf.if %2 {
      %c0_86 = arith.constant 0 : index
      %c0_87 = arith.constant 0 : index
      %162 = vector.load %arg1[%c0_86, %c0_87] : memref<8x128xf32, #tpu.memory_space<vmem>>, vector<8x128xf32>
      %163 = arith.truncf %162 : vector<8x128xf32> to vector<8x128xbf16>
      %c0_88 = arith.constant 0 : index
      %c0_89 = arith.constant 0 : index
      %164 = vector.load %arg6[%c0_88, %c0_89] : memref<128x256xbf16, #tpu.memory_space<vmem>>, vector<128x256xbf16>
      %cst_90 = arith.constant dense<0.000000e+00> : vector<8x256xf32>
      %165 = tpu.matmul %163, %164, %cst_90 {dimension_numbers = #tpu.dot_dimension_numbers<[1], [0], [0], [1], [0, 0, 1, 1], [], []>} : vector<8x128xbf16>, vector<128x256xbf16>, vector<8x256xf32> -> vector<8x256xf32>
      %c0_91 = arith.constant 0 : index
      %c0_92 = arith.constant 0 : index
      %166 = vector.load %arg7[%c0_91, %c0_92] : memref<1x256xf32, #tpu.memory_space<vmem>>, vector<1x256xf32>
      %167 = vector.broadcast %166 : vector<1x256xf32> to vector<8x256xf32>
      %168 = arith.addf %165, %167 : vector<8x256xf32>
      %c0_93 = arith.constant 0 : index
      %c0_94 = arith.constant 0 : index
      %169 = vector.load %arg8[%c0_93, %c0_94] : memref<1x256xf32, #tpu.memory_space<vmem>>, vector<1x256xf32>
      %c0_95 = arith.constant 0 : index
      %c0_96 = arith.constant 0 : index
      %170 = vector.load %arg9[%c0_95, %c0_96] : memref<1x256xf32, #tpu.memory_space<vmem>>, vector<1x256xf32>
      %cst_97 = arith.constant dense<0.000000e+00> : vector<8xf32>
      %171 = vector.multi_reduction <add>, %168, %cst_97 [1] : vector<8x256xf32> to vector<8xf32>
      %172 = vector.shape_cast %171 : vector<8xf32> to vector<8x1xf32>
      %cst_98 = arith.constant 2.560000e+02 : f32
      %173 = vector.broadcast %cst_98 : f32 to vector<8x1xf32>
      %174 = arith.divf %172, %173 : vector<8x1xf32>
      %175 = vector.broadcast %174 : vector<8x1xf32> to vector<8x256xf32>
      %176 = arith.subf %168, %175 : vector<8x256xf32>
      %177 = arith.mulf %176, %176 : vector<8x256xf32>
      %cst_99 = arith.constant dense<0.000000e+00> : vector<8xf32>
      %178 = vector.multi_reduction <add>, %177, %cst_99 [1] : vector<8x256xf32> to vector<8xf32>
      %179 = vector.shape_cast %178 : vector<8xf32> to vector<8x1xf32>
      %cst_100 = arith.constant 2.560000e+02 : f32
      %180 = vector.broadcast %cst_100 : f32 to vector<8x1xf32>
      %181 = arith.divf %179, %180 : vector<8x1xf32>
      %182 = vector.broadcast %174 : vector<8x1xf32> to vector<8x256xf32>
      %183 = arith.subf %168, %182 : vector<8x256xf32>
      %cst_101 = arith.constant 9.99999974E-6 : f32
      %184 = vector.broadcast %cst_101 : f32 to vector<8x1xf32>
      %185 = arith.addf %181, %184 : vector<8x1xf32>
      %186 = math.rsqrt %185 : vector<8x1xf32>
      %187 = vector.broadcast %186 : vector<8x1xf32> to vector<8x256xf32>
      %188 = arith.mulf %183, %187 : vector<8x256xf32>
      %189 = vector.broadcast %169 : vector<1x256xf32> to vector<8x256xf32>
      %190 = arith.mulf %188, %189 : vector<8x256xf32>
      %191 = vector.broadcast %170 : vector<1x256xf32> to vector<8x256xf32>
      %192 = arith.addf %190, %191 : vector<8x256xf32>
      %cst_102 = arith.constant 0.000000e+00 : f32
      %193 = vector.broadcast %cst_102 : f32 to vector<8x256xf32>
      %194 = arith.maximumf %192, %193 : vector<8x256xf32>
      %195 = arith.truncf %194 : vector<8x256xf32> to vector<8x256xbf16>
      %c0_103 = arith.constant 0 : index
      %c0_104 = arith.constant 0 : index
      %196 = vector.load %arg10[%c0_103, %c0_104] : memref<256x256xbf16, #tpu.memory_space<vmem>>, vector<256x256xbf16>
      %cst_105 = arith.constant dense<0.000000e+00> : vector<8x256xf32>
      %197 = tpu.matmul %195, %196, %cst_105 {dimension_numbers = #tpu.dot_dimension_numbers<[1], [0], [0], [1], [0, 0, 1, 1], [], []>} : vector<8x256xbf16>, vector<256x256xbf16>, vector<8x256xf32> -> vector<8x256xf32>
      %c0_106 = arith.constant 0 : index
      %c0_107 = arith.constant 0 : index
      %198 = vector.load %arg11[%c0_106, %c0_107] : memref<1x256xf32, #tpu.memory_space<vmem>>, vector<1x256xf32>
      %199 = vector.broadcast %198 : vector<1x256xf32> to vector<8x256xf32>
      %200 = arith.addf %197, %199 : vector<8x256xf32>
      %c0_108 = arith.constant 0 : index
      %c0_109 = arith.constant 0 : index
      %201 = vector.load %arg12[%c0_108, %c0_109] : memref<1x256xf32, #tpu.memory_space<vmem>>, vector<1x256xf32>
      %c0_110 = arith.constant 0 : index
      %c0_111 = arith.constant 0 : index
      %202 = vector.load %arg13[%c0_110, %c0_111] : memref<1x256xf32, #tpu.memory_space<vmem>>, vector<1x256xf32>
      %cst_112 = arith.constant dense<0.000000e+00> : vector<8xf32>
      %203 = vector.multi_reduction <add>, %200, %cst_112 [1] : vector<8x256xf32> to vector<8xf32>
      %204 = vector.shape_cast %203 : vector<8xf32> to vector<8x1xf32>
      %cst_113 = arith.constant 2.560000e+02 : f32
      %205 = vector.broadcast %cst_113 : f32 to vector<8x1xf32>
      %206 = arith.divf %204, %205 : vector<8x1xf32>
      %207 = vector.broadcast %206 : vector<8x1xf32> to vector<8x256xf32>
      %208 = arith.subf %200, %207 : vector<8x256xf32>
      %209 = arith.mulf %208, %208 : vector<8x256xf32>
      %cst_114 = arith.constant dense<0.000000e+00> : vector<8xf32>
      %210 = vector.multi_reduction <add>, %209, %cst_114 [1] : vector<8x256xf32> to vector<8xf32>
      %211 = vector.shape_cast %210 : vector<8xf32> to vector<8x1xf32>
      %cst_115 = arith.constant 2.560000e+02 : f32
      %212 = vector.broadcast %cst_115 : f32 to vector<8x1xf32>
      %213 = arith.divf %211, %212 : vector<8x1xf32>
      %214 = vector.broadcast %206 : vector<8x1xf32> to vector<8x256xf32>
      %215 = arith.subf %200, %214 : vector<8x256xf32>
      %cst_116 = arith.constant 9.99999974E-6 : f32
      %216 = vector.broadcast %cst_116 : f32 to vector<8x1xf32>
      %217 = arith.addf %213, %216 : vector<8x1xf32>
      %218 = math.rsqrt %217 : vector<8x1xf32>
      %219 = vector.broadcast %218 : vector<8x1xf32> to vector<8x256xf32>
      %220 = arith.mulf %215, %219 : vector<8x256xf32>
      %221 = vector.broadcast %201 : vector<1x256xf32> to vector<8x256xf32>
      %222 = arith.mulf %220, %221 : vector<8x256xf32>
      %223 = vector.broadcast %202 : vector<1x256xf32> to vector<8x256xf32>
      %224 = arith.addf %222, %223 : vector<8x256xf32>
      %cst_117 = arith.constant 0.000000e+00 : f32
      %225 = vector.broadcast %cst_117 : f32 to vector<8x256xf32>
      %226 = arith.maximumf %224, %225 : vector<8x256xf32>
      %227 = arith.truncf %226 : vector<8x256xf32> to vector<8x256xbf16>
      %c0_118 = arith.constant 0 : index
      %c0_119 = arith.constant 0 : index
      %228 = vector.load %arg14[%c0_118, %c0_119] : memref<256x64xbf16, #tpu.memory_space<vmem>>, vector<256x64xbf16>
      %cst_120 = arith.constant dense<0.000000e+00> : vector<8x64xf32>
      %229 = tpu.matmul %227, %228, %cst_120 {dimension_numbers = #tpu.dot_dimension_numbers<[1], [0], [0], [1], [0, 0, 1, 1], [], []>} : vector<8x256xbf16>, vector<256x64xbf16>, vector<8x64xf32> -> vector<8x64xf32>
      %c0_121 = arith.constant 0 : index
      %c0_122 = arith.constant 0 : index
      %230 = vector.load %arg15[%c0_121, %c0_122] : memref<1x64xf32, #tpu.memory_space<vmem>>, vector<1x64xf32>
      %231 = vector.broadcast %230 : vector<1x64xf32> to vector<8x64xf32>
      %232 = arith.addf %229, %231 : vector<8x64xf32>
      %c0_123 = arith.constant 0 : index
      %c0_124 = arith.constant 0 : index
      %233 = vector.load %arg47[%c0_123, %c0_124] : memref<8x64xf32, #tpu.memory_space<vmem>>, vector<8x64xf32>
      tpu.vector_store %arg47[%c0_123, %c0_124], %232 {strides = array<i32>} : memref<8x64xf32, #tpu.memory_space<vmem>>, vector<8x64xf32>,
    } else {
    }
    %c0 = arith.constant 0 : index
    %c0_1 = arith.constant 0 : index
    %3 = vector.load %arg3[%c0, %c0_1] : memref<16x8xbf16, #tpu.memory_space<vmem>>, vector<16x8xbf16>
    %c0_2 = arith.constant 0 : index
    %c0_3 = arith.constant 0 : index
    %4 = vector.load %arg47[%c0_2, %c0_3] : memref<8x64xf32, #tpu.memory_space<vmem>>, vector<8x64xf32>
    %5 = arith.truncf %4 : vector<8x64xf32> to vector<8x64xbf16>
    %cst = arith.constant dense<0.000000e+00> : vector<16x64xf32>
    %6 = tpu.matmul %3, %5, %cst {dimension_numbers = #tpu.dot_dimension_numbers<[1], [0], [0], [1], [0, 0, 1, 1], [], []>} : vector<16x8xbf16>, vector<8x64xbf16>, vector<16x64xf32> -> vector<16x64xf32>
    %c0_4 = arith.constant 0 : index
    %c0_5 = arith.constant 0 : index
    %7 = vector.load %arg2[%c0_4, %c0_5] : memref<16x64xf32, #tpu.memory_space<vmem>>, vector<16x64xf32>
    %8 = tpu.concatenate %6, %7 in 1 : vector<16x64xf32>, vector<16x64xf32> -> vector<16x128xf32>
    %9 = arith.truncf %8 : vector<16x128xf32> to vector<16x128xbf16>
    %c0_6 = arith.constant 0 : index
    %c0_7 = arith.constant 0 : index
    %10 = vector.load %arg16[%c0_6, %c0_7] : memref<128x256xbf16, #tpu.memory_space<vmem>>, vector<128x256xbf16>
    %cst_8 = arith.constant dense<0.000000e+00> : vector<16x256xf32>
    %11 = tpu.matmul %9, %10, %cst_8 {dimension_numbers = #tpu.dot_dimension_numbers<[1], [0], [0], [1], [0, 0, 1, 1], [], []>} : vector<16x128xbf16>, vector<128x256xbf16>, vector<16x256xf32> -> vector<16x256xf32>
    %c0_9 = arith.constant 0 : index
    %c0_10 = arith.constant 0 : index
    %12 = vector.load %arg17[%c0_9, %c0_10] : memref<1x256xf32, #tpu.memory_space<vmem>>, vector<1x256xf32>
    %13 = vector.broadcast %12 : vector<1x256xf32> to vector<16x256xf32>
    %14 = arith.addf %11, %13 : vector<16x256xf32>
    %c0_11 = arith.constant 0 : index
    %c0_12 = arith.constant 0 : index
    %15 = vector.load %arg18[%c0_11, %c0_12] : memref<1x256xf32, #tpu.memory_space<vmem>>, vector<1x256xf32>
    %c0_13 = arith.constant 0 : index
    %c0_14 = arith.constant 0 : index
    %16 = vector.load %arg19[%c0_13, %c0_14] : memref<1x256xf32, #tpu.memory_space<vmem>>, vector<1x256xf32>
    %cst_15 = arith.constant dense<0.000000e+00> : vector<16xf32>
    %17 = vector.multi_reduction <add>, %14, %cst_15 [1] : vector<16x256xf32> to vector<16xf32>
    %18 = vector.shape_cast %17 : vector<16xf32> to vector<16x1xf32>
    %cst_16 = arith.constant 2.560000e+02 : f32
    %19 = vector.broadcast %cst_16 : f32 to vector<16x1xf32>
    %20 = arith.divf %18, %19 : vector<16x1xf32>
    %21 = vector.broadcast %20 : vector<16x1xf32> to vector<16x256xf32>
    %22 = arith.subf %14, %21 : vector<16x256xf32>
    %23 = arith.mulf %22, %22 : vector<16x256xf32>
    %cst_17 = arith.constant dense<0.000000e+00> : vector<16xf32>
    %24 = vector.multi_reduction <add>, %23, %cst_17 [1] : vector<16x256xf32> to vector<16xf32>
    %25 = vector.shape_cast %24 : vector<16xf32> to vector<16x1xf32>
    %cst_18 = arith.constant 2.560000e+02 : f32
    %26 = vector.broadcast %cst_18 : f32 to vector<16x1xf32>
    %27 = arith.divf %25, %26 : vector<16x1xf32>
    %28 = vector.broadcast %20 : vector<16x1xf32> to vector<16x256xf32>
    %29 = arith.subf %14, %28 : vector<16x256xf32>
    %cst_19 = arith.constant 9.99999974E-6 : f32
    %30 = vector.broadcast %cst_19 : f32 to vector<16x1xf32>
    %31 = arith.addf %27, %30 : vector<16x1xf32>
    %32 = math.rsqrt %31 : vector<16x1xf32>
    %33 = vector.broadcast %32 : vector<16x1xf32> to vector<16x256xf32>
    %34 = arith.mulf %29, %33 : vector<16x256xf32>
    %35 = vector.broadcast %15 : vector<1x256xf32> to vector<16x256xf32>
    %36 = arith.mulf %34, %35 : vector<16x256xf32>
    %37 = vector.broadcast %16 : vector<1x256xf32> to vector<16x256xf32>
    %38 = arith.addf %36, %37 : vector<16x256xf32>
    %cst_20 = arith.constant 0.000000e+00 : f32
    %39 = vector.broadcast %cst_20 : f32 to vector<16x256xf32>
    %40 = arith.maximumf %38, %39 : vector<16x256xf32>
    %41 = arith.truncf %40 : vector<16x256xf32> to vector<16x256xbf16>
    %c0_21 = arith.constant 0 : index
    %c0_22 = arith.constant 0 : index
    %42 = vector.load %arg20[%c0_21, %c0_22] : memref<256x256xbf16, #tpu.memory_space<vmem>>, vector<256x256xbf16>
    %cst_23 = arith.constant dense<0.000000e+00> : vector<16x256xf32>
    %43 = tpu.matmul %41, %42, %cst_23 {dimension_numbers = #tpu.dot_dimension_numbers<[1], [0], [0], [1], [0, 0, 1, 1], [], []>} : vector<16x256xbf16>, vector<256x256xbf16>, vector<16x256xf32> -> vector<16x256xf32>
    %c0_24 = arith.constant 0 : index
    %c0_25 = arith.constant 0 : index
    %44 = vector.load %arg21[%c0_24, %c0_25] : memref<1x256xf32, #tpu.memory_space<vmem>>, vector<1x256xf32>
    %45 = vector.broadcast %44 : vector<1x256xf32> to vector<16x256xf32>
    %46 = arith.addf %43, %45 : vector<16x256xf32>
    %c0_26 = arith.constant 0 : index
    %c0_27 = arith.constant 0 : index
    %47 = vector.load %arg22[%c0_26, %c0_27] : memref<1x256xf32, #tpu.memory_space<vmem>>, vector<1x256xf32>
    %c0_28 = arith.constant 0 : index
    %c0_29 = arith.constant 0 : index
    %48 = vector.load %arg23[%c0_28, %c0_29] : memref<1x256xf32, #tpu.memory_space<vmem>>, vector<1x256xf32>
    %cst_30 = arith.constant dense<0.000000e+00> : vector<16xf32>
    %49 = vector.multi_reduction <add>, %46, %cst_30 [1] : vector<16x256xf32> to vector<16xf32>
    %50 = vector.shape_cast %49 : vector<16xf32> to vector<16x1xf32>
    %cst_31 = arith.constant 2.560000e+02 : f32
    %51 = vector.broadcast %cst_31 : f32 to vector<16x1xf32>
    %52 = arith.divf %50, %51 : vector<16x1xf32>
    %53 = vector.broadcast %52 : vector<16x1xf32> to vector<16x256xf32>
    %54 = arith.subf %46, %53 : vector<16x256xf32>
    %55 = arith.mulf %54, %54 : vector<16x256xf32>
    %cst_32 = arith.constant dense<0.000000e+00> : vector<16xf32>
    %56 = vector.multi_reduction <add>, %55, %cst_32 [1] : vector<16x256xf32> to vector<16xf32>
    %57 = vector.shape_cast %56 : vector<16xf32> to vector<16x1xf32>
    %cst_33 = arith.constant 2.560000e+02 : f32
    %58 = vector.broadcast %cst_33 : f32 to vector<16x1xf32>
    %59 = arith.divf %57, %58 : vector<16x1xf32>
    %60 = vector.broadcast %52 : vector<16x1xf32> to vector<16x256xf32>
    %61 = arith.subf %46, %60 : vector<16x256xf32>
    %cst_34 = arith.constant 9.99999974E-6 : f32
    %62 = vector.broadcast %cst_34 : f32 to vector<16x1xf32>
    %63 = arith.addf %59, %62 : vector<16x1xf32>
    %64 = math.rsqrt %63 : vector<16x1xf32>
    %65 = vector.broadcast %64 : vector<16x1xf32> to vector<16x256xf32>
    %66 = arith.mulf %61, %65 : vector<16x256xf32>
    %67 = vector.broadcast %47 : vector<1x256xf32> to vector<16x256xf32>
    %68 = arith.mulf %66, %67 : vector<16x256xf32>
    %69 = vector.broadcast %48 : vector<1x256xf32> to vector<16x256xf32>
    %70 = arith.addf %68, %69 : vector<16x256xf32>
    %cst_35 = arith.constant 0.000000e+00 : f32
    %71 = vector.broadcast %cst_35 : f32 to vector<16x256xf32>
    %72 = arith.maximumf %70, %71 : vector<16x256xf32>
    %73 = arith.truncf %72 : vector<16x256xf32> to vector<16x256xbf16>
    %c0_36 = arith.constant 0 : index
    %c0_37 = arith.constant 0 : index
    %74 = vector.load %arg24[%c0_36, %c0_37] : memref<256x64xbf16, #tpu.memory_space<vmem>>, vector<256x64xbf16>
    %cst_38 = arith.constant dense<0.000000e+00> : vector<16x64xf32>
    %75 = tpu.matmul %73, %74, %cst_38 {dimension_numbers = #tpu.dot_dimension_numbers<[1], [0], [0], [1], [0, 0, 1, 1], [], []>} : vector<16x256xbf16>, vector<256x64xbf16>, vector<16x64xf32> -> vector<16x64xf32>
    %c0_39 = arith.constant 0 : index
    %c0_40 = arith.constant 0 : index
    %76 = vector.load %arg25[%c0_39, %c0_40] : memref<1x64xf32, #tpu.memory_space<vmem>>, vector<1x64xf32>
    %77 = vector.broadcast %76 : vector<1x64xf32> to vector<16x64xf32>
    %78 = arith.addf %75, %77 : vector<16x64xf32>
    %79 = math.tanh %78 : vector<16x64xf32>
    %c0_41 = arith.constant 0 : index
    %c0_42 = arith.constant 0 : index
    %80 = vector.load %arg4[%c0_41, %c0_42] : memref<8x16xbf16, #tpu.memory_space<vmem>>, vector<8x16xbf16>
    %81 = arith.truncf %79 : vector<16x64xf32> to vector<16x64xbf16>
    %cst_43 = arith.constant dense<0.000000e+00> : vector<8x64xf32>
    %82 = tpu.matmul %80, %81, %cst_43 {dimension_numbers = #tpu.dot_dimension_numbers<[1], [0], [0], [1], [0, 0, 1, 1], [], []>} : vector<8x16xbf16>, vector<16x64xbf16>, vector<8x64xf32> -> vector<8x64xf32>
    %c0_44 = arith.constant 0 : index
    %c0_45 = arith.constant 0 : index
    %83 = vector.load %arg5[%c0_44, %c0_45] : memref<8x1xf32, #tpu.memory_space<vmem>>, vector<8x1xf32>
    %84 = vector.broadcast %83 : vector<8x1xf32> to vector<8x64xf32>
    %85 = arith.mulf %82, %84 : vector<8x64xf32>
    %c0_46 = arith.constant 0 : index
    %c0_47 = arith.constant 0 : index
    %86 = vector.load %arg47[%c0_46, %c0_47] : memref<8x64xf32, #tpu.memory_space<vmem>>, vector<8x64xf32>
    %87 = tpu.concatenate %85, %86 in 1 : vector<8x64xf32>, vector<8x64xf32> -> vector<8x128xf32>
    %88 = arith.truncf %87 : vector<8x128xf32> to vector<8x128xbf16>
    %c0_48 = arith.constant 0 : index
    %c0_49 = arith.constant 0 : index
    %89 = vector.load %arg26[%c0_48, %c0_49] : memref<128x256xbf16, #tpu.memory_space<vmem>>, vector<128x256xbf16>
    %cst_50 = arith.constant dense<0.000000e+00> : vector<8x256xf32>
    %90 = tpu.matmul %88, %89, %cst_50 {dimension_numbers = #tpu.dot_dimension_numbers<[1], [0], [0], [1], [0, 0, 1, 1], [], []>} : vector<8x128xbf16>, vector<128x256xbf16>, vector<8x256xf32> -> vector<8x256xf32>
    %c0_51 = arith.constant 0 : index
    %c0_52 = arith.constant 0 : index
    %91 = vector.load %arg27[%c0_51, %c0_52] : memref<1x256xf32, #tpu.memory_space<vmem>>, vector<1x256xf32>
    %92 = vector.broadcast %91 : vector<1x256xf32> to vector<8x256xf32>
    %93 = arith.addf %90, %92 : vector<8x256xf32>
    %c0_53 = arith.constant 0 : index
    %c0_54 = arith.constant 0 : index
    %94 = vector.load %arg28[%c0_53, %c0_54] : memref<1x256xf32, #tpu.memory_space<vmem>>, vector<1x256xf32>
    %c0_55 = arith.constant 0 : index
    %c0_56 = arith.constant 0 : index
    %95 = vector.load %arg29[%c0_55, %c0_56] : memref<1x256xf32, #tpu.memory_space<vmem>>, vector<1x256xf32>
    %cst_57 = arith.constant dense<0.000000e+00> : vector<8xf32>
    %96 = vector.multi_reduction <add>, %93, %cst_57 [1] : vector<8x256xf32> to vector<8xf32>
    %97 = vector.shape_cast %96 : vector<8xf32> to vector<8x1xf32>
    %cst_58 = arith.constant 2.560000e+02 : f32
    %98 = vector.broadcast %cst_58 : f32 to vector<8x1xf32>
    %99 = arith.divf %97, %98 : vector<8x1xf32>
    %100 = vector.broadcast %99 : vector<8x1xf32> to vector<8x256xf32>
    %101 = arith.subf %93, %100 : vector<8x256xf32>
    %102 = arith.mulf %101, %101 : vector<8x256xf32>
    %cst_59 = arith.constant dense<0.000000e+00> : vector<8xf32>
    %103 = vector.multi_reduction <add>, %102, %cst_59 [1] : vector<8x256xf32> to vector<8xf32>
    %104 = vector.shape_cast %103 : vector<8xf32> to vector<8x1xf32>
    %cst_60 = arith.constant 2.560000e+02 : f32
    %105 = vector.broadcast %cst_60 : f32 to vector<8x1xf32>
    %106 = arith.divf %104, %105 : vector<8x1xf32>
    %107 = vector.broadcast %99 : vector<8x1xf32> to vector<8x256xf32>
    %108 = arith.subf %93, %107 : vector<8x256xf32>
    %cst_61 = arith.constant 9.99999974E-6 : f32
    %109 = vector.broadcast %cst_61 : f32 to vector<8x1xf32>
    %110 = arith.addf %106, %109 : vector<8x1xf32>
    %111 = math.rsqrt %110 : vector<8x1xf32>
    %112 = vector.broadcast %111 : vector<8x1xf32> to vector<8x256xf32>
    %113 = arith.mulf %108, %112 : vector<8x256xf32>
    %114 = vector.broadcast %94 : vector<1x256xf32> to vector<8x256xf32>
    %115 = arith.mulf %113, %114 : vector<8x256xf32>
    %116 = vector.broadcast %95 : vector<1x256xf32> to vector<8x256xf32>
    %117 = arith.addf %115, %116 : vector<8x256xf32>
    %cst_62 = arith.constant 0.000000e+00 : f32
    %118 = vector.broadcast %cst_62 : f32 to vector<8x256xf32>
    %119 = arith.maximumf %117, %118 : vector<8x256xf32>
    %120 = arith.truncf %119 : vector<8x256xf32> to vector<8x256xbf16>
    %c0_63 = arith.constant 0 : index
    %c0_64 = arith.constant 0 : index
    %121 = vector.load %arg30[%c0_63, %c0_64] : memref<256x256xbf16, #tpu.memory_space<vmem>>, vector<256x256xbf16>
    %cst_65 = arith.constant dense<0.000000e+00> : vector<8x256xf32>
    %122 = tpu.matmul %120, %121, %cst_65 {dimension_numbers = #tpu.dot_dimension_numbers<[1], [0], [0], [1], [0, 0, 1, 1], [], []>} : vector<8x256xbf16>, vector<256x256xbf16>, vector<8x256xf32> -> vector<8x256xf32>
    %c0_66 = arith.constant 0 : index
    %c0_67 = arith.constant 0 : index
    %123 = vector.load %arg31[%c0_66, %c0_67] : memref<1x256xf32, #tpu.memory_space<vmem>>, vector<1x256xf32>
    %124 = vector.broadcast %123 : vector<1x256xf32> to vector<8x256xf32>
    %125 = arith.addf %122, %124 : vector<8x256xf32>
    %c0_68 = arith.constant 0 : index
    %c0_69 = arith.constant 0 : index
    %126 = vector.load %arg32[%c0_68, %c0_69] : memref<1x256xf32, #tpu.memory_space<vmem>>, vector<1x256xf32>
    %c0_70 = arith.constant 0 : index
    %c0_71 = arith.constant 0 : index
    %127 = vector.load %arg33[%c0_70, %c0_71] : memref<1x256xf32, #tpu.memory_space<vmem>>, vector<1x256xf32>
    %cst_72 = arith.constant dense<0.000000e+00> : vector<8xf32>
    %128 = vector.multi_reduction <add>, %125, %cst_72 [1] : vector<8x256xf32> to vector<8xf32>
    %129 = vector.shape_cast %128 : vector<8xf32> to vector<8x1xf32>
    %cst_73 = arith.constant 2.560000e+02 : f32
    %130 = vector.broadcast %cst_73 : f32 to vector<8x1xf32>
    %131 = arith.divf %129, %130 : vector<8x1xf32>
    %132 = vector.broadcast %131 : vector<8x1xf32> to vector<8x256xf32>
    %133 = arith.subf %125, %132 : vector<8x256xf32>
    %134 = arith.mulf %133, %133 : vector<8x256xf32>
    %cst_74 = arith.constant dense<0.000000e+00> : vector<8xf32>
    %135 = vector.multi_reduction <add>, %134, %cst_74 [1] : vector<8x256xf32> to vector<8xf32>
    %136 = vector.shape_cast %135 : vector<8xf32> to vector<8x1xf32>
    %cst_75 = arith.constant 2.560000e+02 : f32
    %137 = vector.broadcast %cst_75 : f32 to vector<8x1xf32>
    %138 = arith.divf %136, %137 : vector<8x1xf32>
    %139 = vector.broadcast %131 : vector<8x1xf32> to vector<8x256xf32>
    %140 = arith.subf %125, %139 : vector<8x256xf32>
    %cst_76 = arith.constant 9.99999974E-6 : f32
    %141 = vector.broadcast %cst_76 : f32 to vector<8x1xf32>
    %142 = arith.addf %138, %141 : vector<8x1xf32>
    %143 = math.rsqrt %142 : vector<8x1xf32>
    %144 = vector.broadcast %143 : vector<8x1xf32> to vector<8x256xf32>
    %145 = arith.mulf %140, %144 : vector<8x256xf32>
    %146 = vector.broadcast %126 : vector<1x256xf32> to vector<8x256xf32>
    %147 = arith.mulf %145, %146 : vector<8x256xf32>
    %148 = vector.broadcast %127 : vector<1x256xf32> to vector<8x256xf32>
    %149 = arith.addf %147, %148 : vector<8x256xf32>
    %cst_77 = arith.constant 0.000000e+00 : f32
    %150 = vector.broadcast %cst_77 : f32 to vector<8x256xf32>
    %151 = arith.maximumf %149, %150 : vector<8x256xf32>
    %152 = arith.truncf %151 : vector<8x256xf32> to vector<8x256xbf16>
    %c0_78 = arith.constant 0 : index
    %c0_79 = arith.constant 0 : index
    %153 = vector.load %arg34[%c0_78, %c0_79] : memref<256x64xbf16, #tpu.memory_space<vmem>>, vector<256x64xbf16>
    %cst_80 = arith.constant dense<0.000000e+00> : vector<8x64xf32>
    %154 = tpu.matmul %152, %153, %cst_80 {dimension_numbers = #tpu.dot_dimension_numbers<[1], [0], [0], [1], [0, 0, 1, 1], [], []>} : vector<8x256xbf16>, vector<256x64xbf16>, vector<8x64xf32> -> vector<8x64xf32>
    %c0_81 = arith.constant 0 : index
    %c0_82 = arith.constant 0 : index
    %155 = vector.load %arg35[%c0_81, %c0_82] : memref<1x64xf32, #tpu.memory_space<vmem>>, vector<1x64xf32>
    %156 = vector.broadcast %155 : vector<1x64xf32> to vector<8x64xf32>
    %157 = arith.addf %154, %156 : vector<8x64xf32>
    %c0_83 = arith.constant 0 : index
    %c0_84 = arith.constant 0 : index
    %158 = vector.load %arg47[%c0_83, %c0_84] : memref<8x64xf32, #tpu.memory_space<vmem>>, vector<8x64xf32>
    tpu.vector_store %arg47[%c0_83, %c0_84], %157 {strides = array<i32>} : memref<8x64xf32, #tpu.memory_space<vmem>>, vector<8x64xf32>,
    %c5_i32 = arith.constant 5 : i32
    %159 = arith.cmpi eq, %arg0, %c5_i32 : i32
    %160 = arith.extui %159 : i1 to i32
    %c0_i32_85 = arith.constant 0 : i32
    %161 = arith.cmpi ne, %160, %c0_i32_85 : i32
    scf.if %161 {
      %c0_86 = arith.constant 0 : index
      %c0_87 = arith.constant 0 : index
      %162 = vector.load %arg47[%c0_86, %c0_87] : memref<8x64xf32, #tpu.memory_space<vmem>>, vector<8x64xf32>
      %163 = arith.truncf %162 : vector<8x64xf32> to vector<8x64xbf16>
      %c0_88 = arith.constant 0 : index
      %c0_89 = arith.constant 0 : index
      %164 = vector.load %arg36[%c0_88, %c0_89] : memref<64x256xbf16, #tpu.memory_space<vmem>>, vector<64x256xbf16>
      %cst_90 = arith.constant dense<0.000000e+00> : vector<8x256xf32>
      %165 = tpu.matmul %163, %164, %cst_90 {dimension_numbers = #tpu.dot_dimension_numbers<[1], [0], [0], [1], [0, 0, 1, 1], [], []>} : vector<8x64xbf16>, vector<64x256xbf16>, vector<8x256xf32> -> vector<8x256xf32>
      %c0_91 = arith.constant 0 : index
      %c0_92 = arith.constant 0 : index
      %166 = vector.load %arg37[%c0_91, %c0_92] : memref<1x256xf32, #tpu.memory_space<vmem>>, vector<1x256xf32>
      %167 = vector.broadcast %166 : vector<1x256xf32> to vector<8x256xf32>
      %168 = arith.addf %165, %167 : vector<8x256xf32>
      %c0_93 = arith.constant 0 : index
      %c0_94 = arith.constant 0 : index
      %169 = vector.load %arg38[%c0_93, %c0_94] : memref<1x256xf32, #tpu.memory_space<vmem>>, vector<1x256xf32>
      %c0_95 = arith.constant 0 : index
      %c0_96 = arith.constant 0 : index
      %170 = vector.load %arg39[%c0_95, %c0_96] : memref<1x256xf32, #tpu.memory_space<vmem>>, vector<1x256xf32>
      %cst_97 = arith.constant dense<0.000000e+00> : vector<8xf32>
      %171 = vector.multi_reduction <add>, %168, %cst_97 [1] : vector<8x256xf32> to vector<8xf32>
      %172 = vector.shape_cast %171 : vector<8xf32> to vector<8x1xf32>
      %cst_98 = arith.constant 2.560000e+02 : f32
      %173 = vector.broadcast %cst_98 : f32 to vector<8x1xf32>
      %174 = arith.divf %172, %173 : vector<8x1xf32>
      %175 = vector.broadcast %174 : vector<8x1xf32> to vector<8x256xf32>
      %176 = arith.subf %168, %175 : vector<8x256xf32>
      %177 = arith.mulf %176, %176 : vector<8x256xf32>
      %cst_99 = arith.constant dense<0.000000e+00> : vector<8xf32>
      %178 = vector.multi_reduction <add>, %177, %cst_99 [1] : vector<8x256xf32> to vector<8xf32>
      %179 = vector.shape_cast %178 : vector<8xf32> to vector<8x1xf32>
      %cst_100 = arith.constant 2.560000e+02 : f32
      %180 = vector.broadcast %cst_100 : f32 to vector<8x1xf32>
      %181 = arith.divf %179, %180 : vector<8x1xf32>
      %182 = vector.broadcast %174 : vector<8x1xf32> to vector<8x256xf32>
      %183 = arith.subf %168, %182 : vector<8x256xf32>
      %cst_101 = arith.constant 9.99999974E-6 : f32
      %184 = vector.broadcast %cst_101 : f32 to vector<8x1xf32>
      %185 = arith.addf %181, %184 : vector<8x1xf32>
      %186 = math.rsqrt %185 : vector<8x1xf32>
      %187 = vector.broadcast %186 : vector<8x1xf32> to vector<8x256xf32>
      %188 = arith.mulf %183, %187 : vector<8x256xf32>
      %189 = vector.broadcast %169 : vector<1x256xf32> to vector<8x256xf32>
      %190 = arith.mulf %188, %189 : vector<8x256xf32>
      %191 = vector.broadcast %170 : vector<1x256xf32> to vector<8x256xf32>
      %192 = arith.addf %190, %191 : vector<8x256xf32>
      %cst_102 = arith.constant 0.000000e+00 : f32
      %193 = vector.broadcast %cst_102 : f32 to vector<8x256xf32>
      %194 = arith.maximumf %192, %193 : vector<8x256xf32>
      %195 = arith.truncf %194 : vector<8x256xf32> to vector<8x256xbf16>
      %c0_103 = arith.constant 0 : index
      %c0_104 = arith.constant 0 : index
      %196 = vector.load %arg40[%c0_103, %c0_104] : memref<256x256xbf16, #tpu.memory_space<vmem>>, vector<256x256xbf16>
      %cst_105 = arith.constant dense<0.000000e+00> : vector<8x256xf32>
      %197 = tpu.matmul %195, %196, %cst_105 {dimension_numbers = #tpu.dot_dimension_numbers<[1], [0], [0], [1], [0, 0, 1, 1], [], []>} : vector<8x256xbf16>, vector<256x256xbf16>, vector<8x256xf32> -> vector<8x256xf32>
      %c0_106 = arith.constant 0 : index
      %c0_107 = arith.constant 0 : index
      %198 = vector.load %arg41[%c0_106, %c0_107] : memref<1x256xf32, #tpu.memory_space<vmem>>, vector<1x256xf32>
      %199 = vector.broadcast %198 : vector<1x256xf32> to vector<8x256xf32>
      %200 = arith.addf %197, %199 : vector<8x256xf32>
      %c0_108 = arith.constant 0 : index
      %c0_109 = arith.constant 0 : index
      %201 = vector.load %arg42[%c0_108, %c0_109] : memref<1x256xf32, #tpu.memory_space<vmem>>, vector<1x256xf32>
      %c0_110 = arith.constant 0 : index
      %c0_111 = arith.constant 0 : index
      %202 = vector.load %arg43[%c0_110, %c0_111] : memref<1x256xf32, #tpu.memory_space<vmem>>, vector<1x256xf32>
      %cst_112 = arith.constant dense<0.000000e+00> : vector<8xf32>
      %203 = vector.multi_reduction <add>, %200, %cst_112 [1] : vector<8x256xf32> to vector<8xf32>
      %204 = vector.shape_cast %203 : vector<8xf32> to vector<8x1xf32>
      %cst_113 = arith.constant 2.560000e+02 : f32
      %205 = vector.broadcast %cst_113 : f32 to vector<8x1xf32>
      %206 = arith.divf %204, %205 : vector<8x1xf32>
      %207 = vector.broadcast %206 : vector<8x1xf32> to vector<8x256xf32>
      %208 = arith.subf %200, %207 : vector<8x256xf32>
      %209 = arith.mulf %208, %208 : vector<8x256xf32>
      %cst_114 = arith.constant dense<0.000000e+00> : vector<8xf32>
      %210 = vector.multi_reduction <add>, %209, %cst_114 [1] : vector<8x256xf32> to vector<8xf32>
      %211 = vector.shape_cast %210 : vector<8xf32> to vector<8x1xf32>
      %cst_115 = arith.constant 2.560000e+02 : f32
      %212 = vector.broadcast %cst_115 : f32 to vector<8x1xf32>
      %213 = arith.divf %211, %212 : vector<8x1xf32>
      %214 = vector.broadcast %206 : vector<8x1xf32> to vector<8x256xf32>
      %215 = arith.subf %200, %214 : vector<8x256xf32>
      %cst_116 = arith.constant 9.99999974E-6 : f32
      %216 = vector.broadcast %cst_116 : f32 to vector<8x1xf32>
      %217 = arith.addf %213, %216 : vector<8x1xf32>
      %218 = math.rsqrt %217 : vector<8x1xf32>
      %219 = vector.broadcast %218 : vector<8x1xf32> to vector<8x256xf32>
      %220 = arith.mulf %215, %219 : vector<8x256xf32>
      %221 = vector.broadcast %201 : vector<1x256xf32> to vector<8x256xf32>
      %222 = arith.mulf %220, %221 : vector<8x256xf32>
      %223 = vector.broadcast %202 : vector<1x256xf32> to vector<8x256xf32>
      %224 = arith.addf %222, %223 : vector<8x256xf32>
      %cst_117 = arith.constant 0.000000e+00 : f32
      %225 = vector.broadcast %cst_117 : f32 to vector<8x256xf32>
      %226 = arith.maximumf %224, %225 : vector<8x256xf32>
      %227 = arith.truncf %226 : vector<8x256xf32> to vector<8x256xbf16>
      %c0_118 = arith.constant 0 : index
      %c0_119 = arith.constant 0 : index
      %228 = vector.load %arg44[%c0_118, %c0_119] : memref<256x2xbf16, #tpu.memory_space<vmem>>, vector<256x2xbf16>
      %cst_120 = arith.constant dense<0.000000e+00> : vector<8x2xf32>
      %229 = tpu.matmul %227, %228, %cst_120 {dimension_numbers = #tpu.dot_dimension_numbers<[1], [0], [0], [1], [0, 0, 1, 1], [], []>} : vector<8x256xbf16>, vector<256x2xbf16>, vector<8x2xf32> -> vector<8x2xf32>
      %c0_121 = arith.constant 0 : index
      %c0_122 = arith.constant 0 : index
      %230 = vector.load %arg45[%c0_121, %c0_122] : memref<1x2xf32, #tpu.memory_space<vmem>>, vector<1x2xf32>
      %231 = vector.broadcast %230 : vector<1x2xf32> to vector<8x2xf32>
      %232 = arith.addf %229, %231 : vector<8x2xf32>
      %233 = tpu.iota {dimensions = array<i32: 1>} : vector<8x2xi32>
      %c0_i32_123 = arith.constant 0 : i32
      %234 = vector.broadcast %c0_i32_123 : i32 to vector<8x2xi32>
      %235 = arith.cmpi eq, %233, %234 : vector<8x2xi32>
      %236 = math.tanh %232 : vector<8x2xf32>
      %237 = arith.negf %232 : vector<8x2xf32>
      %238 = math.exp %237 : vector<8x2xf32>
      %cst_124 = arith.constant 1.000000e+00 : f32
      %239 = vector.broadcast %cst_124 : f32 to vector<8x2xf32>
      %240 = arith.addf %239, %238 : vector<8x2xf32>
      %241 = arith.divf %239, %240 : vector<8x2xf32>
      %242 = arith.select %235, %236, %241 : vector<8x2xi1>, vector<8x2xf32>
      %c0_125 = arith.constant 0 : index
      %c0_126 = arith.constant 0 : index
      %243 = vector.load %arg46[%c0_125, %c0_126] : memref<8x2xf32, #tpu.memory_space<vmem>>, vector<8x2xf32>
      tpu.vector_store %arg46[%c0_125, %c0_126], %242 {strides = array<i32>} : memref<8x2xf32, #tpu.memory_space<vmem>>, vector<8x2xf32>,
    } else {
    }
    return
  }
  func.func @transform_0(%arg0: i32) -> (i32, i32) {
    %c0_i32 = arith.constant 0 : i32
    %c0_i32_0 = arith.constant 0 : i32
    %c0_i32_1 = arith.constant 0 : i32
    return %c0_i32, %c0_i32_0 : i32, i32
  }
  func.func @transform_1(%arg0: i32) -> (i32, i32) {
    %c0_i32 = arith.constant 0 : i32
    %c0_i32_0 = arith.constant 0 : i32
    %c0_i32_1 = arith.constant 0 : i32
    return %c0_i32, %c0_i32_0 : i32, i32
  }
  func.func @transform_2(%arg0: i32) -> (i32, i32) {
    %c0_i32 = arith.constant 0 : i32
    %c0_i32_0 = arith.constant 0 : i32
    %c0_i32_1 = arith.constant 0 : i32
    return %c0_i32, %c0_i32_0 : i32, i32
  }
  func.func @transform_3(%arg0: i32) -> (i32, i32) {
    %c0_i32 = arith.constant 0 : i32
    %c0_i32_0 = arith.constant 0 : i32
    %c0_i32_1 = arith.constant 0 : i32
    return %c0_i32, %c0_i32_0 : i32, i32
  }
  func.func @transform_4(%arg0: i32) -> (i32, i32) {
    %c0_i32 = arith.constant 0 : i32
    %c0_i32_0 = arith.constant 0 : i32
    %c0_i32_1 = arith.constant 0 : i32
    return %c0_i32, %c0_i32_0 : i32, i32
  }
  func.func @transform_5(%arg0: i32) -> (i32, i32) {
    %c0_i32 = arith.constant 0 : i32
    %c0_i32_0 = arith.constant 0 : i32
    %c0_i32_1 = arith.constant 0 : i32
    return %c0_i32, %c0_i32_0 : i32, i32
  }
  func.func @transform_6(%arg0: i32) -> (i32, i32) {
    %c0_i32 = arith.constant 0 : i32
    %c0_i32_0 = arith.constant 0 : i32
    %c0_i32_1 = arith.constant 0 : i32
    return %c0_i32, %c0_i32_0 : i32, i32
  }
  func.func @transform_7(%arg0: i32) -> (i32, i32) {
    %c0_i32 = arith.constant 0 : i32
    %c0_i32_0 = arith.constant 0 : i32
    %c0_i32_1 = arith.constant 0 : i32
    return %c0_i32, %c0_i32_0 : i32, i32
  }
  func.func @transform_8(%arg0: i32) -> (i32, i32) {
    %c0_i32 = arith.constant 0 : i32
    %c0_i32_0 = arith.constant 0 : i32
    %c0_i32_1 = arith.constant 0 : i32
    return %c0_i32, %c0_i32_0 : i32, i32
  }
  func.func @transform_9(%arg0: i32) -> (i32, i32) {
    %c0_i32 = arith.constant 0 : i32
    %c0_i32_0 = arith.constant 0 : i32
    %c0_i32_1 = arith.constant 0 : i32
    return %c0_i32, %c0_i32_0 : i32, i32
  }
  func.func @transform_10(%arg0: i32) -> (i32, i32) {
    %c0_i32 = arith.constant 0 : i32
    %c0_i32_0 = arith.constant 0 : i32
    %c0_i32_1 = arith.constant 0 : i32
    return %c0_i32, %c0_i32_0 : i32, i32
  }
  func.func @transform_11(%arg0: i32) -> (i32, i32) {
    %c0_i32 = arith.constant 0 : i32
    %c0_i32_0 = arith.constant 0 : i32
    %c0_i32_1 = arith.constant 0 : i32
    return %c0_i32, %c0_i32_0 : i32, i32
  }
  func.func @transform_12(%arg0: i32) -> (i32, i32) {
    %c0_i32 = arith.constant 0 : i32
    %c0_i32_0 = arith.constant 0 : i32
    %c0_i32_1 = arith.constant 0 : i32
    return %c0_i32, %c0_i32_0 : i32, i32
  }
  func.func @transform_13(%arg0: i32) -> (i32, i32) {
    %c0_i32 = arith.constant 0 : i32
    %c0_i32_0 = arith.constant 0 : i32
    %c0_i32_1 = arith.constant 0 : i32
    return %c0_i32, %c0_i32_0 : i32, i32
  }
  func.func @transform_14(%arg0: i32) -> (i32, i32) {
    %c0_i32 = arith.constant 0 : i32
    %c0_i32_0 = arith.constant 0 : i32
    %c0_i32_1 = arith.constant 0 : i32
    return %c0_i32, %c0_i32_0 : i32, i32
  }
  func.func @transform_15(%arg0: i32) -> (i32, i32) {
    %c0_i32 = arith.constant 0 : i32
    %c0_i32_0 = arith.constant 0 : i32
    %c0_i32_1 = arith.constant 0 : i32
    return %c0_i32, %c0_i32_0 : i32, i32
  }
  func.func @transform_16(%arg0: i32) -> (i32, i32) {
    %c0_i32 = arith.constant 0 : i32
    %c0_i32_0 = arith.constant 0 : i32
    %c0_i32_1 = arith.constant 0 : i32
    return %c0_i32, %c0_i32_0 : i32, i32
  }
  func.func @transform_17(%arg0: i32) -> (i32, i32) {
    %c0_i32 = arith.constant 0 : i32
    %c0_i32_0 = arith.constant 0 : i32
    %c0_i32_1 = arith.constant 0 : i32
    return %c0_i32, %c0_i32_0 : i32, i32
  }
  func.func @transform_18(%arg0: i32) -> (i32, i32) {
    %c0_i32 = arith.constant 0 : i32
    %c0_i32_0 = arith.constant 0 : i32
    %c0_i32_1 = arith.constant 0 : i32
    return %c0_i32, %c0_i32_0 : i32, i32
  }
  func.func @transform_19(%arg0: i32) -> (i32, i32) {
    %c0_i32 = arith.constant 0 : i32
    %c0_i32_0 = arith.constant 0 : i32
    %c0_i32_1 = arith.constant 0 : i32
    return %c0_i32, %c0_i32_0 : i32, i32
  }
  func.func @transform_20(%arg0: i32) -> (i32, i32) {
    %c0_i32 = arith.constant 0 : i32
    %c0_i32_0 = arith.constant 0 : i32
    %c0_i32_1 = arith.constant 0 : i32
    return %c0_i32, %c0_i32_0 : i32, i32
  }
  func.func @transform_21(%arg0: i32) -> (i32, i32) {
    %c0_i32 = arith.constant 0 : i32
    %c0_i32_0 = arith.constant 0 : i32
    %c0_i32_1 = arith.constant 0 : i32
    return %c0_i32, %c0_i32_0 : i32, i32
  }
  func.func @transform_22(%arg0: i32) -> (i32, i32) {
    %c0_i32 = arith.constant 0 : i32
    %c0_i32_0 = arith.constant 0 : i32
    %c0_i32_1 = arith.constant 0 : i32
    return %c0_i32, %c0_i32_0 : i32, i32
  }
  func.func @transform_23(%arg0: i32) -> (i32, i32) {
    %c0_i32 = arith.constant 0 : i32
    %c0_i32_0 = arith.constant 0 : i32
    %c0_i32_1 = arith.constant 0 : i32
    return %c0_i32, %c0_i32_0 : i32, i32
  }
  func.func @transform_24(%arg0: i32) -> (i32, i32) {
    %c0_i32 = arith.constant 0 : i32
    %c0_i32_0 = arith.constant 0 : i32
    %c0_i32_1 = arith.constant 0 : i32
    return %c0_i32, %c0_i32_0 : i32, i32
  }
  func.func @transform_25(%arg0: i32) -> (i32, i32) {
    %c0_i32 = arith.constant 0 : i32
    %c0_i32_0 = arith.constant 0 : i32
    %c0_i32_1 = arith.constant 0 : i32
    return %c0_i32, %c0_i32_0 : i32, i32
  }
  func.func @transform_26(%arg0: i32) -> (i32, i32) {
    %c0_i32 = arith.constant 0 : i32
    %c0_i32_0 = arith.constant 0 : i32
    %c0_i32_1 = arith.constant 0 : i32
    return %c0_i32, %c0_i32_0 : i32, i32
  }
  func.func @transform_27(%arg0: i32) -> (i32, i32) {
    %c0_i32 = arith.constant 0 : i32
    %c0_i32_0 = arith.constant 0 : i32
    %c0_i32_1 = arith.constant 0 : i32
    return %c0_i32, %c0_i32_0 : i32, i32
  }
  func.func @transform_28(%arg0: i32) -> (i32, i32) {
    %c0_i32 = arith.constant 0 : i32
    %c0_i32_0 = arith.constant 0 : i32
    %c0_i32_1 = arith.constant 0 : i32
    return %c0_i32, %c0_i32_0 : i32, i32
  }
  func.func @transform_29(%arg0: i32) -> (i32, i32) {
    %c0_i32 = arith.constant 0 : i32
    %c0_i32_0 = arith.constant 0 : i32
    %c0_i32_1 = arith.constant 0 : i32
    return %c0_i32, %c0_i32_0 : i32, i32
  }
  func.func @transform_30(%arg0: i32) -> (i32, i32) {
    %c0_i32 = arith.constant 0 : i32
    %c0_i32_0 = arith.constant 0 : i32
    %c0_i32_1 = arith.constant 0 : i32
    return %c0_i32, %c0_i32_0 : i32, i32
  }
  func.func @transform_31(%arg0: i32) -> (i32, i32) {
    %c0_i32 = arith.constant 0 : i32
    %c0_i32_0 = arith.constant 0 : i32
    %c0_i32_1 = arith.constant 0 : i32
    return %c0_i32, %c0_i32_0 : i32, i32
  }
  func.func @transform_32(%arg0: i32) -> (i32, i32) {
    %c0_i32 = arith.constant 0 : i32
    %c0_i32_0 = arith.constant 0 : i32
    %c0_i32_1 = arith.constant 0 : i32
    return %c0_i32, %c0_i32_0 : i32, i32
  }
  func.func @transform_33(%arg0: i32) -> (i32, i32) {
    %c0_i32 = arith.constant 0 : i32
    %c0_i32_0 = arith.constant 0 : i32
    %c0_i32_1 = arith.constant 0 : i32
    return %c0_i32, %c0_i32_0 : i32, i32
  }
  func.func @transform_34(%arg0: i32) -> (i32, i32) {
    %c0_i32 = arith.constant 0 : i32
    %c0_i32_0 = arith.constant 0 : i32
    %c0_i32_1 = arith.constant 0 : i32
    return %c0_i32, %c0_i32_0 : i32, i32
  }
  func.func @transform_35(%arg0: i32) -> (i32, i32) {
    %c0_i32 = arith.constant 0 : i32
    %c0_i32_0 = arith.constant 0 : i32
    %c0_i32_1 = arith.constant 0 : i32
    return %c0_i32, %c0_i32_0 : i32, i32
  }
  func.func @transform_36(%arg0: i32) -> (i32, i32) {
    %c0_i32 = arith.constant 0 : i32
    %c0_i32_0 = arith.constant 0 : i32
    %c0_i32_1 = arith.constant 0 : i32
    return %c0_i32, %c0_i32_0 : i32, i32
  }
  func.func @transform_37(%arg0: i32) -> (i32, i32) {
    %c0_i32 = arith.constant 0 : i32
    %c0_i32_0 = arith.constant 0 : i32
    %c0_i32_1 = arith.constant 0 : i32
    return %c0_i32, %c0_i32_0 : i32, i32
  }
  func.func @transform_38(%arg0: i32) -> (i32, i32) {
    %c0_i32 = arith.constant 0 : i32
    %c0_i32_0 = arith.constant 0 : i32
    %c0_i32_1 = arith.constant 0 : i32
    return %c0_i32, %c0_i32_0 : i32, i32
  }
  func.func @transform_39(%arg0: i32) -> (i32, i32) {
    %c0_i32 = arith.constant 0 : i32
    %c0_i32_0 = arith.constant 0 : i32
    %c0_i32_1 = arith.constant 0 : i32
    return %c0_i32, %c0_i32_0 : i32, i32
  }
  func.func @transform_40(%arg0: i32) -> (i32, i32) {
    %c0_i32 = arith.constant 0 : i32
    %c0_i32_0 = arith.constant 0 : i32
    %c0_i32_1 = arith.constant 0 : i32
    return %c0_i32, %c0_i32_0 : i32, i32
  }
  func.func @transform_41(%arg0: i32) -> (i32, i32) {
    %c0_i32 = arith.constant 0 : i32
    %c0_i32_0 = arith.constant 0 : i32
    %c0_i32_1 = arith.constant 0 : i32
    return %c0_i32, %c0_i32_0 : i32, i32
  }
  func.func @transform_42(%arg0: i32) -> (i32, i32) {
    %c0_i32 = arith.constant 0 : i32
    %c0_i32_0 = arith.constant 0 : i32
    %c0_i32_1 = arith.constant 0 : i32
    return %c0_i32, %c0_i32_0 : i32, i32
  }
  func.func @transform_43(%arg0: i32) -> (i32, i32) {
    %c0_i32 = arith.constant 0 : i32
    %c0_i32_0 = arith.constant 0 : i32
    %c0_i32_1 = arith.constant 0 : i32
    return %c0_i32, %c0_i32_0 : i32, i32
  }
  func.func @transform_44(%arg0: i32) -> (i32, i32) {
    %c0_i32 = arith.constant 0 : i32
    %c0_i32_0 = arith.constant 0 : i32
    %c0_i32_1 = arith.constant 0 : i32
    return %c0_i32, %c0_i32_0 : i32, i32
  }
  func.func @transform_45(%arg0: i32) -> (i32, i32) {
    %c0_i32 = arith.constant 0 : i32
    %c0_i32_0 = arith.constant 0 : i32
    %c0_i32_1 = arith.constant 0 : i32
    return %c0_i32, %c0_i32_0 : i32, i32
  }
}

</mosaic_0001>

<bundles_post_ra>
// kernel: tpu_custom_call.1
= control target key start
LH: loop header
LB: loop body
LE: loop exit
PB: predicated region body
PF: predicated region fallthrough
CT: control target
= control target key end

     0   :  { %s6638_s6 = smov 1   ;;  %s6639_s10 = smov 2   ;;  %s7587_s0 = inlined_call_operand.smem [shape: u32[46], index: -1, kind: input, shape index: {}] }
   0x1   :  { %s6724_s5 = sld [smem:[%s7587_s0]]   ;;  %s6640_s14 = smov 3  }
   0x2   :  { %s6729_s9 = sld [smem:[%s7587_s0 + %s6638_s6]]   ;;  %s6641_s18 = smov 4  }
   0x3   :  { %s6734_s13 = sld [smem:[%s7587_s0 + %s6639_s10]]   ;;  %s6642_s22 = smov 5  }
   0x4   :  { %s6739_s17 = sld [smem:[%s7587_s0 + %s6640_s14]]   ;;  %s6643_s26 = smov 6  }
   0x5   :  { %s6744_s21 = sld [smem:[%s7587_s0 + %s6641_s18]]   ;;  %s6644_s30 = smov 7  }
   0x6   :  { %s6749_s25 = sld [smem:[%s7587_s0 + %s6642_s22]]   ;;  %s6645_s4 = smov 8  }
   0x7   :  { %7620 = sst [smem:[#allocation54_spill]] %s6724_s5  ;;  %s6646_s10 = smov 9  }
   0x8   :  { %7621 = sst [smem:[#allocation55_spill]] %s6729_s9  ;;  %s6647_s15 = smov 10  }
   0x9   :  { %7622 = sst [smem:[#allocation56_spill]] %s6734_s13  ;;  %s6648_s20 = smov 11  }
   0xa   :  { %s6754_s29 = sld [smem:[%s7587_s0 + %s6643_s26]]   ;;  %s6649_s26 = smov 12  }
   0xb   :  { %7623 = sst [smem:[#allocation57_spill]] %s6744_s21  ;;  %s6650_s1 = smov 13  }
   0xc   :  { %s6759_s3 = sld [smem:[%s7587_s0 + %s6644_s30]]   ;;  %s6651_s7 = smov 14  }
   0xd   :  { %s6764_s8 = sld [smem:[%s7587_s0 + %s6645_s4]]   ;;  %s6653_s22 = smov 16  }
   0xe   :  { %s6769_s14 = sld [smem:[%s7587_s0 + %s6646_s10]]   ;;  %s6654_s28 = smov 17  }
   0xf   :  { %s6774_s19 = sld [smem:[%s7587_s0 + %s6647_s15]]   ;;  %s6652_s15 = smov 15  }
  0x10   :  { %7624 = sst [smem:[#allocation58_spill]] %s6754_s29 }
  0x11   :  { %s6779_s24 = sld [smem:[%s7587_s0 + %s6648_s20]]  }
  0x12   :  { %7625 = sst [smem:[#allocation59_spill]] %s6759_s3 }
  0x13   :  { %7626 = sst [smem:[#allocation60_spill]] %s6764_s8 }
  0x14   :  { %7627 = sst [smem:[#allocation61_spill]] %s6769_s14 }
  0x15   :  { %s6784_s30 = sld [smem:[%s7587_s0 + %s6649_s26]]  }
  0x16   :  { %s6789_s6 = sld [smem:[%s7587_s0 + %s6650_s1]]  }
  0x17   :  { %7628 = sst [smem:[#allocation62_spill]] %s6779_s24 }
  0x18   :  { %s6794_s12 = sld [smem:[%s7587_s0 + %s6651_s7]]   ;;  %s6655_s7 = smov 18  }
  0x19   :  { %s6799_s20 = sld [smem:[%s7587_s0 + %s6652_s15]]   ;;  %s6656_s15 = smov 19  }
  0x1a   :  { %s6804_s27 = sld [smem:[%s7587_s0 + %s6653_s22]]   ;;  %s6657_s22 = smov 20  }
  0x1b   :  { %s6809_s4 = sld [smem:[%s7587_s0 + %s6654_s28]]   ;;  %s6658_s28 = smov 21  }
  0x1c   :  { %7629 = sst [smem:[#allocation63_spill]] %s6789_s6 }
  0x1d   :  { %s6814_s21 = sld [smem:[%s7587_s0 + %s6655_s7]]   ;;  %s6659_s7 = smov 22  }
  0x1e   :  { %7630 = sst [smem:[#allocation64_spill]] %s6794_s12 }
  0x1f   :  { %s6819_s13 = sld [smem:[%s7587_s0 + %s6656_s15]]   ;;  %s6660_s15 = smov 23  }
  0x20   :  { %7631 = sst [smem:[#allocation65_spill]] %s6804_s27 }
  0x21   :  { %7632 = sst [smem:[#allocation66_spill]] %s6809_s4 }
  0x22   :  { %s6824_s6 = sld [smem:[%s7587_s0 + %s6657_s22]]   ;;  %s6661_s22 = smov 24  }
  0x23   :  { %7633 = sst [smem:[#allocation67_spill]] %s6814_s21 }
  0x24   :  { %s6829_s14 = sld [smem:[%s7587_s0 + %s6658_s28]]   ;;  %s6662_s28 = smov 25  }
  0x25   :  { %7634 = sst [smem:[#allocation68_spill]] %s6819_s13 }
  0x26   :  { %s6834_s21 = sld [smem:[%s7587_s0 + %s6659_s7]]   ;;  %s6663_s7 = smov 26  }
  0x27   :  { %s6839_s13 = sld [smem:[%s7587_s0 + %s6660_s15]]   ;;  %s6664_s15 = smov 27  }
  0x28   :  { %7635 = sst [smem:[#allocation69_spill]] %s6824_s6 }
  0x29   :  { %s6844_s27 = sld [smem:[%s7587_s0 + %s6661_s22]]   ;;  %s6665_s22 = smov 28  }
  0x2a   :  { %7636 = sst [smem:[#allocation70_spill]] %s6829_s14 }
  0x2b   :  { %s6849_s14 = sld [smem:[%s7587_s0 + %s6662_s28]]   ;;  %s6666_s28 = smov 29  }
  0x2c   :  { %s6854_s12 = sld [smem:[%s7587_s0 + %s6663_s7]]   ;;  %s6667_s7 = smov 30  }
  0x2d   :  { %7637 = sst [smem:[#allocation71_spill]] %s6839_s13 }
  0x2e   :  { %s6859_s13 = sld [smem:[%s7587_s0 + %s6664_s15]]   ;;  %s6668_s15 = smov 31  }
  0x2f   :  { %7638 = sst [smem:[#allocation72_spill]] %s6844_s27 }
  0x30   :  { %s6864_s27 = sld [smem:[%s7587_s0 + %s6665_s22]]   ;;  %s6669_s22 = smov 32  }
  0x31   :  { %s6869_s24 = sld [smem:[%s7587_s0 + %s6666_s28]]   ;;  %s6670_s28 = smov 33  }
  0x32   :  { %7639 = sst [smem:[#allocation73_spill]] %s6854_s12 }
  0x33   :  { %s6874_s12 = sld [smem:[%s7587_s0 + %s6667_s7]]   ;;  %s6671_s7 = smov 34  }
  0x34   :  { %7640 = sst [smem:[#allocation74_spill]] %s6859_s13 }
  0x35   :  { %s6879_s8 = sld [smem:[%s7587_s0 + %s6668_s15]]   ;;  %s6672_s15 = smov 35  }
  0x36   :  { %7641 = sst [smem:[#allocation75_spill]] %s6864_s27 }
  0x37   :  { %7642 = sst [smem:[#allocation76_spill]] %s6869_s24 }
  0x38   :  { %s6884_s27 = sld [smem:[%s7587_s0 + %s6669_s22]]   ;;  %s6673_s22 = smov 36  }
  0x39   :  { %7643 = sst [smem:[#allocation77_spill]] %s6874_s12 }
  0x3a   :  { %s6889_s24 = sld [smem:[%s7587_s0 + %s6670_s28]]   ;;  %s6674_s28 = smov 37  }
  0x3b   :  { %7644 = sst [smem:[#allocation78_spill]] %s6879_s8 }
  0x3c   :  { %s6894_s12 = sld [smem:[%s7587_s0 + %s6671_s7]]   ;;  %s6675_s7 = smov 38  }
  0x3d   :  { %s6899_s8 = sld [smem:[%s7587_s0 + %s6672_s15]]   ;;  %s6676_s15 = smov 39  }
  0x3e   :  { %7645 = sst [smem:[#allocation79_spill]] %s6884_s27 }
  0x3f   :  { %s6904_s27 = sld [smem:[%s7587_s0 + %s6673_s22]]   ;;  %s6677_s22 = smov 40  }
  0x40   :  { %7646 = sst [smem:[#allocation80_spill]] %s6889_s24 }
  0x41   :  { %s6909_s24 = sld [smem:[%s7587_s0 + %s6674_s28]]   ;;  %s6678_s28 = smov 41  }
  0x42   :  { %7647 = sst [smem:[#allocation81_spill]] %s6894_s12 }
  0x43   :  { %7648 = sst [smem:[#allocation82_spill]] %s6899_s8 }
  0x44   :  { %s6914_s12 = sld [smem:[%s7587_s0 + %s6675_s7]]   ;;  %s6679_s7 = smov 42  }
  0x45   :  { %7649 = sst [smem:[#allocation83_spill]] %s6904_s27 }
  0x46   :  { %s6919_s29 = sld [smem:[%s7587_s0 + %s6676_s15]]   ;;  %s6680_s15 = smov 43  }
  0x47   :  { %7650 = sst [smem:[#allocation84_spill]] %s6909_s24 }
  0x48   :  { %s6924_s27 = sld [smem:[%s7587_s0 + %s6677_s22]]   ;;  %s6681_s22 = smov 44  }
  0x49   :  { %s6929_s24 = sld [smem:[%s7587_s0 + %s6678_s28]]   ;;  %s6682_s28 = smov 45  }
  0x4a   :  { %7651 = sst [smem:[#allocation85_spill]] %s6914_s12 }
  0x4b   :  { %s6934_s12 = sld [smem:[%s7587_s0 + %s6679_s7]]  }
  0x4c   :  { %7652 = sst [smem:[#allocation86_spill]] %s6919_s29 }
  0x4d   :  { %s6939_s29 = sld [smem:[%s7587_s0 + %s6680_s15]]  }
  0x4e   :  { %7653 = sst [smem:[#allocation87_spill]] %s6924_s27 }
  0x4f   :  { %7654 = sst [smem:[#allocation88_spill]] %s6929_s24 }
  0x50   :  { %s6944_s27 = sld [smem:[%s7587_s0 + %s6681_s22]]  }
  0x51   :  { %s6949_s24 = sld [smem:[%s7587_s0 + %s6682_s28]]  }
  0x52   :  { %96 = vsyncpa [#allocation4], 0 }
  0x53   :  { %97 = vsyncpa [#allocation6], 0 }
  0x54   :  { %98 = vsyncpa [#allocation9], 0 }
  0x55   :  { %99 = vsyncpa [#allocation12], 0 }
  0x56   :  { %100 = vsyncpa [#allocation15], 0 }
  0x57   :  { %101 = vsyncpa [#allocation18], 0 }
  0x58   :  { %102 = vsyncpa [#allocation21], 0 }
  0x59   :  { %103 = vsyncpa [#allocation24], 0 }
  0x5a   :  { %104 = vsyncpa [#allocation27], 0 }
  0x5b   :  { %105 = vsyncpa [#allocation30], 0 }
  0x5c   :  { %106 = vsyncpa [#allocation33], 0 }
  0x5d   :  { %107 = vsyncpa [#allocation36], 0 }
  0x5e   :  { %108 = vsyncpa [#allocation39], 0  ;;  %s6951_s7 = smov 0  }
  0x5f LB: > { %s7655_s13 = sld [smem:[#allocation74_spill]]  ;;  %s7656_s9 = sld [smem:[#allocation55_spill]]  ;;  %s6636_s7 = sphi %s6951_s7, %s114_s7  }
  0x60   : > { %s7657_s8 = sld [smem:[#allocation82_spill]]  ;;  %s7658_s6 = sld [smem:[#allocation69_spill]] }
  0x61   : > { %s7659_s5 = sld [smem:[#allocation54_spill]]  ;;  %s7660_s4 = sld [smem:[#allocation66_spill]] }
  0x62   : > { %s7661_s3 = sld [smem:[#allocation59_spill]]  ;;  %s6683_s0 = smov [#allocation5]  }
  0x63   : > { %s1108_s10 = sshll.u32 %s6683_s0, 4  ;;  %s6957_s11 = sadd.s32 4294967295, %s6636_s7   ;;  %s6963_s10 = int_to_ptr.vmem [resolvable:$true] %s1108_s10 }
  0x64   : > { %p4771_p0 = scmp.ge.s32.totalorder %s6636_s7, 1  ;;  %p1085_p1 = scmp.lt.s32.totalorder %s6636_s7, 7 }
  0x65   : > { %p7605_p3 = scmp.eq.s32.totalorder %s6957_s11, 0  ;;  %s6684_s16 = smov [#allocation8]  }
  0x66   : > { %p6965_p4 = pnand %p4771_p0, %p1085_p1  ;;  %s1138_s18 = sshll.u32 %s6684_s16, 4  ;;  %s6971_s18 = int_to_ptr.vmem [resolvable:$true] %s1138_s18 }
  0x67   : > { %s6685_s23 = smov [#allocation11]   ;;  %s6686_s28 = smov [#allocation14]  }
  0x68   : > { %s7662_s15 = scalar_select %p6965_p4, 1, 0 }
  0x69   : > { %p5288_p5 = pneg %p6965_p4  ;;  %s1163_s26 = sshll.u32 %s6685_s23, 4  ;;  %s6979_s26 = int_to_ptr.vmem [resolvable:$true] %s1163_s26 }
  0x6a   : > { %s6981_s1 = sshll.u32 %s6686_s28, 4  ;;  %s5878_s2 = scalar_lea.hbm %s7656_s9, 256  ;;  %s1189_s1 = int_to_ptr.vmem [resolvable:$true] %s6981_s1 }
  0x6b   : > { %p6975_p6 = pnand %p7605_p3, %p5288_p5  ;;  %p5879_p7 = scmp.ne.s32.totalorder %s7656_s9, %s5878_s2 }
  0x6c   : > { %p5885_p11 = scmp.lt.u32.totalorder %s5878_s2, %s7656_s9 }
  0x6d   : > { %p6987_p8 = pneg %p6975_p6 }
  0x6f   : > { %p5881_p9 = pnand %p6987_p8, %p5879_p7 }
  0x71   : > { %p5882_p10 = pneg %p5881_p9 }
  0x73   : > { %p5887_p12 = pnand %p5885_p11, %p5882_p10 }
  0x75   : > { %5890 = shalt.err (!%p5887_p12)
}
  0x76   : > { %s5891_s16 = scalar_lea.vmem %s6963_s10, 256  ;;  %p5899_p5 = scmp.lt.s32.totalorder %s6963_s10, %s6963_s10 }
  0x77   : > { %p5892_p13 = scmp.ne.s32.totalorder %s6963_s10, %s5891_s16  ;;  %p5900_p2 = scmp.lt.s32.totalorder %s5891_s16, %s5891_s16 }
  0x79   : > { %p5894_p0 = pnand %p5892_p13, %p6987_p8  ;;  %p5901_p3 = por %p5900_p2, %p5899_p5 }
  0x7b   : > { %p5895_p1 = pneg %p5894_p0 }
  0x7d   : > { %p5902_p4 = pnand %p5901_p3, %p5895_p1 }
  0x7f   : > { %5905 = shalt.err (!%p5902_p4)
}
  0x80   : > { %s7607_s23 = smov 128   ;;  %s7610_s28 = smov 8  }
  0x81   : > { %5294 = dma.hbm_to_vmem [thread:$0]  (!%p6975_p6), %s7656_s9, 256, %s6963_s10, [#allocation6], %s7607_s23, %s7607_s23, %s7610_s28  }
  0x82   : > { %s5906_s2 = scalar_lea.hbm %s6749_s25, 2048 }
  0x83   : > { %p5907_p7 = scmp.ne.s32.totalorder %s6749_s25, %s5906_s2  ;;  %p5913_p4 = scmp.lt.u32.totalorder %s5906_s2, %s6749_s25 }
  0x85   : > { %p5909_p2 = pnand %p5907_p7, %p6987_p8 }
  0x87   : > { %p5910_p3 = pneg %p5909_p2 }
  0x89   : > { %p5915_p9 = pnand %p5913_p4, %p5910_p3 }
  0x8b   : > { %5918 = shalt.err (!%p5915_p9)
}
  0x8c   : > { %s5919_s16 = scalar_lea.vmem %s6971_s18, 2048  ;;  %p5927_p13 = scmp.lt.s32.totalorder %s6971_s18, %s6971_s18 }
  0x8d   : > { %p5920_p10 = scmp.ne.s32.totalorder %s6971_s18, %s5919_s16  ;;  %p5928_p0 = scmp.lt.s32.totalorder %s5919_s16, %s5919_s16 }
  0x8f   : > { %p5922_p11 = pnand %p5920_p10, %p6987_p8  ;;  %p5929_p1 = por %p5928_p0, %p5927_p13 }
  0x91   : > { %p5923_p12 = pneg %p5922_p11 }
  0x93   : > { %p5930_p5 = pnand %p5929_p1, %p5923_p12 }
  0x95   : > { %5933 = shalt.err (!%p5930_p5)
}
  0x96   : > { %5300 = dma.hbm_to_vmem [thread:$0]  (!%p6975_p6), %s6749_s25, 2048, %s6971_s18, [#allocation9], %s7607_s23, %s7607_s23, %s7610_s28  }
  0x97   : > { %s5934_s10 = scalar_lea.hbm %s7661_s3, 32 }
  0x98   : > { %p5935_p7 = scmp.ne.s32.totalorder %s7661_s3, %s5934_s10  ;;  %p5941_p4 = scmp.lt.u32.totalorder %s5934_s10, %s7661_s3 }
  0x9a   : > { %p5937_p2 = pnand %p5935_p7, %p6987_p8 }
  0x9c   : > { %p5938_p3 = pneg %p5937_p2 }
  0x9e   : > { %p5943_p9 = pnand %p5941_p4, %p5938_p3 }
  0xa0   : > { %5946 = shalt.err (!%p5943_p9)
}
  0xa1   : > { %s5947_s2 = scalar_lea.vmem %s6979_s26, 32  ;;  %p5955_p13 = scmp.lt.s32.totalorder %s6979_s26, %s6979_s26 }
  0xa2   : > { %p5948_p10 = scmp.ne.s32.totalorder %s6979_s26, %s5947_s2  ;;  %p5956_p0 = scmp.lt.s32.totalorder %s5947_s2, %s5947_s2 }
  0xa4   : > { %p5950_p11 = pnand %p5948_p10, %p6987_p8  ;;  %p5957_p1 = por %p5956_p0, %p5955_p13 }
  0xa6   : > { %p5951_p12 = pneg %p5950_p11 }
  0xa8   : > { %p5958_p5 = pnand %p5957_p1, %p5951_p12 }
  0xaa   : > { %5961 = shalt.err (!%p5958_p5)
}
  0xab   : > { %5306 = dma.hbm_to_vmem [thread:$0]  (!%p6975_p6), %s7661_s3, 32, %s6979_s26, [#allocation12]  }
  0xac   : > { %s5962_s18 = scalar_lea.hbm %s6774_s19, 32 }
  0xad   : > { %p5963_p7 = scmp.ne.s32.totalorder %s6774_s19, %s5962_s18  ;;  %p5969_p4 = scmp.lt.u32.totalorder %s5962_s18, %s6774_s19 }
  0xaf   : > { %p5965_p2 = pnand %p5963_p7, %p6987_p8 }
  0xb1   : > { %p5966_p3 = pneg %p5965_p2 }
  0xb3   : > { %p5971_p9 = pnand %p5969_p4, %p5966_p3 }
  0xb5   : > { %5974 = shalt.err (!%p5971_p9)
}
  0xb6   : > { %s5975_s16 = scalar_lea.vmem %s1189_s1, 32  ;;  %p5983_p13 = scmp.lt.s32.totalorder %s1189_s1, %s1189_s1 }
  0xb7   : > { %p5976_p10 = scmp.ne.s32.totalorder %s1189_s1, %s5975_s16  ;;  %p5984_p0 = scmp.lt.s32.totalorder %s5975_s16, %s5975_s16 }
  0xb9   : > { %p5978_p11 = pnand %p5976_p10, %p6987_p8  ;;  %p5985_p1 = por %p5984_p0, %p5983_p13 }
  0xbb   : > { %p5979_p12 = pneg %p5978_p11 }
  0xbd   : > { %p5986_p5 = pnand %p5985_p1, %p5979_p12 }
  0xbf   : > { %5989 = shalt.err (!%p5986_p5)
}
  0xc0   : > { %5312 = dma.hbm_to_vmem [thread:$0]  (!%p6975_p6), %s6774_s19, 32, %s1189_s1, [#allocation15]  }
  0xc1   : > { %s6689_s26 = smov [#allocation17]   ;;  %s6690_s2 = smov [#allocation20]  }
  0xc2   : > { %s1210_s10 = sshll.u32 %s6689_s26, 4  ;;  %s1234_s18 = sshll.u32 %s6690_s2, 4  ;;  %s1211_s10 = int_to_ptr.vmem [resolvable:$true] %s1210_s10  ;;  %s1235_s18 = int_to_ptr.vmem [resolvable:$true] %s1234_s18 }
  0xc3   : > { %s5990_s23 = scalar_lea.hbm %s6784_s30, 32 }
  0xc4   : > { %p5991_p7 = scmp.ne.s32.totalorder %s6784_s30, %s5990_s23  ;;  %p5997_p4 = scmp.lt.u32.totalorder %s5990_s23, %s6784_s30 }
  0xc6   : > { %p5993_p2 = pnand %p5991_p7, %p6987_p8 }
  0xc8   : > { %p5994_p3 = pneg %p5993_p2 }
  0xca   : > { %p5999_p9 = pnand %p5997_p4, %p5994_p3 }
  0xcc   : > { %6002 = shalt.err (!%p5999_p9)
}
  0xcd   : > { %s6003_s16 = scalar_lea.vmem %s1211_s10, 32  ;;  %p6011_p13 = scmp.lt.s32.totalorder %s1211_s10, %s1211_s10 }
  0xce   : > { %p6004_p10 = scmp.ne.s32.totalorder %s1211_s10, %s6003_s16  ;;  %p6012_p0 = scmp.lt.s32.totalorder %s6003_s16, %s6003_s16 }
  0xd0   : > { %p6006_p11 = pnand %p6004_p10, %p6987_p8  ;;  %p6013_p1 = por %p6012_p0, %p6011_p13 }
  0xd2   : > { %p6007_p12 = pneg %p6006_p11 }
  0xd4   : > { %p6014_p5 = pnand %p6013_p1, %p6007_p12 }
  0xd6   : > { %6017 = shalt.err (!%p6014_p5)
}
  0xd7   : > { %5318 = dma.hbm_to_vmem [thread:$0]  (!%p6975_p6), %s6784_s30, 32, %s1211_s10, [#allocation18]  }
  0xd8   : > { %s6018_s1 = scalar_lea.hbm %s6799_s20, 2048 }
  0xd9   : > { %p6019_p7 = scmp.ne.s32.totalorder %s6799_s20, %s6018_s1  ;;  %p6025_p4 = scmp.lt.u32.totalorder %s6018_s1, %s6799_s20 }
  0xdb   : > { %p6021_p2 = pnand %p6019_p7, %p6987_p8 }
  0xdd   : > { %p6022_p3 = pneg %p6021_p2 }
  0xdf   : > { %p6027_p9 = pnand %p6025_p4, %p6022_p3 }
  0xe1   : > { %6030 = shalt.err (!%p6027_p9)
}
  0xe2   : > { %s6031_s23 = scalar_lea.vmem %s1235_s18, 2048  ;;  %p6039_p13 = scmp.lt.s32.totalorder %s1235_s18, %s1235_s18 }
  0xe3   : > { %p6032_p10 = scmp.ne.s32.totalorder %s1235_s18, %s6031_s23  ;;  %p6040_p0 = scmp.lt.s32.totalorder %s6031_s23, %s6031_s23 }
  0xe5   : > { %p6034_p11 = pnand %p6032_p10, %p6987_p8  ;;  %p6041_p1 = por %p6040_p0, %p6039_p13 }
  0xe7   : > { %p6035_p12 = pneg %p6034_p11 }
  0xe9   : > { %p6042_p5 = pnand %p6041_p1, %p6035_p12 }
  0xeb   : > { %6045 = shalt.err (!%p6042_p5)
}
  0xec   : > { %s7665_s26 = smov 128   ;;  %s6691_s10 = smov [#allocation23]  }
  0xed   : > { %5324 = dma.hbm_to_vmem [thread:$0]  (!%p6975_p6), %s6799_s20, 2048, %s1235_s18, [#allocation21], %s7665_s26, %s7665_s26, %s7610_s28  }
  0xee   : > { %s1259_s2 = sshll.u32 %s6691_s10, 4  ;;  %s6692_s16 = smov [#allocation26]   ;;  %s1260_s2 = int_to_ptr.vmem [resolvable:$true] %s1259_s2 }
  0xef   : > { %s1284_s1 = sshll.u32 %s6692_s16, 4  ;;  %s6046_s23 = scalar_lea.hbm %s7660_s4, 32  ;;  %s1285_s1 = int_to_ptr.vmem [resolvable:$true] %s1284_s1 }
  0xf0   : > { %p6047_p7 = scmp.ne.s32.totalorder %s7660_s4, %s6046_s23  ;;  %p6053_p4 = scmp.lt.u32.totalorder %s6046_s23, %s7660_s4 }
  0xf2   : > { %p6049_p2 = pnand %p6047_p7, %p6987_p8 }
  0xf4   : > { %p6050_p3 = pneg %p6049_p2 }
  0xf6   : > { %p6055_p9 = pnand %p6053_p4, %p6050_p3 }
  0xf8   : > { %6058 = shalt.err (!%p6055_p9)
}
  0xf9   : > { %s6059_s3 = scalar_lea.vmem %s1260_s2, 32  ;;  %p6067_p13 = scmp.lt.s32.totalorder %s1260_s2, %s1260_s2 }
  0xfa   : > { %p6060_p10 = scmp.ne.s32.totalorder %s1260_s2, %s6059_s3  ;;  %p6068_p0 = scmp.lt.s32.totalorder %s6059_s3, %s6059_s3 }
  0xfc   : > { %p6062_p11 = pnand %p6060_p10, %p6987_p8  ;;  %p6069_p1 = por %p6068_p0, %p6067_p13 }
  0xfe   : > { %p6063_p12 = pneg %p6062_p11 }
 0x100   : > { %p6070_p5 = pnand %p6069_p1, %p6063_p12 }
 0x102   : > { %6073 = shalt.err (!%p6070_p5)
}
 0x103   : > { %5330 = dma.hbm_to_vmem [thread:$0]  (!%p6975_p6), %s7660_s4, 32, %s1260_s2, [#allocation24]  }
 0x104   : > { %s6074_s18 = scalar_lea.hbm %s7658_s6, 32 }
 0x105   : > { %p6075_p7 = scmp.ne.s32.totalorder %s7658_s6, %s6074_s18  ;;  %p6081_p4 = scmp.lt.u32.totalorder %s6074_s18, %s7658_s6 }
 0x107   : > { %p6077_p2 = pnand %p6075_p7, %p6987_p8 }
 0x109   : > { %p6078_p3 = pneg %p6077_p2 }
 0x10b   : > { %p6083_p9 = pnand %p6081_p4, %p6078_p3 }
 0x10d   : > { %6086 = shalt.err (!%p6083_p9)
}
 0x10e   : > { %s6087_s3 = scalar_lea.vmem %s1285_s1, 32  ;;  %p6095_p13 = scmp.lt.s32.totalorder %s1285_s1, %s1285_s1 }
 0x10f   : > { %p6088_p10 = scmp.ne.s32.totalorder %s1285_s1, %s6087_s3  ;;  %p6096_p0 = scmp.lt.s32.totalorder %s6087_s3, %s6087_s3 }
 0x111   : > { %p6090_p11 = pnand %p6088_p10, %p6987_p8  ;;  %p6097_p1 = por %p6096_p0, %p6095_p13 }
 0x113   : > { %p6091_p12 = pneg %p6090_p11 }
 0x115   : > { %p6098_p5 = pnand %p6097_p1, %p6091_p12 }
 0x117   : > { %6101 = shalt.err (!%p6098_p5)
}
 0x118   : > { %5336 = dma.hbm_to_vmem [thread:$0]  (!%p6975_p6), %s7658_s6, 32, %s1285_s1, [#allocation27]  }
 0x119   : > { %s6693_s10 = smov [#allocation29]   ;;  %s6694_s16 = smov [#allocation32]  }
 0x11a   : > { %s1306_s2 = sshll.u32 %s6693_s10, 4  ;;  %s1330_s23 = sshll.u32 %s6694_s16, 4  ;;  %s1307_s2 = int_to_ptr.vmem [resolvable:$true] %s1306_s2  ;;  %s1331_s23 = int_to_ptr.vmem [resolvable:$true] %s1330_s23 }
 0x11b   : > { %s6102_s18 = scalar_lea.hbm %s6834_s21, 32 }
 0x11c   : > { %p6103_p7 = scmp.ne.s32.totalorder %s6834_s21, %s6102_s18  ;;  %p6109_p4 = scmp.lt.u32.totalorder %s6102_s18, %s6834_s21 }
 0x11e   : > { %p6105_p2 = pnand %p6103_p7, %p6987_p8 }
 0x120   : > { %p6106_p3 = pneg %p6105_p2 }
 0x122   : > { %p6111_p9 = pnand %p6109_p4, %p6106_p3 }
 0x124   : > { %6114 = shalt.err (!%p6111_p9)
}
 0x125   : > { %s6115_s3 = scalar_lea.vmem %s1307_s2, 32  ;;  %p6123_p13 = scmp.lt.s32.totalorder %s1307_s2, %s1307_s2 }
 0x126   : > { %p6116_p10 = scmp.ne.s32.totalorder %s1307_s2, %s6115_s3  ;;  %p6124_p0 = scmp.lt.s32.totalorder %s6115_s3, %s6115_s3 }
 0x128   : > { %p6118_p11 = pnand %p6116_p10, %p6987_p8  ;;  %p6125_p1 = por %p6124_p0, %p6123_p13 }
 0x12a   : > { %p6119_p12 = pneg %p6118_p11 }
 0x12c   : > { %p6126_p5 = pnand %p6125_p1, %p6119_p12 }
 0x12e   : > { %6129 = shalt.err (!%p6126_p5)
}
 0x12f   : > { %5342 = dma.hbm_to_vmem [thread:$0]  (!%p6975_p6), %s6834_s21, 32, %s1307_s2, [#allocation30]  }
 0x130   : > { %s6130_s1 = scalar_lea.hbm %s6849_s14, 2048 }
 0x131   : > { %p6131_p7 = scmp.ne.s32.totalorder %s6849_s14, %s6130_s1  ;;  %p6137_p4 = scmp.lt.u32.totalorder %s6130_s1, %s6849_s14 }
 0x133   : > { %p6133_p2 = pnand %p6131_p7, %p6987_p8 }
 0x135   : > { %p6134_p3 = pneg %p6133_p2 }
 0x137   : > { %p6139_p9 = pnand %p6137_p4, %p6134_p3 }
 0x139   : > { %6142 = shalt.err (!%p6139_p9)
}
 0x13a   : > { %s6143_s10 = scalar_lea.vmem %s1331_s23, 2048  ;;  %p6151_p13 = scmp.lt.s32.totalorder %s1331_s23, %s1331_s23 }
 0x13b   : > { %p6144_p10 = scmp.ne.s32.totalorder %s1331_s23, %s6143_s10  ;;  %p6152_p0 = scmp.lt.s32.totalorder %s6143_s10, %s6143_s10 }
 0x13d   : > { %p6146_p11 = pnand %p6144_p10, %p6987_p8  ;;  %p6153_p1 = por %p6152_p0, %p6151_p13 }
 0x13f   : > { %p6147_p12 = pneg %p6146_p11 }
 0x141   : > { %p6154_p5 = pnand %p6153_p1, %p6147_p12 }
 0x143   : > { %6157 = shalt.err (!%p6154_p5)
}
 0x144   : > { %5348 = dma.hbm_to_vmem [thread:$0]  (!%p6975_p6), %s6849_s14, 2048, %s1331_s23, [#allocation33], %s7665_s26, %s7665_s26, %s7610_s28  }
 0x145   : > { %s6695_s2 = smov [#allocation35]   ;;  %s6696_s18 = smov [#allocation38]  }
 0x146   : > { %s1355_s16 = sshll.u32 %s6695_s2, 4  ;;  %s1394_s3 = sshll.u32 %s6696_s18, 4  ;;  %s1356_s16 = int_to_ptr.vmem [resolvable:$true] %s1355_s16  ;;  %s1395_s3 = int_to_ptr.vmem [resolvable:$true] %s1394_s3 }
 0x147   : > { %s6158_s1 = scalar_lea.hbm %s7655_s13, 32 }
 0x148   : > { %p6159_p7 = scmp.ne.s32.totalorder %s7655_s13, %s6158_s1  ;;  %p6165_p4 = scmp.lt.u32.totalorder %s6158_s1, %s7655_s13 }
 0x14a   : > { %p6161_p2 = pnand %p6159_p7, %p6987_p8 }
 0x14c   : > { %p6162_p3 = pneg %p6161_p2 }
 0x14e   : > { %p6167_p9 = pnand %p6165_p4, %p6162_p3 }
 0x150   : > { %6170 = shalt.err (!%p6167_p9)
}
 0x151   : > { %s6171_s10 = scalar_lea.vmem %s1356_s16, 32  ;;  %p6179_p13 = scmp.lt.s32.totalorder %s1356_s16, %s1356_s16 }
 0x152   : > { %p6172_p10 = scmp.ne.s32.totalorder %s1356_s16, %s6171_s10  ;;  %p6180_p0 = scmp.lt.s32.totalorder %s6171_s10, %s6171_s10 }
 0x154   : > { %p6174_p11 = pnand %p6172_p10, %p6987_p8  ;;  %p6181_p1 = por %p6180_p0, %p6179_p13 }
 0x156   : > { %p6175_p12 = pneg %p6174_p11 }
 0x158   : > { %p6182_p5 = pnand %p6181_p1, %p6175_p12 }
 0x15a   : > { %6185 = shalt.err (!%p6182_p5)
}
 0x15b   : > { %5354 = dma.hbm_to_vmem [thread:$0]  (!%p6975_p6), %s7655_s13, 32, %s1356_s16, [#allocation36]  }
 0x15c   : > { %s6186_s23 = scalar_lea.hbm %s7657_s8, 1024 }
 0x15d   : > { %p6187_p7 = scmp.ne.s32.totalorder %s7657_s8, %s6186_s23  ;;  %p6193_p4 = scmp.lt.u32.totalorder %s6186_s23, %s7657_s8 }
 0x15f   : > { %p6189_p2 = pnand %p6187_p7, %p6987_p8 }
 0x161   : > { %p6190_p3 = pneg %p6189_p2 }
 0x163   : > { %p6195_p9 = pnand %p6193_p4, %p6190_p3 }
 0x165   : > { %6198 = shalt.err (!%p6195_p9)
}
 0x166   : > { %s6199_s2 = scalar_lea.vmem %s1395_s3, 1024  ;;  %p6207_p13 = scmp.lt.s32.totalorder %s1395_s3, %s1395_s3 }
 0x167   : > { %p6200_p10 = scmp.ne.s32.totalorder %s1395_s3, %s6199_s2  ;;  %p6208_p0 = scmp.lt.s32.totalorder %s6199_s2, %s6199_s2 }
 0x169   : > { %p6202_p11 = pnand %p6200_p10, %p6987_p8  ;;  %p6209_p1 = por %p6208_p0, %p6207_p13 }
 0x16b   : > { %p6203_p12 = pneg %p6202_p11 }
 0x16d   : > { %p6210_p5 = pnand %p6209_p1, %p6203_p12 }
 0x16f   : > { %6213 = shalt.err (!%p6210_p5)
}
 0x170   : > { %5360 = dma.hbm_to_vmem [thread:$0]  (!%p6975_p6), %s7657_s8, 1024, %s1395_s3, [#allocation39], %s7665_s26, %s7665_s26, %s7610_s28  }
 0x171   : > { %s6697_s16 = smov [#allocation3]   ;;  %s6698_s1 = smov [#allocation7]  }
 0x172   : > { %s1098_s18 = sshll.u32 %s6697_s16, 4  ;;  %s1125_s10 = sshll.u32 %s6698_s1, 4  ;;  %s1099_s18 = int_to_ptr.vmem [resolvable:$true] %s1098_s18  ;;  %s1126_s10 = int_to_ptr.vmem [resolvable:$true] %s1125_s10 }
 0x173   : > { %s6214_s23 = scalar_lea.hbm %s7659_s5, 128 }
 0x174   : > { %p6215_p7 = scmp.ne.s32.totalorder %s7659_s5, %s6214_s23  ;;  %p6221_p4 = scmp.lt.u32.totalorder %s6214_s23, %s7659_s5 }
 0x176   : > { %p6217_p2 = pnand %p6215_p7, %p6987_p8 }
 0x178   : > { %p6218_p3 = pneg %p6217_p2 }
 0x17a   : > { %p6223_p9 = pnand %p6221_p4, %p6218_p3 }
 0x17c   : > { %6226 = shalt.err (!%p6223_p9)
}
 0x17d   : > { %s6227_s2 = scalar_lea.vmem %s1099_s18, 128  ;;  %p6235_p13 = scmp.lt.s32.totalorder %s1099_s18, %s1099_s18 }
 0x17e   : > { %p6228_p10 = scmp.ne.s32.totalorder %s1099_s18, %s6227_s2  ;;  %p6236_p0 = scmp.lt.s32.totalorder %s6227_s2, %s6227_s2 }
 0x180   : > { %p6230_p11 = pnand %p6228_p10, %p6987_p8  ;;  %p6237_p1 = por %p6236_p0, %p6235_p13 }
 0x182   : > { %p6231_p12 = pneg %p6230_p11 }
 0x184   : > { %p6238_p5 = pnand %p6237_p1, %p6231_p12 }
 0x186   : > { %6241 = shalt.err (!%p6238_p5)
}
 0x187   : > { %5291 = dma.hbm_to_vmem [thread:$0]  (!%p6975_p6), %s7659_s5, 128, %s1099_s18, [#allocation4]  }
 0x188   : > { %s6242_s3 = scalar_lea.hbm %s6739_s17, 64 }
 0x189   : > { %p6243_p7 = scmp.ne.s32.totalorder %s6739_s17, %s6242_s3  ;;  %p6249_p4 = scmp.lt.u32.totalorder %s6242_s3, %s6739_s17 }
 0x18b   : > { %p6245_p2 = pnand %p6243_p7, %p6987_p8 }
 0x18d   : > { %p6246_p3 = pneg %p6245_p2 }
 0x18f   : > { %p6251_p9 = pnand %p6249_p4, %p6246_p3 }
 0x191   : > { %6254 = shalt.err (!%p6251_p9)
}
 0x192   : > { %s6255_s16 = scalar_lea.vmem %s1126_s10, 64  ;;  %p6263_p13 = scmp.lt.s32.totalorder %s1126_s10, %s1126_s10 }
 0x193   : > { %p6256_p10 = scmp.ne.s32.totalorder %s1126_s10, %s6255_s16  ;;  %p6264_p0 = scmp.lt.s32.totalorder %s6255_s16, %s6255_s16 }
 0x195   : > { %p6258_p11 = pnand %p6256_p10, %p6987_p8  ;;  %p6265_p1 = por %p6264_p0, %p6263_p13 }
 0x197   : > { %p6259_p12 = pneg %p6258_p11 }
 0x199   : > { %p6266_p5 = pnand %p6265_p1, %p6259_p12 }
 0x19b   : > { %6269 = shalt.err (!%p6266_p5)
}
 0x19c   : > { %s7666_s18 = sld [smem:[#allocation58_spill]]  ;;  %s6699_s1 = smov [#allocation10]  }
 0x19d   : > { %5297 = dma.hbm_to_vmem [thread:$0]  (!%p6975_p6), %s6739_s17, 64, %s1126_s10, [#allocation6]  }
 0x19e   : > { %s1152_s23 = sshll.u32 %s6699_s1, 4  ;;  %s6700_s2 = smov [#allocation13]   ;;  %s1153_s23 = int_to_ptr.vmem [resolvable:$true] %s1152_s23 }
 0x19f   : > { %s1174_s3 = sshll.u32 %s6700_s2, 4  ;;  %s1175_s3 = int_to_ptr.vmem [resolvable:$true] %s1174_s3 }
 0x1a2   : > { %s6270_s28 = scalar_lea.hbm %s7666_s18, 32 }
 0x1a3   : > { %p6271_p7 = scmp.ne.s32.totalorder %s7666_s18, %s6270_s28  ;;  %p6277_p4 = scmp.lt.u32.totalorder %s6270_s28, %s7666_s18 }
 0x1a5   : > { %p6273_p2 = pnand %p6271_p7, %p6987_p8 }
 0x1a7   : > { %p6274_p3 = pneg %p6273_p2 }
 0x1a9   : > { %p6279_p9 = pnand %p6277_p4, %p6274_p3 }
 0x1ab   : > { %6282 = shalt.err (!%p6279_p9)
}
 0x1ac   : > { %s6283_s16 = scalar_lea.vmem %s1153_s23, 32  ;;  %p6291_p13 = scmp.lt.s32.totalorder %s1153_s23, %s1153_s23 }
 0x1ad   : > { %p6284_p10 = scmp.ne.s32.totalorder %s1153_s23, %s6283_s16  ;;  %p6292_p0 = scmp.lt.s32.totalorder %s6283_s16, %s6283_s16 }
 0x1af   : > { %p6286_p11 = pnand %p6284_p10, %p6987_p8  ;;  %p6293_p1 = por %p6292_p0, %p6291_p13 }
 0x1b1   : > { %p6287_p12 = pneg %p6286_p11 }
 0x1b3   : > { %p6294_p5 = pnand %p6293_p1, %p6287_p12 }
 0x1b5   : > { %6297 = shalt.err (!%p6294_p5)
}
 0x1b6   : > { %s7667_s10 = sld [smem:[#allocation60_spill]] }
 0x1b7   : > { %5303 = dma.hbm_to_vmem [thread:$0]  (!%p6975_p6), %s7666_s18, 32, %s1153_s23, [#allocation9]  }
 0x1bc   : > { %s6298_s28 = scalar_lea.hbm %s7667_s10, 32 }
 0x1bd   : > { %p6299_p7 = scmp.ne.s32.totalorder %s7667_s10, %s6298_s28  ;;  %p6305_p4 = scmp.lt.u32.totalorder %s6298_s28, %s7667_s10 }
 0x1bf   : > { %p6301_p2 = pnand %p6299_p7, %p6987_p8 }
 0x1c1   : > { %p6302_p3 = pneg %p6301_p2 }
 0x1c3   : > { %p6307_p9 = pnand %p6305_p4, %p6302_p3 }
 0x1c5   : > { %6310 = shalt.err (!%p6307_p9)
}
 0x1c6   : > { %s6311_s1 = scalar_lea.vmem %s1175_s3, 32  ;;  %p6319_p13 = scmp.lt.s32.totalorder %s1175_s3, %s1175_s3 }
 0x1c7   : > { %p6312_p10 = scmp.ne.s32.totalorder %s1175_s3, %s6311_s1  ;;  %p6320_p0 = scmp.lt.s32.totalorder %s6311_s1, %s6311_s1 }
 0x1c9   : > { %p6314_p11 = pnand %p6312_p10, %p6987_p8  ;;  %p6321_p1 = por %p6320_p0, %p6319_p13 }
 0x1cb   : > { %p6315_p12 = pneg %p6314_p11 }
 0x1cd   : > { %p6322_p5 = pnand %p6321_p1, %p6315_p12 }
 0x1cf   : > { %6325 = shalt.err (!%p6322_p5)
}
 0x1d0   : > { %s7668_s23 = sld [smem:[#allocation62_spill]]  ;;  %s6701_s2 = smov [#allocation16]  }
 0x1d1   : > { %5309 = dma.hbm_to_vmem [thread:$0]  (!%p6975_p6), %s7667_s10, 32, %s1175_s3, [#allocation12]  }
 0x1d2   : > { %s1199_s16 = sshll.u32 %s6701_s2, 4  ;;  %s6702_s28 = smov [#allocation19]   ;;  %s1200_s16 = int_to_ptr.vmem [resolvable:$true] %s1199_s16 }
 0x1d3   : > { %s1224_s4 = sshll.u32 %s6702_s28, 4  ;;  %s1225_s4 = int_to_ptr.vmem [resolvable:$true] %s1224_s4 }
 0x1d6   : > { %s6326_s5 = scalar_lea.hbm %s7668_s23, 32 }
 0x1d7   : > { %p6327_p7 = scmp.ne.s32.totalorder %s7668_s23, %s6326_s5  ;;  %p6333_p4 = scmp.lt.u32.totalorder %s6326_s5, %s7668_s23 }
 0x1d9   : > { %p6329_p2 = pnand %p6327_p7, %p6987_p8 }
 0x1db   : > { %p6330_p3 = pneg %p6329_p2 }
 0x1dd   : > { %p6335_p9 = pnand %p6333_p4, %p6330_p3 }
 0x1df   : > { %6338 = shalt.err (!%p6335_p9)
}
 0x1e0   : > { %s6339_s1 = scalar_lea.vmem %s1200_s16, 32  ;;  %p6347_p13 = scmp.lt.s32.totalorder %s1200_s16, %s1200_s16 }
 0x1e1   : > { %p6340_p10 = scmp.ne.s32.totalorder %s1200_s16, %s6339_s1  ;;  %p6348_p0 = scmp.lt.s32.totalorder %s6339_s1, %s6339_s1 }
 0x1e3   : > { %p6342_p11 = pnand %p6340_p10, %p6987_p8  ;;  %p6349_p1 = por %p6348_p0, %p6347_p13 }
 0x1e5   : > { %p6343_p12 = pneg %p6342_p11 }
 0x1e7   : > { %p6350_p5 = pnand %p6349_p1, %p6343_p12 }
 0x1e9   : > { %6353 = shalt.err (!%p6350_p5)
}
 0x1ea   : > { %s7669_s3 = sld [smem:[#allocation64_spill]] }
 0x1eb   : > { %5315 = dma.hbm_to_vmem [thread:$0]  (!%p6975_p6), %s7668_s23, 32, %s1200_s16, [#allocation15]  }
 0x1f0   : > { %s6354_s5 = scalar_lea.hbm %s7669_s3, 16 }
 0x1f1   : > { %p6355_p7 = scmp.ne.s32.totalorder %s7669_s3, %s6354_s5  ;;  %p6361_p4 = scmp.lt.u32.totalorder %s6354_s5, %s7669_s3 }
 0x1f3   : > { %p6357_p2 = pnand %p6355_p7, %p6987_p8 }
 0x1f5   : > { %p6358_p3 = pneg %p6357_p2 }
 0x1f7   : > { %p6363_p9 = pnand %p6361_p4, %p6358_p3 }
 0x1f9   : > { %6366 = shalt.err (!%p6363_p9)
}
 0x1fa   : > { %s6367_s2 = scalar_lea.vmem %s1225_s4, 16  ;;  %s6374_s28 = scalar_lea.vmem %s1225_s4, 32 }
 0x1fb   : > { %p6368_p10 = scmp.ne.s32.totalorder %s1225_s4, %s6367_s2  ;;  %p6375_p13 = scmp.lt.s32.totalorder %s1225_s4, %s1225_s4 }
 0x1fc   : > { %p6376_p0 = scmp.lt.s32.totalorder %s6374_s28, %s6367_s2 }
 0x1fd   : > { %p6370_p11 = pnand %p6368_p10, %p6987_p8 }
 0x1fe   : > { %p6377_p1 = por %p6376_p0, %p6375_p13 }
 0x1ff   : > { %p6371_p12 = pneg %p6370_p11 }
 0x201   : > { %p6378_p5 = pnand %p6377_p1, %p6371_p12 }
 0x203   : > { %6381 = shalt.err (!%p6378_p5)
}
 0x204   : > { %s7670_s16 = sld [smem:[#allocation65_spill]]  ;;  %s6703_s1 = smov [#allocation22]  }
 0x205   : > { %5321 = dma.hbm_to_vmem [thread:$0]  (!%p6975_p6), %s7669_s3, 16, %s1225_s4, [#allocation18]  }
 0x206   : > { %s1248_s5 = sshll.u32 %s6703_s1, 4  ;;  %s6704_s6 = smov [#allocation25]   ;;  %s1249_s5 = int_to_ptr.vmem [resolvable:$true] %s1248_s5 }
 0x207   : > { %s1270_s8 = sshll.u32 %s6704_s6, 4  ;;  %s1271_s8 = int_to_ptr.vmem [resolvable:$true] %s1270_s8 }
 0x20a   : > { %s6382_s9 = scalar_lea.hbm %s7670_s16, 32 }
 0x20b   : > { %p6383_p7 = scmp.ne.s32.totalorder %s7670_s16, %s6382_s9  ;;  %p6389_p4 = scmp.lt.u32.totalorder %s6382_s9, %s7670_s16 }
 0x20d   : > { %p6385_p2 = pnand %p6383_p7, %p6987_p8 }
 0x20f   : > { %p6386_p3 = pneg %p6385_p2 }
 0x211   : > { %p6391_p9 = pnand %p6389_p4, %p6386_p3 }
 0x213   : > { %6394 = shalt.err (!%p6391_p9)
}
 0x214   : > { %s6395_s2 = scalar_lea.vmem %s1249_s5, 32  ;;  %p6403_p13 = scmp.lt.s32.totalorder %s1249_s5, %s1249_s5 }
 0x215   : > { %p6396_p10 = scmp.ne.s32.totalorder %s1249_s5, %s6395_s2  ;;  %p6404_p0 = scmp.lt.s32.totalorder %s6395_s2, %s6395_s2 }
 0x217   : > { %p6398_p11 = pnand %p6396_p10, %p6987_p8  ;;  %p6405_p1 = por %p6404_p0, %p6403_p13 }
 0x219   : > { %p6399_p12 = pneg %p6398_p11 }
 0x21b   : > { %p6406_p5 = pnand %p6405_p1, %p6399_p12 }
 0x21d   : > { %6409 = shalt.err (!%p6406_p5)
}
 0x21e   : > { %s7671_s6 = sld [smem:[#allocation67_spill]] }
 0x21f   : > { %5327 = dma.hbm_to_vmem [thread:$0]  (!%p6975_p6), %s7670_s16, 32, %s1249_s5, [#allocation21]  }
 0x224   : > { %s6410_s9 = scalar_lea.hbm %s7671_s6, 32 }
 0x225   : > { %p6411_p7 = scmp.ne.s32.totalorder %s7671_s6, %s6410_s9  ;;  %p6417_p4 = scmp.lt.u32.totalorder %s6410_s9, %s7671_s6 }
 0x227   : > { %p6413_p2 = pnand %p6411_p7, %p6987_p8 }
 0x229   : > { %p6414_p3 = pneg %p6413_p2 }
 0x22b   : > { %p6419_p9 = pnand %p6417_p4, %p6414_p3 }
 0x22d   : > { %6422 = shalt.err (!%p6419_p9)
}
 0x22e   : > { %s6423_s4 = scalar_lea.vmem %s1271_s8, 32  ;;  %p6431_p13 = scmp.lt.s32.totalorder %s1271_s8, %s1271_s8 }
 0x22f   : > { %p6424_p10 = scmp.ne.s32.totalorder %s1271_s8, %s6423_s4  ;;  %p6432_p0 = scmp.lt.s32.totalorder %s6423_s4, %s6423_s4 }
 0x231   : > { %p6426_p11 = pnand %p6424_p10, %p6987_p8  ;;  %p6433_p1 = por %p6432_p0, %p6431_p13 }
 0x233   : > { %p6427_p12 = pneg %p6426_p11 }
 0x235   : > { %p6434_p5 = pnand %p6433_p1, %p6427_p12 }
 0x237   : > { %6437 = shalt.err (!%p6434_p5)
}
 0x238   : > { %s7672_s28 = sld [smem:[#allocation70_spill]]  ;;  %s6705_s1 = smov [#allocation28]  }
 0x239   : > { %5333 = dma.hbm_to_vmem [thread:$0]  (!%p6975_p6), %s7671_s6, 32, %s1271_s8, [#allocation24]  }
 0x23a   : > { %s1295_s5 = sshll.u32 %s6705_s1, 4  ;;  %s6706_s2 = smov [#allocation31]   ;;  %s1296_s5 = int_to_ptr.vmem [resolvable:$true] %s1295_s5 }
 0x23b   : > { %s1320_s9 = sshll.u32 %s6706_s2, 4  ;;  %s1321_s9 = int_to_ptr.vmem [resolvable:$true] %s1320_s9 }
 0x23e   : > { %s6438_s3 = scalar_lea.hbm %s7672_s28, 32 }
 0x23f   : > { %p6439_p7 = scmp.ne.s32.totalorder %s7672_s28, %s6438_s3  ;;  %p6445_p4 = scmp.lt.u32.totalorder %s6438_s3, %s7672_s28 }
 0x241   : > { %p6441_p2 = pnand %p6439_p7, %p6987_p8 }
 0x243   : > { %p6442_p3 = pneg %p6441_p2 }
 0x245   : > { %p6447_p9 = pnand %p6445_p4, %p6442_p3 }
 0x247   : > { %6450 = shalt.err (!%p6447_p9)
}
 0x248   : > { %s6451_s4 = scalar_lea.vmem %s1296_s5, 32  ;;  %p6459_p13 = scmp.lt.s32.totalorder %s1296_s5, %s1296_s5 }
 0x249   : > { %p6452_p10 = scmp.ne.s32.totalorder %s1296_s5, %s6451_s4  ;;  %p6460_p0 = scmp.lt.s32.totalorder %s6451_s4, %s6451_s4 }
 0x24b   : > { %p6454_p11 = pnand %p6452_p10, %p6987_p8  ;;  %p6461_p1 = por %p6460_p0, %p6459_p13 }
 0x24d   : > { %p6455_p12 = pneg %p6454_p11 }
 0x24f   : > { %p6462_p5 = pnand %p6461_p1, %p6455_p12 }
 0x251   : > { %6465 = shalt.err (!%p6462_p5)
}
 0x252   : > { %s7673_s8 = sld [smem:[#allocation72_spill]] }
 0x253   : > { %5339 = dma.hbm_to_vmem [thread:$0]  (!%p6975_p6), %s7672_s28, 32, %s1296_s5, [#allocation27]  }
 0x258   : > { %s6466_s3 = scalar_lea.hbm %s7673_s8, 16 }
 0x259   : > { %p6467_p7 = scmp.ne.s32.totalorder %s7673_s8, %s6466_s3  ;;  %p6473_p4 = scmp.lt.u32.totalorder %s6466_s3, %s7673_s8 }
 0x25b   : > { %p6469_p2 = pnand %p6467_p7, %p6987_p8 }
 0x25d   : > { %p6470_p3 = pneg %p6469_p2 }
 0x25f   : > { %p6475_p9 = pnand %p6473_p4, %p6470_p3 }
 0x261   : > { %6478 = shalt.err (!%p6475_p9)
}
 0x262   : > { %s6479_s1 = scalar_lea.vmem %s1321_s9, 16  ;;  %s6486_s2 = scalar_lea.vmem %s1321_s9, 32 }
 0x263   : > { %p6480_p10 = scmp.ne.s32.totalorder %s1321_s9, %s6479_s1  ;;  %p6487_p13 = scmp.lt.s32.totalorder %s1321_s9, %s1321_s9 }
 0x264   : > { %p6488_p0 = scmp.lt.s32.totalorder %s6486_s2, %s6479_s1 }
 0x265   : > { %p6482_p11 = pnand %p6480_p10, %p6987_p8 }
 0x266   : > { %p6489_p1 = por %p6488_p0, %p6487_p13 }
 0x267   : > { %p6483_p12 = pneg %p6482_p11 }
 0x269   : > { %p6490_p5 = pnand %p6489_p1, %p6483_p12 }
 0x26b   : > { %6493 = shalt.err (!%p6490_p5)
}
 0x26c   : > { %s7674_s5 = sld [smem:[#allocation73_spill]]  ;;  %s6707_s4 = smov [#allocation34]  }
 0x26d   : > { %5345 = dma.hbm_to_vmem [thread:$0]  (!%p6975_p6), %s7673_s8, 16, %s1321_s9, [#allocation30]  }
 0x26e   : > { %s1344_s3 = sshll.u32 %s6707_s4, 4  ;;  %s6708_s6 = smov [#allocation37]   ;;  %s1345_s3 = int_to_ptr.vmem [resolvable:$true] %s1344_s3 }
 0x26f   : > { %s1366_s10 = sshll.u32 %s6708_s6, 4  ;;  %s1367_s10 = int_to_ptr.vmem [resolvable:$true] %s1366_s10 }
 0x272   : > { %s6494_s13 = scalar_lea.hbm %s7674_s5, 32 }
 0x273   : > { %p6495_p7 = scmp.ne.s32.totalorder %s7674_s5, %s6494_s13  ;;  %p6501_p4 = scmp.lt.u32.totalorder %s6494_s13, %s7674_s5 }
 0x275   : > { %p6497_p2 = pnand %p6495_p7, %p6987_p8 }
 0x277   : > { %p6498_p3 = pneg %p6497_p2 }
 0x279   : > { %p6503_p9 = pnand %p6501_p4, %p6498_p3 }
 0x27b   : > { %6506 = shalt.err (!%p6503_p9)
}
 0x27c   : > { %s6507_s1 = scalar_lea.vmem %s1345_s3, 32  ;;  %p6515_p13 = scmp.lt.s32.totalorder %s1345_s3, %s1345_s3 }
 0x27d   : > { %p6508_p10 = scmp.ne.s32.totalorder %s1345_s3, %s6507_s1  ;;  %p6516_p0 = scmp.lt.s32.totalorder %s6507_s1, %s6507_s1 }
 0x27f   : > { %p6510_p11 = pnand %p6508_p10, %p6987_p8  ;;  %p6517_p1 = por %p6516_p0, %p6515_p13 }
 0x281   : > { %p6511_p12 = pneg %p6510_p11 }
 0x283   : > { %p6518_p5 = pnand %p6517_p1, %p6511_p12 }
 0x285   : > { %6521 = shalt.err (!%p6518_p5)
}
 0x286   : > { %s7675_s6 = sld [smem:[#allocation75_spill]] }
 0x287   : > { %5351 = dma.hbm_to_vmem [thread:$0]  (!%p6975_p6), %s7674_s5, 32, %s1345_s3, [#allocation33]  }
 0x28c   : > { %s6522_s13 = scalar_lea.hbm %s7675_s6, 32 }
 0x28d   : > { %p6523_p7 = scmp.ne.s32.totalorder %s7675_s6, %s6522_s13  ;;  %p6529_p4 = scmp.lt.u32.totalorder %s6522_s13, %s7675_s6 }
 0x28f   : > { %p6525_p2 = pnand %p6523_p7, %p6987_p8 }
 0x291   : > { %p6526_p3 = pneg %p6525_p2 }
 0x293   : > { %p6531_p9 = pnand %p6529_p4, %p6526_p3 }
 0x295   : > { %6534 = shalt.err (!%p6531_p9)
}
 0x296   : > { %s6535_s9 = scalar_lea.vmem %s1367_s10, 32  ;;  %p6543_p13 = scmp.lt.s32.totalorder %s1367_s10, %s1367_s10 }
 0x297   : > { %p6536_p10 = scmp.ne.s32.totalorder %s1367_s10, %s6535_s9  ;;  %p6544_p0 = scmp.lt.s32.totalorder %s6535_s9, %s6535_s9 }
 0x299   : > { %p6538_p11 = pnand %p6536_p10, %p6987_p8  ;;  %p6545_p1 = por %p6544_p0, %p6543_p13 }
 0x29b   : > { %p6539_p12 = pneg %p6538_p11 }
 0x29d   : > { %p6546_p5 = pnand %p6545_p1, %p6539_p12 }
 0x29f   : > { %6549 = shalt.err (!%p6546_p5)
}
 0x2a0   : > { %s7676_s2 = sld [smem:[#allocation86_spill]]  ;;  %s6709_s4 = smov [#allocation40]  }
 0x2a1   : > { %5357 = dma.hbm_to_vmem [thread:$0]  (!%p6975_p6), %s7675_s6, 32, %s1367_s10, [#allocation36]  }
 0x2a2   : > { %s1416_s3 = sshll.u32 %s6709_s4, 4  ;;  %s1417_s3 = int_to_ptr.vmem [resolvable:$true] %s1416_s3 }
 0x2a6   : > { %s6550_s1 = scalar_lea.hbm %s7676_s2, 4096 }
 0x2a7   : > { %p6551_p7 = scmp.ne.s32.totalorder %s7676_s2, %s6550_s1  ;;  %p6557_p4 = scmp.lt.u32.totalorder %s6550_s1, %s7676_s2 }
 0x2a9   : > { %p6553_p2 = pnand %p6551_p7, %p6987_p8 }
 0x2ab   : > { %p6554_p3 = pneg %p6553_p2 }
 0x2ad   : > { %p6559_p9 = pnand %p6557_p4, %p6554_p3 }
 0x2af   : > { %6562 = shalt.err (!%p6559_p9)
}
 0x2b0   : > { %s6563_s13 = scalar_lea.vmem %s1417_s3, 4096  ;;  %p6571_p13 = scmp.lt.s32.totalorder %s1417_s3, %s1417_s3 }
 0x2b1   : > { %p6564_p10 = scmp.ne.s32.totalorder %s1417_s3, %s6563_s13  ;;  %p6572_p0 = scmp.lt.s32.totalorder %s6563_s13, %s6563_s13 }
 0x2b3   : > { %p6566_p11 = pnand %p6564_p10, %p6987_p8  ;;  %p6573_p1 = por %p6572_p0, %p6571_p13 }
 0x2b5   : > { %p6567_p12 = pneg %p6566_p11 }
 0x2b7   : > { %p6574_p5 = pnand %p6573_p1, %p6567_p12 }
 0x2b9   : > { %6577 = shalt.err (!%p6574_p5)
}
 0x2ba   : > { %s7677_s10 = smov 8   ;;  %p7678_p7 = scmp.ne.s32.totalorder %s7662_s15, 0 }
 0x2bb   : > { %5363 = dma.hbm_to_vmem [thread:$0]  (!%p6975_p6), %s7676_s2, 4096, %s1417_s3, [#allocation39], %s7665_s26, %s7665_s26, %s7677_s10  }
 0x2bc   : > { %1447 = sbr.rel (%p7678_p7) target bundleno = 6438 (0x1926), region = 200  ;;  %p7679_p2 = scmp.eq.s32.totalorder (!%p7678_p7), %s6957_s11, 0 }
 0x2c3   : > { %6583 = dma.done.wait (%p7679_p2), [#allocation4], 128   ;;  %p7680_p8 = pmov %p7679_p2 }
 0x2c4   : > { %p7681_p3 = pmov %p7679_p2 }
 0x2c5   : > { %6585 = vsyncadd (%p7680_p8), [#allocation4], 4294967168 }
 0x2c6   : > { %6587 = dma.done.wait (%p7681_p3), [#allocation6], 320   ;;  %p7682_p4 = pmov %p7679_p2 }
 0x2c7   : > { %p7683_p9 = pmov %p7679_p2 }
 0x2c8   : > { %6589 = vsyncadd (%p7682_p4), [#allocation6], 4294966976 }
 0x2c9   : > { %6591 = dma.done.wait (%p7683_p9), [#allocation9], 2080   ;;  %p7684_p6 = pmov %p7679_p2 }
 0x2ca   : > { %p7685_p10 = pmov %p7679_p2 }
 0x2cb   : > { %6593 = vsyncadd (%p7684_p6), [#allocation9], 4294965216 }
 0x2cc   : > { %6595 = dma.done.wait (%p7685_p10), [#allocation12], 64   ;;  %p7686_p11 = pmov %p7679_p2 }
 0x2cd   : > { %p7687_p12 = pmov %p7679_p2 }
 0x2ce   : > { %6597 = vsyncadd (%p7686_p11), [#allocation12], 4294967232 }
 0x2cf   : > { %6599 = dma.done.wait (%p7687_p12), [#allocation15], 64   ;;  %p7688_p13 = pmov %p7679_p2 }
 0x2d0   : > { %p7689_p0 = pmov %p7679_p2 }
 0x2d1   : > { %6601 = vsyncadd (%p7688_p13), [#allocation15], 4294967232 }
 0x2d2   : > { %6603 = dma.done.wait (%p7689_p0), [#allocation18], 48   ;;  %p7690_p1 = pmov %p7689_p0 }
 0x2d3   : > { %p7691_p5 = pmov %p7689_p0 }
 0x2d4   : > { %6605 = vsyncadd (%p7690_p1), [#allocation18], 4294967248 }
 0x2d5   : > { %6607 = dma.done.wait (%p7691_p5), [#allocation21], 2080   ;;  %p7692_p7 = pmov %p7689_p0 }
 0x2d6   : > { %p7693_p2 = pmov %p7689_p0 }
 0x2d7   : > { %6609 = vsyncadd (%p7692_p7), [#allocation21], 4294965216 }
 0x2d8   : > { %6611 = dma.done.wait (%p7693_p2), [#allocation24], 64   ;;  %p7694_p8 = pmov %p7689_p0 }
 0x2d9   : > { %p7695_p3 = pmov %p7689_p0 }
 0x2da   : > { %6613 = vsyncadd (%p7694_p8), [#allocation24], 4294967232 }
 0x2db   : > { %6615 = dma.done.wait (%p7695_p3), [#allocation27], 64   ;;  %p7696_p4 = pmov %p7689_p0 }
 0x2dc   : > { %p7697_p9 = pmov %p7689_p0 }
 0x2dd   : > { %6617 = vsyncadd (%p7696_p4), [#allocation27], 4294967232 }
 0x2de   : > { %6619 = dma.done.wait (%p7697_p9), [#allocation30], 48   ;;  %p7698_p6 = pmov %p7689_p0 }
 0x2df   : > { %p7699_p10 = pmov %p7689_p0 }
 0x2e0   : > { %6621 = vsyncadd (%p7698_p6), [#allocation30], 4294967248 }
 0x2e1   : > { %6623 = dma.done.wait (%p7699_p10), [#allocation33], 2080   ;;  %p7700_p11 = pmov %p7689_p0 }
 0x2e2   : > { %p7701_p12 = pmov %p7689_p0 }
 0x2e3   : > { %6625 = vsyncadd (%p7700_p11), [#allocation33], 4294965216 }
 0x2e4   : > { %6627 = dma.done.wait (%p7701_p12), [#allocation36], 64   ;;  %p7702_p13 = pmov %p7689_p0 }
 0x2e6   : > { %6629 = vsyncadd (%p7702_p13), [#allocation36], 4294967232 }
 0x2e7   : > { %6631 = dma.done.wait (%p7689_p0), [#allocation39], 5120   ;;  %p7703_p1 = pmov %p7689_p0 }
 0x2e8   : > { %p7704_p5 = scmp.ne.s32.totalorder %s6957_s11, 0 }
 0x2e9   : > { %6633 = vsyncadd (%p7703_p1), [#allocation39], 4294962176  ;;  %v5500_v0 = vld [vmem:[#allocation8 + $0x4] ss:$8 sps:$4 sm:$0xff] (!%p7704_p5)   ;;  %v5502_v1 = vld [vmem:[#allocation8] ss:$8 sps:$4 sm:$0xff] (!%p7704_p5)   ;;  %v1666_v19 = vlaneseq (!%p7704_p5) }
 0x2ea   : > { %1645 = sbr.rel (%p7704_p5) target bundleno = 2066 (0x812), region = 304  ;;  %v6710_v2 = vmov (!%p7704_p5), 0   ;;  %1756 = vmatprep.subr.bf16.mxu0 (!%p7704_p5), %v5500_v0  ;;  %v5503_v3 = vld [vmem:[#allocation8 + $0x14] ss:$8 sps:$4 sm:$0xff] (!%p7704_p5)   ;;  %v5505_v4 = vld [vmem:[#allocation8 + $0x10] ss:$8 sps:$4 sm:$0xff] (!%p7704_p5)  }
 0x2eb   : > { %1788 = vmatprep.mubr.bf16.mxu0 (!%p7704_p5), %v6710_v2  ;;  %1757 = vmatpush1.bf16.msra.mxu0 (!%p7704_p5), %v5502_v1  ;;  %v5506_v5 = vld [vmem:[#allocation8 + $0x24] ss:$8 sps:$4 sm:$0xff] (!%p7704_p5)   ;;  %v5508_v6 = vld [vmem:[#allocation8 + $0x20] ss:$8 sps:$4 sm:$0xff] (!%p7704_p5)   ;;  %v5509_v7 = vld [vmem:[#allocation8 + $0x34] ss:$8 sps:$4 sm:$0xff] (!%p7704_p5)  }
 0x2ec   : > { %1758 = vmatprep.subr.bf16.mxu0 (!%p7704_p5), %v5503_v3  ;;  %v5511_v8 = vld [vmem:[#allocation8 + $0x30] ss:$8 sps:$4 sm:$0xff] (!%p7704_p5)   ;;  %v5512_v9 = vld [vmem:[#allocation8 + $0x44] ss:$8 sps:$4 sm:$0xff] (!%p7704_p5)   ;;  %v5514_v10 = vld [vmem:[#allocation8 + $0x40] ss:$8 sps:$4 sm:$0xff] (!%p7704_p5)  }
 0x2ed   : > { %v5515_v11 = vld [vmem:[#allocation8 + $0x54] ss:$8 sps:$4 sm:$0xff] (!%p7704_p5)   ;;  %v5517_v12 = vld [vmem:[#allocation8 + $0x50] ss:$8 sps:$4 sm:$0xff] (!%p7704_p5)   ;;  %v5518_v13 = vld [vmem:[#allocation8 + $0x64] ss:$8 sps:$4 sm:$0xff] (!%p7704_p5)  }
 0x2ee   : > { %v5520_v14 = vld [vmem:[#allocation8 + $0x60] ss:$8 sps:$4 sm:$0xff] (!%p7704_p5)   ;;  %v5521_v15 = vld [vmem:[#allocation8 + $0x74] ss:$8 sps:$4 sm:$0xff] (!%p7704_p5)   ;;  %v5523_v16 = vld [vmem:[#allocation8 + $0x70] ss:$8 sps:$4 sm:$0xff] (!%p7704_p5)  }
 0x2ef   : > { %1759 = vmatpush1.bf16.msra.mxu0 (!%p7704_p5), %v5505_v4  ;;  %v1646_v17 = vld [vmem:[#allocation3] sm:$0xff] (!%p7704_p5)  ;;  %s7705_s15 = sld [smem:[#allocation61_spill]] (!%p7704_p5)  ;;  %v1667_v20 = vshrl.u32 (!%p7704_p5), %v1666_v19, 7  ;;  %v1664_v22 = vld [vmem:[#allocation10] sm:$0x3] (!%p7704_p5)  ;;  %s7706_s22 = sld [smem:[#allocation63_spill]] (!%p7704_p5) }
 0x2f0   : > { %1760 = vmatprep.subr.bf16.mxu0 (!%p7704_p5), %v5506_v5  ;;  %v1647_v18 = vpack.c.bf16 (!%p7704_p5), %v1646_v17, %v1646_v17  ;;  %vm2314_vm0 = vcmask (!%p7704_p5), 523264  }
 0x2f1   : > { %v7329_v21 = vsub.s32 0, %v1667_v20  ;;  %v7331_v23 = vsub.s32 1, %v1667_v20 }
 0x2f3   : > { %1761 = vmatpush1.bf16.msra.mxu0 %v5508_v6  ;;  %v1669_v24 = vrot.slane %v1664_v22, %v7329_v21  ;;  %v1673_v25 = vrot.slane %v1664_v22, %v7331_v23 }
 0x2f4   : > { %1762 = vmatprep.subr.bf16.mxu0 %v5509_v7 }
 0x2f5   : > { %v5524_v33 = vld [vmem:[%s7705_s15 + $0x4] ss:$8 sps:$4 sm:$0xff]   ;;  %v5526_v34 = vld [vmem:[%s7705_s15] ss:$8 sps:$4 sm:$0xff]   ;;  %v5527_v35 = vld [vmem:[%s7705_s15 + $0x14] ss:$8 sps:$4 sm:$0xff]  }
 0x2f6   : > { %2050 = vmatprep.subr.bf16.mxu1 %v5524_v33  ;;  %v5529_v36 = vld [vmem:[%s7705_s15 + $0x10] ss:$8 sps:$4 sm:$0xff]   ;;  %v5530_v37 = vld [vmem:[%s7705_s15 + $0x24] ss:$8 sps:$4 sm:$0xff]   ;;  %v5532_v38 = vld [vmem:[%s7705_s15 + $0x20] ss:$8 sps:$4 sm:$0xff]  }
 0x2f7   : > { %1763 = vmatpush1.bf16.msra.mxu0 %v5511_v8  ;;  %2051 = vmatpush1.bf16.msra.mxu1 %v5526_v34  ;;  %v5533_v39 = vld [vmem:[%s7705_s15 + $0x34] ss:$8 sps:$4 sm:$0xff]   ;;  %v5535_v40 = vld [vmem:[%s7705_s15 + $0x30] ss:$8 sps:$4 sm:$0xff]   ;;  %v5536_v41 = vld [vmem:[%s7705_s15 + $0x44] ss:$8 sps:$4 sm:$0xff]  }
 0x2f8   : > { %1764 = vmatprep.subr.bf16.mxu0 %v5512_v9  ;;  %2052 = vmatprep.subr.bf16.mxu1 %v5527_v35  ;;  %v5538_v42 = vld [vmem:[%s7705_s15 + $0x40] ss:$8 sps:$4 sm:$0xff]   ;;  %v5539_v43 = vld [vmem:[%s7705_s15 + $0x54] ss:$8 sps:$4 sm:$0xff]   ;;  %v5541_v44 = vld [vmem:[%s7705_s15 + $0x50] ss:$8 sps:$4 sm:$0xff]  }
 0x2f9   : > { %v5542_v45 = vld [vmem:[%s7705_s15 + $0x64] ss:$8 sps:$4 sm:$0xff]   ;;  %v5544_v46 = vld [vmem:[%s7705_s15 + $0x60] ss:$8 sps:$4 sm:$0xff]   ;;  %v5545_v47 = vld [vmem:[%s7705_s15 + $0x74] ss:$8 sps:$4 sm:$0xff]  }
 0x2fa   : > { %v5547_v48 = vld [vmem:[%s7705_s15 + $0x70] ss:$8 sps:$4 sm:$0xff]   ;;  %v5548_v49 = vld [vmem:[%s7705_s15 + $0x84] ss:$8 sps:$4 sm:$0xff]   ;;  %v5550_v50 = vld [vmem:[%s7705_s15 + $0x80] ss:$8 sps:$4 sm:$0xff]  }
 0x2fb   : > { %1765 = vmatpush1.bf16.msra.mxu0 %v5514_v10  ;;  %2053 = vmatpush1.bf16.msra.mxu1 %v5529_v36  ;;  %v5551_v51 = vld [vmem:[%s7705_s15 + $0x94] ss:$8 sps:$4 sm:$0xff]   ;;  %v5553_v52 = vld [vmem:[%s7705_s15 + $0x90] ss:$8 sps:$4 sm:$0xff]   ;;  %v5554_v60 = vld [vmem:[%s7705_s15 + $0xa4] ss:$8 sps:$4 sm:$0xff]  }
 0x2fc   : > { %1766 = vmatprep.subr.bf16.mxu0 %v5515_v11  ;;  %2054 = vmatprep.subr.bf16.mxu1 %v5530_v37  ;;  %v5556_v61 = vld [vmem:[%s7705_s15 + $0xa0] ss:$8 sps:$4 sm:$0xff]   ;;  %v5557_v62 = vld [vmem:[%s7705_s15 + $0xb4] ss:$8 sps:$4 sm:$0xff]   ;;  %v5559_v63 = vld [vmem:[%s7705_s15 + $0xb0] ss:$8 sps:$4 sm:$0xff]  }
 0x2fd   : > { %v5560_v0 = vld [vmem:[%s7705_s15 + $0xc4] ss:$8 sps:$4 sm:$0xff]   ;;  %v5562_v1 = vld [vmem:[%s7705_s15 + $0xc0] ss:$8 sps:$4 sm:$0xff]   ;;  %v5563_v2 = vld [vmem:[%s7705_s15 + $0xd4] ss:$8 sps:$4 sm:$0xff]  }
 0x2fe   : > { %v5565_v3 = vld [vmem:[%s7705_s15 + $0xd0] ss:$8 sps:$4 sm:$0xff]   ;;  %v5566_v4 = vld [vmem:[%s7705_s15 + $0xe4] ss:$8 sps:$4 sm:$0xff]   ;;  %v5568_v5 = vld [vmem:[%s7705_s15 + $0xe0] ss:$8 sps:$4 sm:$0xff]  }
 0x2ff   : > { %1767 = vmatpush1.bf16.msra.mxu0 %v5517_v12  ;;  %2055 = vmatpush1.bf16.msra.mxu1 %v5532_v38  ;;  %v5569_v6 = vld [vmem:[%s7705_s15 + $0xf4] ss:$8 sps:$4 sm:$0xff]   ;;  %v5571_v7 = vld [vmem:[%s7705_s15 + $0xf0] ss:$8 sps:$4 sm:$0xff]   ;;  %v1797_v11 = vld [vmem:[#allocation11] sm:$0x3] }
 0x300   : > { %1768 = vmatprep.subr.bf16.mxu0 %v5518_v13  ;;  %2056 = vmatprep.subr.bf16.mxu1 %v5533_v39  ;;  %v1798_v12 = vld [vmem:[#allocation13] sm:$0x3]  ;;  %v1820_v13 = vrot.slane %v1797_v11, %v7329_v21 }
 0x301   : > { %v1833_v17 = vrot.slane %v1798_v12, %v7329_v21 }
 0x303   : > { %1769 = vmatpush1.bf16.msra.mxu0 %v5520_v14  ;;  %2057 = vmatpush1.bf16.msra.mxu1 %v5535_v40  ;;  %v1824_v14 = vrot.slane %v1797_v11, %v7331_v23  ;;  %v5572_v40 = vld [vmem:[%s7706_s22 + $0x40] sm:$0xff]  }
 0x304   : > { %1770 = vmatprep.subr.bf16.mxu0 %v5521_v15  ;;  %2058 = vmatprep.subr.bf16.mxu1 %v5536_v41  ;;  %v5573_v41 = vld [vmem:[%s7706_s22] sm:$0xff]  }
 0x307   : > { %1771 = vmatpush1.bf16.msra.mxu0 %v5523_v16  ;;  %2059 = vmatpush1.bf16.msra.mxu1 %v5538_v42  ;;  %v5574_v42 = vld [vmem:[%s7706_s22 + $0x48] sm:$0xff]  }
 0x308   : > { %2060 = vmatprep.subr.bf16.mxu1 %v5539_v43  ;;  %5084 = vmatprep.subr.bf16.mxu0 %v5572_v40  ;;  %v5575_v43 = vld [vmem:[%s7706_s22 + $0x8] sm:$0xff]  }
 0x30a   : > { %1789 = vmatmul.mubr.bf16.vlgmr.msra.gmra.mrb[0].mxu0 %v1647_v18  ;;  %v1837_v18 = vrot.slane %v1798_v12, %v7331_v23 }
 0x30b   : > { %2061 = vmatpush1.bf16.msra.mxu1 %v5541_v44  ;;  %5085 = vmatpush3.bf16.msra.mxu0 %v5573_v41 }
 0x30c   : > { %2062 = vmatprep.subr.bf16.mxu1 %v5542_v45  ;;  %5086 = vmatprep.subr.bf16.mxu0 %v5574_v42 }
 0x30f   : > { %2063 = vmatpush1.bf16.msra.mxu1 %v5544_v46  ;;  %5087 = vmatpush3.bf16.msra.mxu0 %v5575_v43 }
 0x310   : > { %2064 = vmatprep.subr.bf16.mxu1 %v5545_v47 }
 0x313   : > { %2065 = vmatpush1.bf16.msra.mxu1 %v5547_v48 }
 0x314   : > { %2066 = vmatprep.subr.bf16.mxu1 %v5548_v49 }
 0x317   : > { %2067 = vmatpush1.bf16.msra.mxu1 %v5550_v50 }
 0x318   : > { %2068 = vmatprep.subr.bf16.mxu1 %v5551_v51  ;;  %v5576_v51 = vld [vmem:[%s7706_s22 + $0x50] sm:$0xff]  }
 0x319   : > { %5088 = vmatprep.subr.bf16.mxu0 %v5576_v51 }
 0x31b   : > { %2069 = vmatpush1.bf16.msra.mxu1 %v5553_v52  ;;  %v5577_v52 = vld [vmem:[%s7706_s22 + $0x10] sm:$0xff]  }
 0x31c   : > { %2070 = vmatprep.subr.bf16.mxu1 %v5554_v60  ;;  %5089 = vmatpush3.bf16.msra.mxu0 %v5577_v52  ;;  %v5585_v60 = vld [vmem:[%s7706_s22 + $0x30] sm:$0xff]  }
 0x31f   : > { %2071 = vmatpush1.bf16.msra.mxu1 %v5556_v61  ;;  %v5586_v61 = vld [vmem:[%s7706_s22 + $0x78] sm:$0xff]  }
 0x320   : > { %2072 = vmatprep.subr.bf16.mxu1 %v5557_v62  ;;  %v5587_v62 = vld [vmem:[%s7706_s22 + $0x38] sm:$0xff]  }
 0x323   : > { %2073 = vmatpush1.bf16.msra.mxu1 %v5559_v63 }
 0x324   : > { %2074 = vmatprep.subr.bf16.mxu1 %v5560_v0 }
 0x327   : > { %2075 = vmatpush1.bf16.msra.mxu1 %v5562_v1 }
 0x328   : > { %2076 = vmatprep.subr.bf16.mxu1 %v5563_v2  ;;  %v2091_v2 = vld [vmem:[#allocation16] sm:$0x3] }
 0x32b   : > { %2077 = vmatpush1.bf16.msra.mxu1 %v5565_v3  ;;  %v2092_v3 = vld [vmem:[#allocation17] sm:$0x3] }
 0x32c   : > { %2078 = vmatprep.subr.bf16.mxu1 %v5566_v4  ;;  %v2113_v4 = vrot.slane %v2091_v2, %v7329_v21 }
 0x32f   : > { %2079 = vmatpush1.bf16.msra.mxu1 %v5568_v5  ;;  %v2117_v5 = vrot.slane %v2091_v2, %v7331_v23 }
 0x330   : > { %2080 = vmatprep.subr.bf16.mxu1 %v5569_v6 }
 0x333   : > { %2081 = vmatpush1.bf16.msra.mxu1 %v5571_v7 }
 0x3dd   : > { %v1790_v26 = vpop.f32.mrb[0].mxu0 }
 0x3de   : > { %v1791_v27 = vadd.f32 %v1790_v26, %v1669_v24  ;;  %v1792_v28 = vpop.f32.mrb[1].mxu0 }
 0x3df   : > { %v1793_v29 = vadd.f32 %v1792_v28, %v1673_v25  ;;  %v1794_v30 = vpop.f32.mrb[2].mxu0 }
 0x3e0   : > { %v1795_v31 = vpop.f32.mrb[3].mxu0  ;;  %v1878_v30 = vld [vmem:[#allocation14] sm:$0x3] }
 0x3e1   : > { %v1799_v32 = vadd.f32 %v1793_v29, %v1791_v27  ;;  %v1883_v31 = vrot.slane %v1878_v30, %v7329_v21 }
 0x3e3   : > { %1800 = vadd.xlane.f32.xlu0 %v1799_v32  ;;  %v1887_v32 = vrot.slane %v1878_v30, %v7331_v23 }
 0x470   : > { %v1801_v53 = vpop.xlane.xlu0 %1800 }
 0x471   : > { %v1803_v54 = vmul.f32 0.00390625, %v1801_v53  ;;  %v5578_v53 = vld [vmem:[%s7706_s22 + $0x58] sm:$0xff]  }
 0x472   : > { %5090 = vmatprep.subr.bf16.mxu0 %v5578_v53 }
 0x473   : > { %v1804_v55 = vsub.f32 %v1791_v27, %v1803_v54  ;;  %v1805_v56 = vsub.f32 %v1793_v29, %v1803_v54  ;;  %v5579_v54 = vld [vmem:[%s7706_s22 + $0x18] sm:$0xff]  }
 0x474   : > { %5091 = vmatpush3.bf16.msra.mxu0 %v5579_v54 }
 0x475   : > { %v1806_v57 = vmul.f32 %v1804_v55, %v1804_v55  ;;  %v1807_v58 = vmul.f32 %v1805_v56, %v1805_v56 }
 0x477   : > { %v1808_v59 = vadd.f32 %v1807_v58, %v1806_v57  ;;  %v5582_v57 = vld [vmem:[%s7706_s22 + $0x68] sm:$0xff]  }
 0x478   : > { %v5583_v58 = vld [vmem:[%s7706_s22 + $0x28] sm:$0xff]  }
 0x479   : > { %1809 = vadd.xlane.f32.xlu0 %v1808_v59  ;;  %v5584_v59 = vld [vmem:[%s7706_s22 + $0x70] sm:$0xff]  }
 0x506   : > { %v1810_v8 = vpop.xlane.xlu0 %1809 }
 0x507   : > { %v1811_v9 = vmul.f32 0.00390625, %v1810_v8 }
 0x509   : > { %v1812_v10 = vadd.f32 1e-05, %v1811_v9  ;;  %v2126_v9 = vrot.slane %v2092_v3, %v7329_v21 }
 0x50b   : > { %5588 = vrsqrt.f32 %v1812_v10  ;;  %v2130_v10 = vrot.slane %v2092_v3, %v7331_v23 }
 0x515   : > { %v5589_v15 = vpop.eup %5588 }
 0x516   : > { %v1815_v16 = vmul.f32 %v5589_v15, %v1805_v56  ;;  %v1814_v19 = vmul.f32 %v5589_v15, %v1804_v55  ;;  %v5580_v55 = vld [vmem:[%s7706_s22 + $0x60] sm:$0xff]  }
 0x517   : > { %v5581_v56 = vld [vmem:[%s7706_s22 + $0x20] sm:$0xff]   ;;  %5092 = vmatprep.subr.bf16.mxu0 %v5580_v55 }
 0x518   : > { %v1828_v20 = vmul.f32 %v1824_v14, %v1815_v16  ;;  %v1827_v22 = vmul.f32 %v1820_v13, %v1814_v19  ;;  %5093 = vmatpush3.bf16.msra.mxu0 %v5581_v56 }
 0x519   : > { %5094 = vmatprep.subr.bf16.mxu0 %v5582_v57 }
 0x51a   : > { %v1841_v24 = vadd.f32 %v1837_v18, %v1828_v20  ;;  %v1840_v25 = vadd.f32 %v1833_v17, %v1827_v22  ;;  %v4872_v20 = vld [vmem:[#allocation19] ss:$0 sm:$0xff] }
 0x51c   : > { %v1843_v26 = vmax.f32 %v1841_v24, 0.0  ;;  %v1842_v27 = vmax.f32 %v1840_v25, 0.0  ;;  %5095 = vmatpush3.bf16.msra.mxu0 %v5583_v58 }
 0x51d   : > { %5096 = vmatprep.subr.bf16.mxu0 %v5584_v59 }
 0x51e   : > { %v1845_v28 = vpack.c.bf16 %v1843_v26, %v1843_v26  ;;  %v1844_v29 = vpack.c.bf16 %v1842_v27, %v1842_v27 }
 0x520   : > { %2082 = vmatprep.mubr.bf16.mxu1 %v1845_v28  ;;  %5097 = vmatpush3.bf16.msra.mxu0 %v5585_v60 }
 0x521   : > { %2083 = vmatmul.mubr.bf16.vlgmr.msra.gmra.mrb[0].mxu1 %v1844_v29  ;;  %5098 = vmatprep.subr.bf16.mxu0 %v5586_v61 }
 0x524   : > { %5099 = vmatpush3.bf16.msra.mxu0 %v5587_v62 }
 0x5f4   : > { %v2084_v33 = vpop.f32.mrb[0].mxu1 }
 0x5f5   : > { %v2085_v34 = vadd.f32 %v2084_v33, %v1883_v31  ;;  %v2086_v35 = vpop.f32.mrb[1].mxu1 }
 0x5f6   : > { %v2087_v36 = vadd.f32 %v2086_v35, %v1887_v32  ;;  %v2088_v37 = vpop.f32.mrb[2].mxu1 }
 0x5f7   : > { %v2089_v38 = vpop.f32.mrb[3].mxu1 }
 0x5f8   : > { %v2093_v39 = vadd.f32 %v2087_v36, %v2085_v34 }
 0x5fa   : > { %2094 = vadd.xlane.f32.xlu1 %v2093_v39 }
 0x687   : > { %v2095_v44 = vpop.xlane.xlu1 %2094 }
 0x688   : > { %v2096_v45 = vmul.f32 0.00390625, %v2095_v44 }
 0x68a   : > { %v2097_v46 = vsub.f32 %v2085_v34, %v2096_v45  ;;  %v2098_v47 = vsub.f32 %v2087_v36, %v2096_v45 }
 0x68c   : > { %v2099_v48 = vmul.f32 %v2097_v46, %v2097_v46  ;;  %v2100_v49 = vmul.f32 %v2098_v47, %v2098_v47 }
 0x68e   : > { %v2101_v50 = vadd.f32 %v2100_v49, %v2099_v48 }
 0x690   : > { %2102 = vadd.xlane.f32.xlu1 %v2101_v50 }
 0x71d   : > { %v2103_v63 = vpop.xlane.xlu1 %2102 }
 0x71e   : > { %v2104_v0 = vmul.f32 0.00390625, %v2103_v63 }
 0x720   : > { %v2105_v1 = vadd.f32 1e-05, %v2104_v0 }
 0x722   : > { %5590 = vrsqrt.f32 %v2105_v1 }
 0x72c   : > { %v5591_v6 = vpop.eup %5590 }
 0x72d   : > { %v2107_v7 = vmul.f32 %v5591_v6, %v2097_v46  ;;  %v2108_v8 = vmul.f32 %v5591_v6, %v2098_v47 }
 0x72f   : > { %v2121_v11 = vmul.f32 %v2117_v5, %v2108_v8  ;;  %v2120_v12 = vmul.f32 %v2113_v4, %v2107_v7 }
 0x731   : > { %v2134_v13 = vadd.f32 %v2130_v10, %v2121_v11  ;;  %v2133_v14 = vadd.f32 %v2126_v9, %v2120_v12 }
 0x733   : > { %v2136_v15 = vmax.f32 %v2134_v13, 0.0  ;;  %v2135_v16 = vmax.f32 %v2133_v14, 0.0 }
 0x735   : > { %v2138_v17 = vpack.c.bf16 %v2136_v15, %v2136_v15  ;;  %v2137_v18 = vpack.c.bf16 %v2135_v16, %v2135_v16 }
 0x737   : > { %2306 = vmatprep.mubr.bf16.mxu0 %v2138_v17 }
 0x738   : > { %2307 = vmatmul.mubr.bf16.vlgmr.msra.gmra.mrb[4].mxu0 %v2137_v18 }
 0x80b   : > { %v5100_v19 = vpop.f32.mrb[4].mxu0 }
 0x80c   : > { %v5101_v22 = vpop.f32.mrb[5].mxu0 }
 0x80d   : > { %v5102_v24 = vadd.f32 %v5101_v22, %v5100_v19  ;;  %v5103_v25 = vpop.f32.mrb[6].mxu0 }
 0x80e   : > { %v5104_v26 = vpop.f32.mrb[7].mxu0 }
 0x80f   : > { %v2309_v21 = vadd.f32 %v5102_v24, %v4872_v20 }
 0x811   : > { %2315 = vst.msk [vmem:[#allocation2] sm:$0xff] %vm2314_vm0, %v2309_v21 }
 0x812 PF: > { %s7707_s0 = sld [smem:[#allocation56_spill]]  ;;  %vm2329_vm1 = vcmask 1043456   ;;  %v6711_v27 = vmov 0.0   ;;  %vm6712_vm2 = vmmov 0   ;;  %v2374_v30 = vld [vmem:[#allocation5] sm:$0xff]  ;;  %v2375_v31 = vld [vmem:[#allocation5 + $0x8] sm:$0xff]  ;;  %v2406_v61 = vlaneseq }
 0x813   : > { %5176 = vmatprep.subr.bf16.mxu0 %v6711_v27  ;;  %5178 = vmatprep.mubr.msk.bf16.mxu0 %vm6712_vm2, %v6711_v27  ;;  %v5592_v33 = vpack.i.bf16 %v2375_v31, %v2374_v30  ;;  %v5600_v34 = vld [vmem:[#allocation20 + $0x4] ss:$8 sps:$4 sm:$0xff]   ;;  %v5602_v35 = vld [vmem:[#allocation20] ss:$8 sps:$4 sm:$0xff]   ;;  %vm2325_vm3 = vcmask 64512   ;;  %s6713_s26 = smov 64  }
 0x814   : > { %v5603_v36 = vld [vmem:[#allocation20 + $0x14] ss:$8 sps:$4 sm:$0xff]   ;;  %2496 = vmatprep.subr.bf16.mxu1 %v5600_v34  ;;  %v5605_v37 = vld [vmem:[#allocation20 + $0x10] ss:$8 sps:$4 sm:$0xff]   ;;  %v5606_v38 = vld [vmem:[#allocation20 + $0x24] ss:$8 sps:$4 sm:$0xff]  }
 0x815   : > { %5593 = vrot.lane.b32.xlu0 %v5592_v33, %s6713_s26  ;;  %2497 = vmatpush1.bf16.msra.mxu1 %v5602_v35  ;;  %v5608_v39 = vld [vmem:[#allocation20 + $0x20] ss:$8 sps:$4 sm:$0xff]   ;;  %v5609_v40 = vld [vmem:[#allocation20 + $0x34] ss:$8 sps:$4 sm:$0xff]   ;;  %v5611_v41 = vld [vmem:[#allocation20 + $0x30] ss:$8 sps:$4 sm:$0xff]  }
 0x816   : > { %2498 = vmatprep.subr.bf16.mxu1 %v5603_v36  ;;  %v5612_v42 = vld [vmem:[#allocation20 + $0x44] ss:$8 sps:$4 sm:$0xff]   ;;  %v5614_v43 = vld [vmem:[#allocation20 + $0x40] ss:$8 sps:$4 sm:$0xff]   ;;  %v5615_v44 = vld [vmem:[#allocation20 + $0x54] ss:$8 sps:$4 sm:$0xff]  }
 0x817   : > { %v5617_v45 = vld [vmem:[#allocation20 + $0x50] ss:$8 sps:$4 sm:$0xff]   ;;  %v5618_v46 = vld [vmem:[#allocation20 + $0x64] ss:$8 sps:$4 sm:$0xff]   ;;  %v5620_v47 = vld [vmem:[#allocation20 + $0x60] ss:$8 sps:$4 sm:$0xff]  }
 0x818   : > { %v7393_v23 = vld [vmem:[#allocation2] sm:$0xff]  ;;  %v6714_v50 = vmov 0   ;;  %vm2384_vm4 = vcmask 523264   ;;  %v2407_v62 = vshrl.u32 %v2406_v61, 7  ;;  %v2404_v0 = vld [vmem:[#allocation22] sm:$0x3] }
 0x819   : > { %v2319_v28 = vpack.c.bf16 %v7393_v23, %v7393_v23  ;;  %v5599_v29 = vld [vmem:[%s7707_s0] sm:$0xff]   ;;  %2499 = vmatpush1.bf16.msra.mxu1 %v5605_v37  ;;  %2528 = vmatprep.mubr.bf16.mxu1 %v6714_v50  ;;  %s7708_s9 = sld [smem:[#allocation68_spill]]  ;;  %s7709_s4 = sld [smem:[#allocation71_spill]]  ;;  %vm3107_vm5 = vcmask 130048  }
 0x81a   : > { %2500 = vmatprep.subr.bf16.mxu1 %v5606_v38  ;;  %v5621_v48 = vld [vmem:[#allocation20 + $0x74] ss:$8 sps:$4 sm:$0xff]   ;;  %v5623_v49 = vld [vmem:[#allocation20 + $0x70] ss:$8 sps:$4 sm:$0xff]   ;;  %5597 = vset.pattern.permute.xlu1 %v6714_v50  ;;  %v7408_v63 = vsub.s32 0, %v2407_v62  ;;  %v7410_v1 = vsub.s32 1, %v2407_v62 }
 0x81b   : > { %v2331_v32 = vsel %vm2329_vm1, %v2319_v28, 0  ;;  %5598 = vset.pattern.permute.xlu0 %v6714_v50  ;;  %s7710_s3 = sld [smem:[#allocation57_spill]]  ;;  %s7711_s1 = sld [smem:[#allocation76_spill]] }
 0x81c   : > { %5177 = vmatpush3.bf16.msra.mxu0 %v2331_v32  ;;  %v2409_v2 = vrot.slane %v2404_v0, %v7408_v63  ;;  %v2413_v3 = vrot.slane %v2404_v0, %v7410_v1  ;;  %s7712_s13 = sld [smem:[#allocation77_spill]]  ;;  %s7713_s10 = sld [smem:[#allocation80_spill]] }
 0x81d   : > { %2501 = vmatpush1.bf16.msra.mxu1 %v5608_v39  ;;  %s7714_s0 = sld [smem:[#allocation78_spill]]  ;;  %p5022_p7 = scmp.ne.s32.totalorder %s6957_s11, 5 }
 0x81e   : > { %2502 = vmatprep.subr.bf16.mxu1 %v5609_v40  ;;  %s7718_s11 = sld [smem:[#allocation84_spill]] (!%p5022_p7)  ;;  %vm4467_vm7 = vcmask (!%p5022_p7), 15360  }
 0x81f   : > { %5179 = vmatmul.mubr.msk.bf16.vlgmr.msra.gmra.mrb[0].mxu0 %vm2325_vm3, %v5599_v29  ;;  %v5624_v14 = vld [vmem:[%s7708_s9] ss:$8 sps:$4 sm:$0xff]   ;;  %v5626_v15 = vld [vmem:[%s7708_s9 + $0x4] ss:$8 sps:$4 sm:$0xff]   ;;  %v5629_v16 = vld [vmem:[%s7708_s9 + $0x14] ss:$8 sps:$4 sm:$0xff]  }
 0x820   : > { %2814 = vmatprep.subr.bf16.mxu0 %v5626_v15  ;;  %v5627_v17 = vld [vmem:[%s7708_s9 + $0x10] ss:$8 sps:$4 sm:$0xff]   ;;  %v5632_v18 = vld [vmem:[%s7708_s9 + $0x24] ss:$8 sps:$4 sm:$0xff]   ;;  %v5630_v19 = vld [vmem:[%s7708_s9 + $0x20] ss:$8 sps:$4 sm:$0xff]  }
 0x821   : > { %2503 = vmatpush1.bf16.msra.mxu1 %v5611_v41  ;;  %2815 = vmatpush1.bf16.msra.mxu0 %v5624_v14  ;;  %v5635_v20 = vld [vmem:[%s7708_s9 + $0x34] ss:$8 sps:$4 sm:$0xff]   ;;  %v5633_v22 = vld [vmem:[%s7708_s9 + $0x30] ss:$8 sps:$4 sm:$0xff]   ;;  %v5638_v24 = vld [vmem:[%s7708_s9 + $0x44] ss:$8 sps:$4 sm:$0xff]  }
 0x822   : > { %2504 = vmatprep.subr.bf16.mxu1 %v5612_v42  ;;  %2816 = vmatprep.subr.bf16.mxu0 %v5629_v16  ;;  %v5636_v25 = vld [vmem:[%s7708_s9 + $0x40] ss:$8 sps:$4 sm:$0xff]   ;;  %v5641_v26 = vld [vmem:[%s7708_s9 + $0x54] ss:$8 sps:$4 sm:$0xff]   ;;  %v5639_v21 = vld [vmem:[%s7708_s9 + $0x50] ss:$8 sps:$4 sm:$0xff]  }
 0x823   : > { %v5642_v28 = vld [vmem:[%s7708_s9 + $0x60] ss:$8 sps:$4 sm:$0xff]   ;;  %v5647_v29 = vld [vmem:[%s7708_s9 + $0x74] ss:$8 sps:$4 sm:$0xff]   ;;  %v5645_v30 = vld [vmem:[%s7708_s9 + $0x70] ss:$8 sps:$4 sm:$0xff]  }
 0x824   : > { %v5650_v31 = vld [vmem:[%s7708_s9 + $0x84] ss:$8 sps:$4 sm:$0xff]   ;;  %v5648_v32 = vld [vmem:[%s7708_s9 + $0x80] ss:$8 sps:$4 sm:$0xff]   ;;  %v5669_v62 = vld [vmem:[%s7708_s9 + $0xf0] ss:$8 sps:$4 sm:$0xff]  }
 0x825   : > { %2505 = vmatpush1.bf16.msra.mxu1 %v5614_v43  ;;  %2817 = vmatpush1.bf16.msra.mxu0 %v5627_v17 }
 0x826   : > { %2506 = vmatprep.subr.bf16.mxu1 %v5615_v44  ;;  %2818 = vmatprep.subr.bf16.mxu0 %v5632_v18 }
 0x829   : > { %2507 = vmatpush1.bf16.msra.mxu1 %v5617_v45  ;;  %2819 = vmatpush1.bf16.msra.mxu0 %v5630_v19 }
 0x82a   : > { %2508 = vmatprep.subr.bf16.mxu1 %v5618_v46  ;;  %2820 = vmatprep.subr.bf16.mxu0 %v5635_v20 }
 0x82d   : > { %2509 = vmatpush1.bf16.msra.mxu1 %v5620_v47  ;;  %2821 = vmatpush1.bf16.msra.mxu0 %v5633_v22  ;;  %v5653_v47 = vld [vmem:[%s7708_s9 + $0x94] ss:$8 sps:$4 sm:$0xff]  }
 0x82e   : > { %2510 = vmatprep.subr.bf16.mxu1 %v5621_v48  ;;  %2822 = vmatprep.subr.bf16.mxu0 %v5638_v24  ;;  %v5651_v48 = vld [vmem:[%s7708_s9 + $0x90] ss:$8 sps:$4 sm:$0xff]  }
 0x831   : > { %2511 = vmatpush1.bf16.msra.mxu1 %v5623_v49  ;;  %2823 = vmatpush1.bf16.msra.mxu0 %v5636_v25  ;;  %v5656_v49 = vld [vmem:[%s7708_s9 + $0xa4] ss:$8 sps:$4 sm:$0xff]  }
 0x832   : > { %2824 = vmatprep.subr.bf16.mxu0 %v5641_v26 }
 0x835   : > { %2825 = vmatpush1.bf16.msra.mxu0 %v5639_v21 }
 0x887   : > { %v5594_v51 = vpop.permute.xlu0 %5593 }
 0x888   : > { %v5596_v52 = vunpack.i.h.bf16 %v5594_v51  ;;  %v5595_v53 = vunpack.i.l.bf16 %v5594_v51  ;;  %v5654_v51 = vld [vmem:[%s7708_s9 + $0xa0] ss:$8 sps:$4 sm:$0xff]  }
 0x8f2   : > { %v2367_v54 = vpop.f32.mrb[0].mxu0 }
 0x8f3   : > { %v5180_v55 = vpop.f32.mrb[1].mxu0  ;;  %v2385_v57 = vsel %vm2384_vm4, %v2367_v54, %v5595_v53  ;;  %v5657_v53 = vld [vmem:[%s7708_s9 + $0xb0] ss:$8 sps:$4 sm:$0xff]   ;;  %v5662_v54 = vld [vmem:[%s7708_s9 + $0xc4] ss:$8 sps:$4 sm:$0xff]  }
 0x8f4   : > { %v2370_v56 = vpop.f32.mrb[2].mxu0  ;;  %v5660_v55 = vld [vmem:[%s7708_s9 + $0xc0] ss:$8 sps:$4 sm:$0xff]  }
 0x8f5   : > { %v2386_v58 = vsel %vm2384_vm4, %v2370_v56, %v5596_v52  ;;  %v5181_v59 = vpop.f32.mrb[3].mxu0  ;;  %v5659_v52 = vld [vmem:[%s7708_s9 + $0xb4] ss:$8 sps:$4 sm:$0xff]  }
 0x8f6   : > { %v2387_v60 = vpack.c.bf16 %v2386_v58, %v2385_v57  ;;  %v5665_v56 = vld [vmem:[%s7708_s9 + $0xd4] ss:$8 sps:$4 sm:$0xff]   ;;  %v5663_v57 = vld [vmem:[%s7708_s9 + $0xd0] ss:$8 sps:$4 sm:$0xff]   ;;  %v5666_v58 = vld [vmem:[%s7708_s9 + $0xe0] ss:$8 sps:$4 sm:$0xff]  }
 0x8f7   : > { %v5668_v59 = vld [vmem:[%s7708_s9 + $0xe4] ss:$8 sps:$4 sm:$0xff]  }
 0x8f8   : > { %2529 = vmatmul.mubr.bf16.vlgmr.msra.gmra.mrb[0].mxu1 %v2387_v60  ;;  %v5671_v60 = vld [vmem:[%s7708_s9 + $0xf4] ss:$8 sps:$4 sm:$0xff]  }
 0x9cb   : > { %v2530_v4 = vpop.f32.mrb[0].mxu1 }
 0x9cc   : > { %v2531_v5 = vadd.f32 %v2530_v4, %v2409_v2  ;;  %v2532_v6 = vpop.f32.mrb[1].mxu1 }
 0x9cd   : > { %v2533_v7 = vadd.f32 %v2532_v6, %v2413_v3  ;;  %v2534_v8 = vpop.f32.mrb[2].mxu1 }
 0x9ce   : > { %v2535_v9 = vadd.f32 %v2534_v8, %v2409_v2  ;;  %v2536_v10 = vpop.f32.mrb[3].mxu1 }
 0x9cf   : > { %v2537_v11 = vadd.f32 %v2536_v10, %v2413_v3  ;;  %v2541_v12 = vadd.f32 %v2533_v7, %v2531_v5 }
 0x9d1   : > { %2542 = vadd.xlane.f32.xlu0 %v2541_v12  ;;  %v2544_v13 = vadd.f32 %v2537_v11, %v2535_v9 }
 0x9d3   : > { %2545 = vadd.xlane.f32.xlu1 %v2544_v13 }
 0x9e7   : > { %3159 = vrot.lane.b32.xlu0 %v7393_v23, %s6713_s26  ;;  %v5644_v23 = vld [vmem:[%s7708_s9 + $0x64] ss:$8 sps:$4 sm:$0xff]   ;;  %s7715_s26 = sld [smem:[#allocation79_spill]] }
 0x9e8   : > { %2826 = vmatprep.subr.bf16.mxu0 %v5644_v23 }
 0x9e9   : > { %2827 = vmatpush1.bf16.msra.mxu0 %v5642_v28 }
 0x9ea   : > { %2828 = vmatprep.subr.bf16.mxu0 %v5647_v29 }
 0x9ed   : > { %2829 = vmatpush1.bf16.msra.mxu0 %v5645_v30 }
 0x9ee   : > { %2830 = vmatprep.subr.bf16.mxu0 %v5650_v31 }
 0x9f1   : > { %2831 = vmatpush1.bf16.msra.mxu0 %v5648_v32 }
 0x9f2   : > { %2832 = vmatprep.subr.bf16.mxu0 %v5653_v47  ;;  %v5673_v47 = vld [vmem:[%s7709_s4] sm:$0xff]  }
 0x9f5   : > { %2833 = vmatpush1.bf16.msra.mxu0 %v5651_v48 }
 0x9f6   : > { %2834 = vmatprep.subr.bf16.mxu0 %v5656_v49 }
 0x9f9   : > { %2835 = vmatpush1.bf16.msra.mxu0 %v5654_v51 }
 0x9fa   : > { %2836 = vmatprep.subr.bf16.mxu0 %v5659_v52 }
 0x9fd   : > { %2837 = vmatpush1.bf16.msra.mxu0 %v5657_v53 }
 0x9fe   : > { %2838 = vmatprep.subr.bf16.mxu0 %v5662_v54 }
 0xa01   : > { %2839 = vmatpush1.bf16.msra.mxu0 %v5660_v55 }
 0xa02   : > { %2840 = vmatprep.subr.bf16.mxu0 %v5665_v56 }
 0xa05   : > { %2841 = vmatpush1.bf16.msra.mxu0 %v5663_v57 }
 0xa06   : > { %2842 = vmatprep.subr.bf16.mxu0 %v5668_v59 }
 0xa09   : > { %2843 = vmatpush1.bf16.msra.mxu0 %v5666_v58 }
 0xa0a   : > { %2844 = vmatprep.subr.bf16.mxu0 %v5671_v60 }
 0xa0d   : > { %2845 = vmatpush1.bf16.msra.mxu0 %v5669_v62 }
 0xa5e   : > { %v2543_v33 = vpop.xlane.xlu0 %2542 }
 0xa5f   : > { %v2548_v34 = vmul.f32 0.00390625, %v2543_v33 }
 0xa60   : > { %v2546_v35 = vpop.xlane.xlu1 %2545 }
 0xa61   : > { %v2550_v36 = vsub.f32 %v2531_v5, %v2548_v34  ;;  %v2551_v37 = vsub.f32 %v2533_v7, %v2548_v34  ;;  %v2549_v38 = vmul.f32 0.00390625, %v2546_v35  ;;  %v2539_v7 = vld [vmem:[#allocation23] sm:$0x3]  ;;  %v2642_v34 = vld [vmem:[#allocation26] sm:$0x3] }
 0xa62   : > { %v2578_v8 = vrot.slane %v2539_v7, %v7408_v63  ;;  %v2647_v35 = vrot.slane %v2642_v34, %v7408_v63 }
 0xa63   : > { %v2552_v39 = vsub.f32 %v2535_v9, %v2549_v38  ;;  %v2553_v40 = vsub.f32 %v2537_v11, %v2549_v38  ;;  %v2554_v41 = vmul.f32 %v2550_v36, %v2550_v36  ;;  %v2555_v42 = vmul.f32 %v2551_v37, %v2551_v37  ;;  %v2540_v11 = vld [vmem:[#allocation25] sm:$0x3] }
 0xa64   : > { %v2582_v9 = vrot.slane %v2539_v7, %v7410_v1  ;;  %v2593_v15 = vrot.slane %v2540_v11, %v7408_v63  ;;  %v2597_v16 = vrot.slane %v2540_v11, %v7410_v1  ;;  %v5679_v7 = vld [vmem:[%s7709_s4 + $0x18] sm:$0xff]   ;;  %v5683_v11 = vld [vmem:[%s7709_s4 + $0x28] sm:$0xff]  }
 0xa65   : > { %v2558_v43 = vadd.f32 %v2555_v42, %v2554_v41  ;;  %v2556_v44 = vmul.f32 %v2552_v39, %v2552_v39  ;;  %v2557_v45 = vmul.f32 %v2553_v40, %v2553_v40 }
 0xa67   : > { %2559 = vadd.xlane.f32.xlu1 %v2558_v43  ;;  %v2561_v46 = vadd.f32 %v2557_v45, %v2556_v44 }
 0xa6b   : > { %2562 = vadd.xlane.f32.xlu1 %v2561_v46 }
 0xaf4   : > { %v2560_v0 = vpop.xlane.xlu1 %2559 }
 0xaf5   : > { %v2564_v2 = vmul.f32 0.00390625, %v2560_v0 }
 0xaf7   : > { %v2566_v3 = vadd.f32 1e-05, %v2564_v2  ;;  %v5674_v2 = vld [vmem:[%s7709_s4 + $0x48] sm:$0xff]  }
 0xaf8   : > { %v2563_v4 = vpop.xlane.xlu1 %2562 }
 0xaf9   : > { %5776 = vrsqrt.f32 %v2566_v3  ;;  %v2565_v5 = vmul.f32 0.00390625, %v2563_v4  ;;  %v5675_v3 = vld [vmem:[%s7709_s4 + $0x8] sm:$0xff]   ;;  %v5676_v4 = vld [vmem:[%s7709_s4 + $0x50] sm:$0xff]  }
 0xafb   : > { %v2567_v6 = vadd.f32 1e-05, %v2565_v5  ;;  %v5677_v5 = vld [vmem:[%s7709_s4 + $0x10] sm:$0xff]  }
 0xafd   : > { %5778 = vrsqrt.f32 %v2567_v6  ;;  %v5678_v6 = vld [vmem:[%s7709_s4 + $0x58] sm:$0xff]  }
 0xb03   : > { %v5777_v10 = vpop.eup %5776 }
 0xb04   : > { %v2570_v12 = vmul.f32 %v5777_v10, %v2550_v36  ;;  %v2571_v13 = vmul.f32 %v5777_v10, %v2551_v37  ;;  %v2651_v36 = vrot.slane %v2642_v34, %v7410_v1  ;;  %v5682_v10 = vld [vmem:[%s7709_s4 + $0x68] sm:$0xff]  }
 0xb06   : > { %v2586_v14 = vmul.f32 %v2582_v9, %v2571_v13  ;;  %v2585_v17 = vmul.f32 %v2578_v8, %v2570_v12  ;;  %v5684_v12 = vld [vmem:[%s7709_s4 + $0x70] sm:$0xff]  }
 0xb07   : > { %v5779_v18 = vpop.eup %5778  ;;  %v5685_v13 = vld [vmem:[%s7709_s4 + $0x30] sm:$0xff]  }
 0xb08   : > { %v2572_v19 = vmul.f32 %v5779_v18, %v2552_v39  ;;  %v2573_v20 = vmul.f32 %v5779_v18, %v2553_v40  ;;  %v2601_v24 = vadd.f32 %v2597_v16, %v2586_v14  ;;  %v2600_v26 = vadd.f32 %v2593_v15, %v2585_v17  ;;  %v5686_v14 = vld [vmem:[%s7709_s4 + $0x78] sm:$0xff]  }
 0xb0a   : > { %v2588_v22 = vmul.f32 %v2582_v9, %v2573_v20  ;;  %v2587_v25 = vmul.f32 %v2578_v8, %v2572_v19  ;;  %v2605_v28 = vmax.f32 %v2601_v24, 0.0  ;;  %v2604_v30 = vmax.f32 %v2600_v26, 0.0  ;;  %v5680_v8 = vld [vmem:[%s7709_s4 + $0x60] sm:$0xff]   ;;  %v2857_v24 = vld [vmem:[#allocation28] sm:$0x3] }
 0xb0b   : > { %v5681_v9 = vld [vmem:[%s7709_s4 + $0x20] sm:$0xff]   ;;  %v2899_v26 = vrot.slane %v2857_v24, %v7410_v1 }
 0xb0c   : > { %v2603_v21 = vadd.f32 %v2597_v16, %v2588_v22  ;;  %v2602_v23 = vadd.f32 %v2593_v15, %v2587_v25  ;;  %v5687_v15 = vld [vmem:[%s7709_s4 + $0x38] sm:$0xff]   ;;  %v2895_v25 = vrot.slane %v2857_v24, %v7408_v63 }
 0xb0e   : > { %v2607_v29 = vmax.f32 %v2603_v21, 0.0  ;;  %v2606_v31 = vmax.f32 %v2602_v23, 0.0  ;;  %v2858_v23 = vld [vmem:[#allocation29] sm:$0x3] }
 0xb10   : > { %v2609_v32 = vpack.c.bf16 %v2607_v29, %v2605_v28  ;;  %v2608_v33 = vpack.c.bf16 %v2606_v31, %v2604_v30  ;;  %v2910_v31 = vrot.slane %v2858_v23, %v7408_v63 }
 0xb12   : > { %2846 = vmatprep.mubr.bf16.mxu0 %v2609_v32  ;;  %v2914_v32 = vrot.slane %v2858_v23, %v7410_v1  ;;  %v3180_v23 = vld [vmem:[#allocation34] sm:$0x3] }
 0xb13   : > { %2847 = vmatmul.mubr.bf16.vlgmr.msra.gmra.mrb[4].mxu0 %v2608_v33 }
 0xb14   : > { %3304 = vmatprep.mubr.bf16.mxu0 %v6714_v50  ;;  %v5672_v50 = vld [vmem:[%s7709_s4 + $0x40] sm:$0xff]  }
 0xb15   : > { %5108 = vmatprep.subr.bf16.mxu1 %v5672_v50 }
 0xb16   : > { %5109 = vmatpush3.bf16.msra.mxu1 %v5673_v47 }
 0xb17   : > { %5110 = vmatprep.subr.bf16.mxu1 %v5674_v2 }
 0xb1a   : > { %5111 = vmatpush3.bf16.msra.mxu1 %v5675_v3  ;;  %v4939_v3 = vld [vmem:[#allocation31] ss:$0 sm:$0xff] }
 0xb1b   : > { %5112 = vmatprep.subr.bf16.mxu1 %v5676_v4 }
 0xb1e   : > { %5113 = vmatpush3.bf16.msra.mxu1 %v5677_v5 }
 0xb1f   : > { %5114 = vmatprep.subr.bf16.mxu1 %v5678_v6 }
 0xb22   : > { %5115 = vmatpush3.bf16.msra.mxu1 %v5679_v7 }
 0xb23   : > { %5116 = vmatprep.subr.bf16.mxu1 %v5680_v8 }
 0xb26   : > { %5117 = vmatpush3.bf16.msra.mxu1 %v5681_v9 }
 0xb27   : > { %5118 = vmatprep.subr.bf16.mxu1 %v5682_v10 }
 0xb2a   : > { %5119 = vmatpush3.bf16.msra.mxu1 %v5683_v11 }
 0xb2b   : > { %5120 = vmatprep.subr.bf16.mxu1 %v5684_v12 }
 0xb2e   : > { %5121 = vmatpush3.bf16.msra.mxu1 %v5685_v13 }
 0xb2f   : > { %5122 = vmatprep.subr.bf16.mxu1 %v5686_v14  ;;  %v3105_v14 = vld [vmem:[#allocation7] sm:$0xf] }
 0xb32   : > { %5123 = vmatpush3.bf16.msra.mxu1 %v5687_v15  ;;  %v5711_v15 = vld [vmem:[#allocation32 + $0x74] ss:$8 sps:$4 sm:$0xff]  }
 0xb33   : > { %5182 = vmatprep.subr.bf16.mxu1 %v6711_v27 }
 0xbe6   : > { %v2848_v37 = vpop.f32.mrb[4].mxu0 }
 0xbe7   : > { %v2849_v38 = vadd.f32 %v2848_v37, %v2647_v35  ;;  %v2850_v39 = vpop.f32.mrb[5].mxu0 }
 0xbe8   : > { %v2851_v40 = vadd.f32 %v2850_v39, %v2651_v36  ;;  %v2852_v41 = vpop.f32.mrb[6].mxu0 }
 0xbe9   : > { %v2854_v42 = vpop.f32.mrb[7].mxu0  ;;  %v2853_v43 = vadd.f32 %v2852_v41, %v2647_v35 }
 0xbea   : > { %v2855_v44 = vadd.f32 %v2854_v42, %v2651_v36  ;;  %v2859_v45 = vadd.f32 %v2851_v40, %v2849_v38 }
 0xbec   : > { %2860 = vadd.xlane.f32.xlu1 %v2859_v45  ;;  %v2862_v46 = vadd.f32 %v2855_v44, %v2853_v43 }
 0xbf0   : > { %2863 = vadd.xlane.f32.xlu1 %v2862_v46 }
 0xc79   : > { %v2861_v48 = vpop.xlane.xlu1 %2860 }
 0xc7a   : > { %v2865_v49 = vmul.f32 0.00390625, %v2861_v48  ;;  %v3151_v48 = vld [vmem:[%s7710_s3] sm:$0xff]  ;;  %s7716_s3 = sld [smem:[#allocation81_spill]] }
 0xc7c   : > { %v2867_v51 = vsub.f32 %v2849_v38, %v2865_v49  ;;  %v2868_v52 = vsub.f32 %v2851_v40, %v2865_v49  ;;  %v5688_v49 = vld [vmem:[#allocation32] ss:$8 sps:$4 sm:$0xff]  }
 0xc7d   : > { %v2864_v53 = vpop.xlane.xlu1 %2863 }
 0xc7e   : > { %v2866_v54 = vmul.f32 0.00390625, %v2864_v53  ;;  %v2871_v55 = vmul.f32 %v2867_v51, %v2867_v51  ;;  %v2872_v56 = vmul.f32 %v2868_v52, %v2868_v52  ;;  %v5691_v53 = vld [vmem:[#allocation32 + $0x10] ss:$8 sps:$4 sm:$0xff]  }
 0xc80   : > { %v2869_v57 = vsub.f32 %v2853_v43, %v2866_v54  ;;  %v2870_v58 = vsub.f32 %v2855_v44, %v2866_v54  ;;  %v2875_v59 = vadd.f32 %v2872_v56, %v2871_v55  ;;  %v5696_v54 = vld [vmem:[#allocation32 + $0x24] ss:$8 sps:$4 sm:$0xff]   ;;  %v5694_v55 = vld [vmem:[#allocation32 + $0x20] ss:$8 sps:$4 sm:$0xff]   ;;  %v5699_v56 = vld [vmem:[#allocation32 + $0x34] ss:$8 sps:$4 sm:$0xff]  }
 0xc82   : > { %2876 = vadd.xlane.f32.xlu1 %v2875_v59  ;;  %v2873_v60 = vmul.f32 %v2869_v57, %v2869_v57  ;;  %v2874_v62 = vmul.f32 %v2870_v58, %v2870_v58  ;;  %v5705_v59 = vld [vmem:[#allocation32 + $0x54] ss:$8 sps:$4 sm:$0xff]  }
 0xc84   : > { %v2878_v0 = vadd.f32 %v2874_v62, %v2873_v60  ;;  %v5703_v60 = vld [vmem:[#allocation32 + $0x50] ss:$8 sps:$4 sm:$0xff]   ;;  %v5708_v62 = vld [vmem:[#allocation32 + $0x64] ss:$8 sps:$4 sm:$0xff]  }
 0xc86   : > { %2879 = vadd.xlane.f32.xlu1 %v2878_v0  ;;  %v5706_v0 = vld [vmem:[#allocation32 + $0x60] ss:$8 sps:$4 sm:$0xff]  }
 0xc97   : > { %3154 = vperm.xlu1 %5597, %v3151_v48   ;;  %v5732_v48 = vld [vmem:[%s7711_s1 + $0x64] ss:$8 sps:$4 sm:$0xff]  }
 0xd0f   : > { %v2877_v16 = vpop.xlane.xlu1 %2876 }
 0xd10   : > { %v2881_v17 = vmul.f32 0.00390625, %v2877_v16  ;;  %v5709_v16 = vld [vmem:[#allocation32 + $0x70] ss:$8 sps:$4 sm:$0xff]  }
 0xd12   : > { %v2883_v18 = vadd.f32 1e-05, %v2881_v17 }
 0xd13   : > { %v2880_v19 = vpop.xlane.xlu1 %2879 }
 0xd14   : > { %5780 = vrsqrt.f32 %v2883_v18  ;;  %v2882_v20 = vmul.f32 0.00390625, %v2880_v19  ;;  %v3160_v19 = vpop.permute.xlu0 %3159 }
 0xd16   : > { %v2884_v22 = vadd.f32 1e-05, %v2882_v20 }
 0xd17   : > { %v3155_v17 = vpop.permute.xlu1 %3154 }
 0xd18   : > { %5782 = vrsqrt.f32 %v2884_v22 }
 0xd1e   : > { %v5781_v21 = vpop.eup %5780 }
 0xd1f   : > { %v2887_v28 = vmul.f32 %v5781_v21, %v2867_v51  ;;  %v2888_v29 = vmul.f32 %v5781_v21, %v2868_v52  ;;  %v5690_v51 = vld [vmem:[#allocation32 + $0x4] ss:$8 sps:$4 sm:$0xff]   ;;  %v5693_v52 = vld [vmem:[#allocation32 + $0x14] ss:$8 sps:$4 sm:$0xff]  }
 0xd20   : > { %3272 = vmatprep.subr.bf16.mxu0 %v5690_v51  ;;  %v5735_v51 = vld [vmem:[%s7711_s1 + $0x74] ss:$8 sps:$4 sm:$0xff]  }
 0xd21   : > { %v2903_v30 = vmul.f32 %v2899_v26, %v2888_v29  ;;  %v2902_v33 = vmul.f32 %v2895_v25, %v2887_v28  ;;  %3273 = vmatpush1.bf16.msra.mxu0 %v5688_v49  ;;  %v3185_v28 = vrot.slane %v3180_v23, %v7408_v63  ;;  %v3189_v29 = vrot.slane %v3180_v23, %v7410_v1  ;;  %v5730_v49 = vld [vmem:[%s7711_s1 + $0x60] ss:$8 sps:$4 sm:$0xff]  }
 0xd22   : > { %v5783_v34 = vpop.eup %5782  ;;  %3274 = vmatprep.subr.bf16.mxu0 %v5693_v52  ;;  %v5733_v52 = vld [vmem:[%s7711_s1 + $0x70] ss:$8 sps:$4 sm:$0xff]  }
 0xd23   : > { %v2889_v35 = vmul.f32 %v5783_v34, %v2869_v57  ;;  %v2890_v36 = vmul.f32 %v5783_v34, %v2870_v58  ;;  %v2918_v38 = vadd.f32 %v2914_v32, %v2903_v30  ;;  %v2917_v40 = vadd.f32 %v2910_v31, %v2902_v33  ;;  %v5697_v57 = vld [vmem:[#allocation32 + $0x30] ss:$8 sps:$4 sm:$0xff]   ;;  %v5702_v58 = vld [vmem:[#allocation32 + $0x44] ss:$8 sps:$4 sm:$0xff]  }
 0xd25   : > { %v2905_v37 = vmul.f32 %v2899_v26, %v2890_v36  ;;  %v2904_v39 = vmul.f32 %v2895_v25, %v2889_v35  ;;  %v2922_v43 = vmax.f32 %v2918_v38, 0.0  ;;  %v2921_v45 = vmax.f32 %v2917_v40, 0.0  ;;  %3275 = vmatpush1.bf16.msra.mxu0 %v5691_v53  ;;  %v5714_v38 = vld [vmem:[%s7711_s1 + $0x4] ss:$8 sps:$4 sm:$0xff]   ;;  %v5715_v40 = vld [vmem:[%s7711_s1 + $0x10] ss:$8 sps:$4 sm:$0xff]  }
 0xd26   : > { %3276 = vmatprep.subr.bf16.mxu0 %v5696_v54  ;;  %v5738_v53 = vld [vmem:[%s7711_s1 + $0x84] ss:$8 sps:$4 sm:$0xff]   ;;  %v5736_v54 = vld [vmem:[%s7711_s1 + $0x80] ss:$8 sps:$4 sm:$0xff]  }
 0xd27   : > { %v2920_v41 = vadd.f32 %v2914_v32, %v2905_v37  ;;  %v2919_v42 = vadd.f32 %v2910_v31, %v2904_v39  ;;  %v5712_v37 = vld [vmem:[%s7711_s1] ss:$8 sps:$4 sm:$0xff]   ;;  %v5717_v39 = vld [vmem:[%s7711_s1 + $0x14] ss:$8 sps:$4 sm:$0xff]  }
 0xd29   : > { %v2924_v44 = vmax.f32 %v2920_v41, 0.0  ;;  %v2923_v46 = vmax.f32 %v2919_v42, 0.0  ;;  %3277 = vmatpush1.bf16.msra.mxu0 %v5694_v55  ;;  %v5720_v41 = vld [vmem:[%s7711_s1 + $0x24] ss:$8 sps:$4 sm:$0xff]   ;;  %v5718_v42 = vld [vmem:[%s7711_s1 + $0x20] ss:$8 sps:$4 sm:$0xff]  }
 0xd2a   : > { %3278 = vmatprep.subr.bf16.mxu0 %v5699_v56  ;;  %v5741_v55 = vld [vmem:[%s7711_s1 + $0x94] ss:$8 sps:$4 sm:$0xff]   ;;  %v5739_v56 = vld [vmem:[%s7711_s1 + $0x90] ss:$8 sps:$4 sm:$0xff]  }
 0xd2b   : > { %v2926_v50 = vpack.c.bf16 %v2924_v44, %v2922_v43  ;;  %v2925_v47 = vpack.c.bf16 %v2923_v46, %v2921_v45  ;;  %v5723_v43 = vld [vmem:[%s7711_s1 + $0x34] ss:$8 sps:$4 sm:$0xff]   ;;  %v5721_v44 = vld [vmem:[%s7711_s1 + $0x30] ss:$8 sps:$4 sm:$0xff]   ;;  %v5726_v45 = vld [vmem:[%s7711_s1 + $0x44] ss:$8 sps:$4 sm:$0xff]  }
 0xd2c   : > { %v5724_v46 = vld [vmem:[%s7711_s1 + $0x40] ss:$8 sps:$4 sm:$0xff]  }
 0xd2d   : > { %3094 = vmatprep.mubr.bf16.mxu1 %v2926_v50  ;;  %3279 = vmatpush1.bf16.msra.mxu0 %v5697_v57  ;;  %v5729_v50 = vld [vmem:[%s7711_s1 + $0x54] ss:$8 sps:$4 sm:$0xff]  }
 0xd2e   : > { %3095 = vmatmul.mubr.bf16.vlgmr.msra.gmra.mrb[4].mxu1 %v2925_v47  ;;  %3280 = vmatprep.subr.bf16.mxu0 %v5702_v58  ;;  %v5727_v47 = vld [vmem:[%s7711_s1 + $0x50] ss:$8 sps:$4 sm:$0xff]  }
 0xd2f   : > { %5184 = vmatprep.mubr.msk.bf16.mxu1 %vm6712_vm2, %v6711_v27  ;;  %v5700_v27 = vld [vmem:[#allocation32 + $0x40] ss:$8 sps:$4 sm:$0xff]  }
 0xd31   : > { %3281 = vmatpush1.bf16.msra.mxu0 %v5700_v27 }
 0xd32   : > { %3282 = vmatprep.subr.bf16.mxu0 %v5705_v59 }
 0xd35   : > { %3283 = vmatpush1.bf16.msra.mxu0 %v5703_v60 }
 0xd36   : > { %3284 = vmatprep.subr.bf16.mxu0 %v5708_v62 }
 0xd39   : > { %3285 = vmatpush1.bf16.msra.mxu0 %v5706_v0 }
 0xd3a   : > { %3286 = vmatprep.subr.bf16.mxu0 %v5711_v15 }
 0xd3d   : > { %3287 = vmatpush1.bf16.msra.mxu0 %v5709_v16 }
 0xe01   : > { %v5124_v2 = vpop.f32.mrb[4].mxu1 }
 0xe02   : > { %v5125_v4 = vpop.f32.mrb[5].mxu1 }
 0xe03   : > { %v5126_v5 = vadd.f32 %v5125_v4, %v5124_v2  ;;  %v5127_v6 = vpop.f32.mrb[6].mxu1  ;;  %v5744_v2 = vld [vmem:[%s7711_s1 + $0xa4] ss:$8 sps:$4 sm:$0xff]   ;;  %v5747_v4 = vld [vmem:[%s7711_s1 + $0xb4] ss:$8 sps:$4 sm:$0xff]  }
 0xe04   : > { %v5128_v7 = vpop.f32.mrb[7].mxu1 }
 0xe05   : > { %v3097_v8 = vadd.f32 %v5126_v5, %v4939_v3  ;;  %v5129_v9 = vadd.f32 %v5128_v7, %v5127_v6  ;;  %v5745_v5 = vld [vmem:[%s7711_s1 + $0xb0] ss:$8 sps:$4 sm:$0xff]   ;;  %v5750_v6 = vld [vmem:[%s7711_s1 + $0xc4] ss:$8 sps:$4 sm:$0xff]   ;;  %v5748_v7 = vld [vmem:[%s7711_s1 + $0xc0] ss:$8 sps:$4 sm:$0xff]  }
 0xe07   : > { %v3100_v10 = vadd.f32 %v5129_v9, %v4939_v3  ;;  %5784 = vtanh.f32 %v3097_v8  ;;  %v5742_v3 = vld [vmem:[%s7711_s1 + $0xa0] ss:$8 sps:$4 sm:$0xff]   ;;  %v5753_v8 = vld [vmem:[%s7711_s1 + $0xd4] ss:$8 sps:$4 sm:$0xff]   ;;  %v5751_v9 = vld [vmem:[%s7711_s1 + $0xd0] ss:$8 sps:$4 sm:$0xff]  }
 0xe09   : > { %5786 = vtanh.f32 %v3100_v10  ;;  %v5754_v10 = vld [vmem:[%s7711_s1 + $0xe0] ss:$8 sps:$4 sm:$0xff]  }
 0xe11   : > { %v5785_v11 = vpop.eup %5784 }
 0xe13   : > { %v5787_v12 = vpop.eup %5786 }
 0xe14   : > { %v3106_v13 = vpack.c.bf16 %v5787_v12, %v5785_v11  ;;  %v5756_v11 = vld [vmem:[%s7711_s1 + $0xe4] ss:$8 sps:$4 sm:$0xff]   ;;  %v5759_v12 = vld [vmem:[%s7711_s1 + $0xf4] ss:$8 sps:$4 sm:$0xff]  }
 0xe16   : > { %5183 = vmatpush3.bf16.msra.mxu1 %v3106_v13  ;;  %v5757_v13 = vld [vmem:[%s7711_s1 + $0xf0] ss:$8 sps:$4 sm:$0xff]  }
 0xe17   : > { %3565 = vmatprep.subr.bf16.mxu1 %v5714_v38 }
 0xe19   : > { %5185 = vmatmul.mubr.msk.bf16.vlgmr.msra.gmra.mrb[8].mxu1 %vm3107_vm5, %v3105_v14 }
 0xe1a   : > { %3566 = vmatpush1.bf16.msra.mxu1 %v5712_v37 }
 0xe1b   : > { %3567 = vmatprep.subr.bf16.mxu1 %v5717_v39 }
 0xe1e   : > { %3568 = vmatpush1.bf16.msra.mxu1 %v5715_v40 }
 0xe1f   : > { %3569 = vmatprep.subr.bf16.mxu1 %v5720_v41 }
 0xe22   : > { %3570 = vmatpush1.bf16.msra.mxu1 %v5718_v42 }
 0xe23   : > { %3571 = vmatprep.subr.bf16.mxu1 %v5723_v43 }
 0xe26   : > { %3572 = vmatpush1.bf16.msra.mxu1 %v5721_v44 }
 0xe27   : > { %3573 = vmatprep.subr.bf16.mxu1 %v5726_v45  ;;  %v5760_v45 = vld [vmem:[%s7713_s10 + $0x40] sm:$0xff]  }
 0xe28   : > { %5132 = vmatprep.subr.bf16.mxu0 %v5760_v45 }
 0xe2a   : > { %3574 = vmatpush1.bf16.msra.mxu1 %v5724_v46  ;;  %v5761_v46 = vld [vmem:[%s7713_s10] sm:$0xff]  }
 0xe2b   : > { %3575 = vmatprep.subr.bf16.mxu1 %v5729_v50  ;;  %v5762_v50 = vld [vmem:[%s7713_s10 + $0x48] sm:$0xff]  }
 0xe2e   : > { %3576 = vmatpush1.bf16.msra.mxu1 %v5727_v47  ;;  %v5763_v47 = vld [vmem:[%s7713_s10 + $0x8] sm:$0xff]  }
 0xe2f   : > { %3577 = vmatprep.subr.bf16.mxu1 %v5732_v48 }
 0xe32   : > { %3578 = vmatpush1.bf16.msra.mxu1 %v5730_v49 }
 0xe33   : > { %3579 = vmatprep.subr.bf16.mxu1 %v5735_v51 }
 0xe36   : > { %3580 = vmatpush1.bf16.msra.mxu1 %v5733_v52 }
 0xe37   : > { %3581 = vmatprep.subr.bf16.mxu1 %v5738_v53 }
 0xe3a   : > { %3582 = vmatpush1.bf16.msra.mxu1 %v5736_v54 }
 0xe3b   : > { %3583 = vmatprep.subr.bf16.mxu1 %v5741_v55 }
 0xe3e   : > { %3584 = vmatpush1.bf16.msra.mxu1 %v5739_v56  ;;  %v5764_v56 = vld [vmem:[%s7713_s10 + $0x50] sm:$0xff]  }
 0xe3f   : > { %3585 = vmatprep.subr.bf16.mxu1 %v5744_v2  ;;  %v5772_v2 = vld [vmem:[%s7713_s10 + $0x70] sm:$0xff]  }
 0xe42   : > { %3586 = vmatpush1.bf16.msra.mxu1 %v5742_v3  ;;  %v5773_v3 = vld [vmem:[%s7713_s10 + $0x30] sm:$0xff]  }
 0xe43   : > { %3587 = vmatprep.subr.bf16.mxu1 %v5747_v4  ;;  %v5774_v4 = vld [vmem:[%s7713_s10 + $0x78] sm:$0xff]  }
 0xe46   : > { %3588 = vmatpush1.bf16.msra.mxu1 %v5745_v5  ;;  %v5775_v5 = vld [vmem:[%s7713_s10 + $0x38] sm:$0xff]  }
 0xe47   : > { %3589 = vmatprep.subr.bf16.mxu1 %v5750_v6 }
 0xe4a   : > { %3590 = vmatpush1.bf16.msra.mxu1 %v5748_v7 }
 0xe4b   : > { %3591 = vmatprep.subr.bf16.mxu1 %v5753_v8 }
 0xe4e   : > { %3592 = vmatpush1.bf16.msra.mxu1 %v5751_v9  ;;  %v3606_v9 = vld [vmem:[%s7714_s0] sm:$0x3]  ;;  %s7719_s0 = sld [smem:[#allocation85_spill]] (!%p5022_p7) }
 0xe4f   : > { %3593 = vmatprep.subr.bf16.mxu1 %v5756_v11  ;;  %v3628_v11 = vrot.slane %v3606_v9, %v7408_v63 }
 0xe52   : > { %3594 = vmatpush1.bf16.msra.mxu1 %v5754_v10  ;;  %v3607_v10 = vld [vmem:[%s7715_s26] sm:$0x3]  ;;  %s7720_s26 = sld [smem:[#allocation87_spill]] (!%p5022_p7) }
 0xe53   : > { %3595 = vmatprep.subr.bf16.mxu1 %v5759_v12  ;;  %v3632_v12 = vrot.slane %v3606_v9, %v7410_v1  ;;  %v5828_v9 = vld [vmem:[#allocation40 + $0x84] ss:$8 sps:$4 sm:$0xff] (!%p5022_p7)  }
 0xe56   : > { %3596 = vmatpush1.bf16.msra.mxu1 %v5757_v13 }
 0xeec   : > { %v3145_v18 = vpop.f32.mrb[8].mxu1 }
 0xeed   : > { %v3157_v20 = vmul.f32 %v3155_v17, %v3145_v18  ;;  %v5186_v22 = vpop.f32.mrb[9].mxu1  ;;  %v3313_v17 = vld [vmem:[#allocation35] sm:$0x3]  ;;  %v3314_v18 = vld [vmem:[#allocation37] sm:$0x3] }
 0xeee   : > { %v3148_v24 = vpop.f32.mrb[10].mxu1 }
 0xeef   : > { %v3162_v25 = vsel %vm2384_vm4, %v3157_v20, %v3160_v19  ;;  %v5187_v26 = vpop.f32.mrb[11].mxu1  ;;  %v3335_v19 = vrot.slane %v3313_v17, %v7408_v63  ;;  %v3339_v20 = vrot.slane %v3313_v17, %v7410_v1  ;;  %v3645_v17 = vrot.slane %v3607_v10, %v7410_v1 }
 0xef0   : > { %v3163_v21 = vpack.c.bf16 %v3162_v25, %v3162_v25  ;;  %v3348_v26 = vrot.slane %v3314_v18, %v7408_v63 }
 0xef2   : > { %3305 = vmatmul.mubr.bf16.vlgmr.msra.gmra.mrb[8].mxu0 %v3163_v21  ;;  %v3352_v21 = vrot.slane %v3314_v18, %v7410_v1 }
 0xef3   : > { %5133 = vmatpush3.bf16.msra.mxu0 %v5761_v46 }
 0xef4   : > { %5134 = vmatprep.subr.bf16.mxu0 %v5762_v50 }
 0xef7   : > { %5135 = vmatpush3.bf16.msra.mxu0 %v5763_v47 }
 0xef8   : > { %5136 = vmatprep.subr.bf16.mxu0 %v5764_v56  ;;  %v5806_v56 = vld [vmem:[#allocation40] ss:$8 sps:$4 sm:$0xff] (!%p5022_p7)  }
 0xfc5   : > { %v3306_v30 = vpop.f32.mrb[8].mxu0 }
 0xfc6   : > { %v3307_v31 = vadd.f32 %v3306_v30, %v3185_v28  ;;  %v3308_v32 = vpop.f32.mrb[9].mxu0 }
 0xfc7   : > { %v3309_v33 = vadd.f32 %v3308_v32, %v3189_v29  ;;  %v3310_v34 = vpop.f32.mrb[10].mxu0 }
 0xfc8   : > { %v3311_v35 = vpop.f32.mrb[11].mxu0 }
 0xfc9   : > { %v3315_v36 = vadd.f32 %v3309_v33, %v3307_v31  ;;  %v3393_v35 = vld [vmem:[%s7712_s13] sm:$0x3]  ;;  %s7717_s13 = sld [smem:[#allocation83_spill]] (!%p5022_p7) }
 0xfca   : > { %v3402_v37 = vrot.slane %v3393_v35, %v7410_v1 }
 0xfcb   : > { %3316 = vadd.xlane.f32.xlu1 %v3315_v36  ;;  %v3398_v36 = vrot.slane %v3393_v35, %v7408_v63  ;;  %v5794_v35 = vld [vmem:[#allocation38] ss:$8 sps:$4 sm:$0xff] (!%p5022_p7)  }
 0xfcf   : > { %v3844_v45 = vld [vmem:[%s7717_s13] sm:$0x3] (!%p5022_p7) }
 0xfd0   : > { %v3849_v46 = vrot.slane (!%p5022_p7), %v3844_v45, %v7408_v63  ;;  %v3853_v50 = vrot.slane (!%p5022_p7), %v3844_v45, %v7410_v1 }
0x1058   : > { %v3317_v57 = vpop.xlane.xlu1 %3316 }
0x1059   : > { %v3318_v58 = vmul.f32 0.00390625, %v3317_v57  ;;  %v5765_v57 = vld [vmem:[%s7713_s10 + $0x10] sm:$0xff]  }
0x105a   : > { %5137 = vmatpush3.bf16.msra.mxu0 %v5765_v57  ;;  %v5807_v57 = vld [vmem:[#allocation40 + $0x14] ss:$8 sps:$4 sm:$0xff] (!%p5022_p7)  }
0x105b   : > { %v3319_v27 = vsub.f32 %v3307_v31, %v3318_v58  ;;  %v3320_v59 = vsub.f32 %v3309_v33, %v3318_v58  ;;  %v5766_v58 = vld [vmem:[%s7713_s10 + $0x58] sm:$0xff]  }
0x105c   : > { %5138 = vmatprep.subr.bf16.mxu0 %v5766_v58  ;;  %v5809_v58 = vld [vmem:[#allocation40 + $0x10] ss:$8 sps:$4 sm:$0xff] (!%p5022_p7)  }
0x105d   : > { %v3321_v60 = vmul.f32 %v3319_v27, %v3319_v27  ;;  %v3322_v62 = vmul.f32 %v3320_v59, %v3320_v59 }
0x105f   : > { %v3323_v0 = vadd.f32 %v3322_v62, %v3321_v60  ;;  %v5769_v60 = vld [vmem:[%s7713_s10 + $0x20] sm:$0xff]   ;;  %v5770_v62 = vld [vmem:[%s7713_s10 + $0x68] sm:$0xff]  }
0x1061   : > { %3324 = vadd.xlane.f32.xlu0 %v3323_v0  ;;  %v5771_v0 = vld [vmem:[%s7713_s10 + $0x28] sm:$0xff]  }
0x10ee   : > { %v3325_v14 = vpop.xlane.xlu0 %3324 }
0x10ef   : > { %v3326_v15 = vmul.f32 0.00390625, %v3325_v14 }
0x10f1   : > { %v3327_v16 = vadd.f32 1e-05, %v3326_v15 }
0x10f3   : > { %5788 = vrsqrt.f32 %v3327_v16  ;;  %v3641_v16 = vrot.slane %v3607_v10, %v7408_v63  ;;  %v5830_v10 = vld [vmem:[#allocation40 + $0x80] ss:$8 sps:$4 sm:$0xff] (!%p5022_p7)  }
0x10fd   : > { %v5789_v22 = vpop.eup %5788 }
0x10fe   : > { %v3329_v24 = vmul.f32 %v5789_v22, %v3319_v27  ;;  %v3330_v25 = vmul.f32 %v5789_v22, %v3320_v59  ;;  %v5767_v27 = vld [vmem:[%s7713_s10 + $0x18] sm:$0xff]   ;;  %v5768_v59 = vld [vmem:[%s7713_s10 + $0x60] sm:$0xff]  }
0x10ff   : > { %5139 = vmatpush3.bf16.msra.mxu0 %v5767_v27  ;;  %v5810_v27 = vld [vmem:[#allocation40 + $0x24] ss:$8 sps:$4 sm:$0xff] (!%p5022_p7)  }
0x1100   : > { %v3343_v23 = vmul.f32 %v3339_v20, %v3330_v25  ;;  %v3342_v28 = vmul.f32 %v3335_v19, %v3329_v24  ;;  %5140 = vmatprep.subr.bf16.mxu0 %v5768_v59  ;;  %v5812_v59 = vld [vmem:[#allocation40 + $0x20] ss:$8 sps:$4 sm:$0xff] (!%p5022_p7)  }
0x1102   : > { %v3356_v29 = vadd.f32 %v3352_v21, %v3343_v23  ;;  %v3355_v30 = vadd.f32 %v3348_v26, %v3342_v28  ;;  %v5005_v28 = vld [vmem:[%s7716_s3] ss:$0 sm:$0xff]  ;;  %s7721_s3 = sld [smem:[#allocation88_spill]] (!%p5022_p7) }
0x1103   : > { %5141 = vmatpush3.bf16.msra.mxu0 %v5769_v60  ;;  %v5813_v60 = vld [vmem:[#allocation40 + $0x34] ss:$8 sps:$4 sm:$0xff] (!%p5022_p7)  }
0x1104   : > { %v3358_v31 = vmax.f32 %v3356_v29, 0.0  ;;  %v3357_v32 = vmax.f32 %v3355_v30, 0.0  ;;  %5142 = vmatprep.subr.bf16.mxu0 %v5770_v62  ;;  %v5815_v62 = vld [vmem:[#allocation40 + $0x30] ss:$8 sps:$4 sm:$0xff] (!%p5022_p7)  }
0x1106   : > { %v3360_v33 = vpack.c.bf16 %v3358_v31, %v3358_v31  ;;  %v3359_v34 = vpack.c.bf16 %v3357_v32, %v3357_v32 }
0x1107   : > { %5143 = vmatpush3.bf16.msra.mxu0 %v5771_v0  ;;  %v5816_v0 = vld [vmem:[#allocation40 + $0x44] ss:$8 sps:$4 sm:$0xff] (!%p5022_p7)  }
0x1108   : > { %3597 = vmatprep.mubr.bf16.mxu1 %v3360_v33  ;;  %5144 = vmatprep.subr.bf16.mxu0 %v5772_v2  ;;  %v5818_v2 = vld [vmem:[#allocation40 + $0x40] ss:$8 sps:$4 sm:$0xff] (!%p5022_p7)  }
0x1109   : > { %3598 = vmatmul.mubr.bf16.vlgmr.msra.gmra.mrb[12].mxu1 %v3359_v34  ;;  %v5792_v34 = vld [vmem:[#allocation38 + $0x4] ss:$8 sps:$4 sm:$0xff] (!%p5022_p7)  }
0x110b   : > { %5145 = vmatpush3.bf16.msra.mxu0 %v5773_v3  ;;  %v5819_v3 = vld [vmem:[#allocation40 + $0x54] ss:$8 sps:$4 sm:$0xff] (!%p5022_p7)  }
0x110c   : > { %5146 = vmatprep.subr.bf16.mxu0 %v5774_v4  ;;  %v5821_v4 = vld [vmem:[#allocation40 + $0x50] ss:$8 sps:$4 sm:$0xff] (!%p5022_p7)  }
0x110f   : > { %5147 = vmatpush3.bf16.msra.mxu0 %v5775_v5  ;;  %v5822_v5 = vld [vmem:[#allocation40 + $0x64] ss:$8 sps:$4 sm:$0xff] (!%p5022_p7)  }
0x1110   : > { %3899 = vmatprep.subr.bf16.mxu0 (!%p5022_p7), %v5792_v34 }
0x11dc   : > { %v3599_v38 = vpop.f32.mrb[12].mxu1 }
0x11dd   : > { %v3600_v39 = vadd.f32 %v3599_v38, %v3398_v36  ;;  %v3601_v40 = vpop.f32.mrb[13].mxu1  ;;  %v6715_v36 = vmov (!%p5022_p7), 0   ;;  %v5797_v38 = vld [vmem:[#allocation38 + $0x10] ss:$8 sps:$4 sm:$0xff] (!%p5022_p7)  }
0x11de   : > { %v3602_v41 = vadd.f32 %v3601_v40, %v3402_v37  ;;  %v3603_v42 = vpop.f32.mrb[14].mxu1  ;;  %v5795_v37 = vld [vmem:[#allocation38 + $0x14] ss:$8 sps:$4 sm:$0xff] (!%p5022_p7)   ;;  %v5800_v40 = vld [vmem:[#allocation38 + $0x20] ss:$8 sps:$4 sm:$0xff] (!%p5022_p7)  }
0x11df   : > { %v3604_v43 = vpop.f32.mrb[15].mxu1  ;;  %v5803_v42 = vld [vmem:[#allocation38 + $0x30] ss:$8 sps:$4 sm:$0xff] (!%p5022_p7)  }
0x11e0   : > { %v3608_v44 = vadd.f32 %v3602_v41, %v3600_v39 }
0x11e2   : > { %3609 = vadd.xlane.f32.xlu1 %v3608_v44 }
0x126f   : > { %v3610_v48 = vpop.xlane.xlu1 %3609 }
0x1270   : > { %v3611_v49 = vmul.f32 0.00390625, %v3610_v48 }
0x1272   : > { %v3612_v51 = vsub.f32 %v3600_v39, %v3611_v49  ;;  %v3613_v52 = vsub.f32 %v3602_v41, %v3611_v49  ;;  %v5798_v39 = vld [vmem:[#allocation38 + $0x24] ss:$8 sps:$4 sm:$0xff] (!%p5022_p7)   ;;  %v5801_v41 = vld [vmem:[#allocation38 + $0x34] ss:$8 sps:$4 sm:$0xff] (!%p5022_p7)  }
0x1274   : > { %v3614_v53 = vmul.f32 %v3612_v51, %v3612_v51  ;;  %v3615_v54 = vmul.f32 %v3613_v52, %v3613_v52 }
0x1276   : > { %v3616_v55 = vadd.f32 %v3615_v54, %v3614_v53 }
0x1278   : > { %3617 = vadd.xlane.f32.xlu1 %v3616_v55  ;;  %v5804_v55 = vld [vmem:[#allocation40 + $0x4] ss:$8 sps:$4 sm:$0xff] (!%p5022_p7)  }
0x1279   : > { %4192 = vmatprep.subr.bf16.mxu1 (!%p5022_p7), %v5804_v55 }
0x127a   : > { %4193 = vmatpush1.bf16.msra.mxu1 (!%p5022_p7), %v5806_v56 }
0x127b   : > { %4194 = vmatprep.subr.bf16.mxu1 (!%p5022_p7), %v5807_v57 }
0x127e   : > { %4195 = vmatpush1.bf16.msra.mxu1 (!%p5022_p7), %v5809_v58 }
0x127f   : > { %4196 = vmatprep.subr.bf16.mxu1 (!%p5022_p7), %v5810_v27 }
0x1282   : > { %4197 = vmatpush1.bf16.msra.mxu1 (!%p5022_p7), %v5812_v59 }
0x1283   : > { %4198 = vmatprep.subr.bf16.mxu1 (!%p5022_p7), %v5813_v60 }
0x1286   : > { %4199 = vmatpush1.bf16.msra.mxu1 (!%p5022_p7), %v5815_v62 }
0x1287   : > { %4200 = vmatprep.subr.bf16.mxu1 (!%p5022_p7), %v5816_v0  ;;  %v5852_v0 = vld [vmem:[%s6939_s29 + $0x40] sm:$0xff] (!%p5022_p7)  }
0x128a   : > { %4201 = vmatpush1.bf16.msra.mxu1 (!%p5022_p7), %v5818_v2  ;;  %v5853_v2 = vld [vmem:[%s6939_s29] sm:$0xff] (!%p5022_p7)  }
0x128b   : > { %4202 = vmatprep.subr.bf16.mxu1 (!%p5022_p7), %v5819_v3  ;;  %v5854_v3 = vld [vmem:[%s6939_s29 + $0x48] sm:$0xff] (!%p5022_p7)  }
0x128e   : > { %4203 = vmatpush1.bf16.msra.mxu1 (!%p5022_p7), %v5821_v4  ;;  %v5855_v4 = vld [vmem:[%s6939_s29 + $0x8] sm:$0xff] (!%p5022_p7)  }
0x128f   : > { %4204 = vmatprep.subr.bf16.mxu1 (!%p5022_p7), %v5822_v5 }
0x1305   : > { %v3618_v6 = vpop.xlane.xlu1 %3617 }
0x1306   : > { %v3619_v7 = vmul.f32 0.00390625, %v3618_v6  ;;  %v5824_v6 = vld [vmem:[#allocation40 + $0x60] ss:$8 sps:$4 sm:$0xff] (!%p5022_p7)  }
0x1307   : > { %4205 = vmatpush1.bf16.msra.mxu1 (!%p5022_p7), %v5824_v6 }
0x1308   : > { %v3620_v8 = vadd.f32 1e-05, %v3619_v7  ;;  %v5825_v7 = vld [vmem:[#allocation40 + $0x74] ss:$8 sps:$4 sm:$0xff] (!%p5022_p7)  }
0x1309   : > { %4206 = vmatprep.subr.bf16.mxu1 (!%p5022_p7), %v5825_v7 }
0x130a   : > { %5790 = vrsqrt.f32 %v3620_v8  ;;  %v5827_v8 = vld [vmem:[#allocation40 + $0x70] ss:$8 sps:$4 sm:$0xff] (!%p5022_p7)  }
0x130b   : > { %4207 = vmatpush1.bf16.msra.mxu1 (!%p5022_p7), %v5827_v8 }
0x130c   : > { %4208 = vmatprep.subr.bf16.mxu1 (!%p5022_p7), %v5828_v9 }
0x130f   : > { %4209 = vmatpush1.bf16.msra.mxu1 (!%p5022_p7), %v5830_v10 }
0x1314   : > { %v5791_v13 = vpop.eup %5790 }
0x1315   : > { %v3622_v14 = vmul.f32 %v5791_v13, %v3612_v51  ;;  %v3623_v15 = vmul.f32 %v5791_v13, %v3613_v52 }
0x1317   : > { %v3636_v18 = vmul.f32 %v3632_v12, %v3623_v15  ;;  %v3635_v19 = vmul.f32 %v3628_v11, %v3622_v14  ;;  %v5831_v11 = vld [vmem:[#allocation40 + $0x94] ss:$8 sps:$4 sm:$0xff] (!%p5022_p7)   ;;  %v5833_v12 = vld [vmem:[#allocation40 + $0x90] ss:$8 sps:$4 sm:$0xff] (!%p5022_p7)  }
0x1318   : > { %4210 = vmatprep.subr.bf16.mxu1 (!%p5022_p7), %v5831_v11 }
0x1319   : > { %v3649_v20 = vadd.f32 %v3645_v17, %v3636_v18  ;;  %v3648_v22 = vadd.f32 %v3641_v16, %v3635_v19  ;;  %4211 = vmatpush1.bf16.msra.mxu1 (!%p5022_p7), %v5833_v12  ;;  %v5856_v12 = vld [vmem:[%s6939_s29 + $0x50] sm:$0xff] (!%p5022_p7)  }
0x131b   : > { %v3651_v24 = vmax.f32 %v3649_v20, 0.0  ;;  %v3650_v25 = vmax.f32 %v3648_v22, 0.0  ;;  %v5834_v20 = vld [vmem:[#allocation40 + $0xa4] ss:$8 sps:$4 sm:$0xff] (!%p5022_p7)   ;;  %v5836_v22 = vld [vmem:[#allocation40 + $0xa0] ss:$8 sps:$4 sm:$0xff] (!%p5022_p7)  }
0x131c   : > { %4212 = vmatprep.subr.bf16.mxu1 (!%p5022_p7), %v5834_v20  ;;  %v5864_v20 = vld [vmem:[%s6939_s29 + $0x70] sm:$0xff] (!%p5022_p7)  }
0x131d   : > { %v3653_v26 = vpack.c.bf16 %v3651_v24, %v3651_v24  ;;  %v3652_v21 = vpack.c.bf16 %v3650_v25, %v3650_v25  ;;  %4213 = vmatpush1.bf16.msra.mxu1 (!%p5022_p7), %v5836_v22  ;;  %v5837_v24 = vld [vmem:[#allocation40 + $0xb4] ss:$8 sps:$4 sm:$0xff] (!%p5022_p7)   ;;  %v5839_v25 = vld [vmem:[#allocation40 + $0xb0] ss:$8 sps:$4 sm:$0xff] (!%p5022_p7)  }
0x131e   : > { %4214 = vmatprep.subr.bf16.mxu1 (!%p5022_p7), %v5837_v24  ;;  %v5865_v22 = vld [vmem:[%s6939_s29 + $0x30] sm:$0xff] (!%p5022_p7)   ;;  %v5866_v24 = vld [vmem:[%s6939_s29 + $0x78] sm:$0xff] (!%p5022_p7)  }
0x131f   : > { %3821 = vmatprep.mubr.bf16.mxu0 %v3653_v26  ;;  %v5840_v26 = vld [vmem:[#allocation40 + $0xc4] ss:$8 sps:$4 sm:$0xff] (!%p5022_p7)  }
0x1320   : > { %3822 = vmatmul.mubr.bf16.vlgmr.msra.gmra.mrb[12].mxu0 %v3652_v21  ;;  %v5842_v21 = vld [vmem:[#allocation40 + $0xc0] ss:$8 sps:$4 sm:$0xff] (!%p5022_p7)  }
0x1321   : > { %3931 = vmatprep.mubr.bf16.mxu0 (!%p5022_p7), %v6715_v36  ;;  %3900 = vmatpush1.bf16.msra.mxu0 (!%p5022_p7), %v5794_v35  ;;  %v3940_v36 = vld [vmem:[%s7718_s11] sm:$0x3] (!%p5022_p7) }
0x1322   : > { %3901 = vmatprep.subr.bf16.mxu0 (!%p5022_p7), %v5795_v37  ;;  %4215 = vmatpush1.bf16.msra.mxu1 (!%p5022_p7), %v5839_v25  ;;  %v3941_v37 = vld [vmem:[%s7719_s0] sm:$0x3] (!%p5022_p7)  ;;  %v5867_v25 = vld [vmem:[%s6939_s29 + $0x38] sm:$0xff] (!%p5022_p7)  }
0x1323   : > { %4216 = vmatprep.subr.bf16.mxu1 (!%p5022_p7), %v5840_v26 }
0x1325   : > { %3902 = vmatpush1.bf16.msra.mxu0 (!%p5022_p7), %v5797_v38  ;;  %v3962_v38 = vrot.slane (!%p5022_p7), %v3940_v36, %v7408_v63 }
0x1326   : > { %3903 = vmatprep.subr.bf16.mxu0 (!%p5022_p7), %v5798_v39  ;;  %4217 = vmatpush1.bf16.msra.mxu1 (!%p5022_p7), %v5842_v21  ;;  %v3966_v39 = vrot.slane (!%p5022_p7), %v3940_v36, %v7410_v1 }
0x1329   : > { %3904 = vmatpush1.bf16.msra.mxu0 (!%p5022_p7), %v5800_v40 }
0x132a   : > { %3905 = vmatprep.subr.bf16.mxu0 (!%p5022_p7), %v5801_v41 }
0x132d   : > { %3906 = vmatpush1.bf16.msra.mxu0 (!%p5022_p7), %v5803_v42  ;;  %v3975_v42 = vrot.slane (!%p5022_p7), %v3941_v37, %v7408_v63 }
0x132e   : > { %5154 = vmatprep.subr.bf16.mxu0 (!%p5022_p7), %v5852_v0 }
0x13f3   : > { %v5148_v23 = vpop.f32.mrb[12].mxu0  ;;  %3833 = sbr.rel (%p5022_p7) target bundleno = 6438 (0x1926), region = 308 }
0x13f4   : > { %v5149_v29 = vpop.f32.mrb[13].mxu0 }
0x13f5   : > { %v5150_v30 = vadd.f32 %v5149_v29, %v5148_v23  ;;  %v5151_v31 = vpop.f32.mrb[14].mxu0  ;;  %v5843_v23 = vld [vmem:[#allocation40 + $0xd4] ss:$8 sps:$4 sm:$0xff] (!%p5022_p7)   ;;  %v5846_v29 = vld [vmem:[#allocation40 + $0xe4] ss:$8 sps:$4 sm:$0xff] (!%p5022_p7)  }
0x13f6   : > { %v5152_v32 = vpop.f32.mrb[15].mxu0  ;;  %4218 = vmatprep.subr.bf16.mxu1 (!%p5022_p7), %v5843_v23  ;;  %v5849_v31 = vld [vmem:[#allocation40 + $0xf4] ss:$8 sps:$4 sm:$0xff] (!%p5022_p7)  }
0x13f7   : > { %v3824_v33 = vadd.f32 %v5150_v30, %v5005_v28  ;;  %v5845_v28 = vld [vmem:[#allocation40 + $0xd0] ss:$8 sps:$4 sm:$0xff] (!%p5022_p7)   ;;  %v5848_v30 = vld [vmem:[#allocation40 + $0xe0] ss:$8 sps:$4 sm:$0xff] (!%p5022_p7)  }
0x13f8   : > { %4219 = vmatpush1.bf16.msra.mxu1 (!%p5022_p7), %v5845_v28  ;;  %v5851_v32 = vld [vmem:[#allocation40 + $0xf0] ss:$8 sps:$4 sm:$0xff] (!%p5022_p7)  }
0x13f9   : > { %3829 = vst.msk [vmem:[#allocation2] sm:$0xff] %vm2384_vm4, %v3824_v33  ;;  %4220 = vmatprep.subr.bf16.mxu1 (!%p5022_p7), %v5846_v29  ;;  %v4233_v28 = vld [vmem:[%s7721_s3] sm:$0x3] (!%p5022_p7) }
0x13fa   : > { %v4234_v29 = vld [vmem:[%s6934_s12] sm:$0x3] }
0x13fb   : > { %v4272_v36 = vrot.slane %v4234_v29, %v7410_v1 }
0x13fc   : > { %4221 = vmatpush1.bf16.msra.mxu1 %v5848_v30  ;;  %v4255_v30 = vrot.slane %v4233_v28, %v7408_v63 }
0x13fd   : > { %4222 = vmatprep.subr.bf16.mxu1 %v5849_v31  ;;  %v4259_v31 = vrot.slane %v4233_v28, %v7410_v1 }
0x1400   : > { %v3834_v43 = vld [vmem:[#allocation2] sm:$0xff]  ;;  %4223 = vmatpush1.bf16.msra.mxu1 %v5851_v32 }
0x1401   : > { %v3835_v44 = vpack.c.bf16 %v3834_v43, %v3834_v43  ;;  %v3979_v43 = vrot.slane %v3941_v37, %v7410_v1 }
0x1403   : > { %5031 = vmatmul.mubr.msk.bf16.vlgmr.msra.gmra.mrb[0].mxu0 %vm2384_vm4, %v3835_v44 }
0x1404   : > { %5155 = vmatpush3.bf16.msra.mxu0 %v5853_v2 }
0x1405   : > { %5156 = vmatprep.subr.bf16.mxu0 %v5854_v3 }
0x1408   : > { %5157 = vmatpush3.bf16.msra.mxu0 %v5855_v4 }
0x1409   : > { %5158 = vmatprep.subr.bf16.mxu0 %v5856_v12 }
0x14d6   : > { %v3933_v47 = vpop.f32.mrb[0].mxu0 }
0x14d7   : > { %v3934_v48 = vadd.f32 %v3933_v47, %v3849_v46  ;;  %v3935_v49 = vpop.f32.mrb[1].mxu0 }
0x14d8   : > { %v3936_v51 = vadd.f32 %v3935_v49, %v3853_v50  ;;  %v3937_v52 = vpop.f32.mrb[2].mxu0 }
0x14d9   : > { %v3938_v53 = vpop.f32.mrb[3].mxu0 }
0x14da   : > { %v3942_v54 = vadd.f32 %v3936_v51, %v3934_v48  ;;  %v4020_v53 = vld [vmem:[%s7720_s26] sm:$0x3] }
0x14db   : > { %v4029_v55 = vrot.slane %v4020_v53, %v7410_v1 }
0x14dc   : > { %3943 = vadd.xlane.f32.xlu0 %v3942_v54  ;;  %v4025_v54 = vrot.slane %v4020_v53, %v7408_v63  ;;  %v4457_v53 = vand.u32 127, %v2406_v61 }
0x14de   : > { %vm4458_vm6 = vcmp.eq.s32.totalorder %v4457_v53, 0 }
0x1569   : > { %v3944_v13 = vpop.xlane.xlu0 %3943 }
0x156a   : > { %v3945_v14 = vmul.f32 0.00390625, %v3944_v13  ;;  %v5857_v13 = vld [vmem:[%s6939_s29 + $0x10] sm:$0xff]  }
0x156b   : > { %5159 = vmatpush3.bf16.msra.mxu0 %v5857_v13 }
0x156c   : > { %v3946_v15 = vsub.f32 %v3934_v48, %v3945_v14  ;;  %v3947_v16 = vsub.f32 %v3936_v51, %v3945_v14  ;;  %v5858_v14 = vld [vmem:[%s6939_s29 + $0x58] sm:$0xff]  }
0x156d   : > { %5160 = vmatprep.subr.bf16.mxu0 %v5858_v14 }
0x156e   : > { %v3948_v17 = vmul.f32 %v3946_v15, %v3946_v15  ;;  %v3949_v18 = vmul.f32 %v3947_v16, %v3947_v16 }
0x1570   : > { %v3950_v19 = vadd.f32 %v3949_v18, %v3948_v17  ;;  %v5861_v17 = vld [vmem:[%s6939_s29 + $0x20] sm:$0xff]   ;;  %v5862_v18 = vld [vmem:[%s6939_s29 + $0x68] sm:$0xff]  }
0x1572   : > { %3951 = vadd.xlane.f32.xlu0 %v3950_v19  ;;  %v5863_v19 = vld [vmem:[%s6939_s29 + $0x28] sm:$0xff]  }
0x15ff   : > { %v3952_v33 = vpop.xlane.xlu0 %3951 }
0x1600   : > { %v3953_v34 = vmul.f32 0.00390625, %v3952_v33 }
0x1602   : > { %v3954_v35 = vadd.f32 1e-05, %v3953_v34 }
0x1604   : > { %5868 = vrsqrt.f32 %v3954_v35  ;;  %v4268_v35 = vrot.slane %v4234_v29, %v7408_v63 }
0x160e   : > { %v5869_v40 = vpop.eup %5868 }
0x160f   : > { %v3957_v41 = vmul.f32 %v5869_v40, %v3947_v16  ;;  %v3956_v44 = vmul.f32 %v5869_v40, %v3946_v15  ;;  %v5859_v15 = vld [vmem:[%s6939_s29 + $0x18] sm:$0xff]   ;;  %v5860_v16 = vld [vmem:[%s6939_s29 + $0x60] sm:$0xff]  }
0x1610   : > { %5161 = vmatpush3.bf16.msra.mxu0 %v5859_v15 }
0x1611   : > { %v3970_v45 = vmul.f32 %v3966_v39, %v3957_v41  ;;  %v3969_v46 = vmul.f32 %v3962_v38, %v3956_v44  ;;  %5162 = vmatprep.subr.bf16.mxu0 %v5860_v16 }
0x1613   : > { %v3983_v50 = vadd.f32 %v3979_v43, %v3970_v45  ;;  %v3982_v47 = vadd.f32 %v3975_v42, %v3969_v46  ;;  %v5064_v46 = vld [vmem:[%s6944_s27] ss:$0 sm:$0xff] }
0x1614   : > { %5163 = vmatpush3.bf16.msra.mxu0 %v5861_v17 }
0x1615   : > { %v3985_v48 = vmax.f32 %v3983_v50, 0.0  ;;  %v3984_v49 = vmax.f32 %v3982_v47, 0.0  ;;  %5164 = vmatprep.subr.bf16.mxu0 %v5862_v18 }
0x1617   : > { %v3987_v51 = vpack.c.bf16 %v3985_v48, %v3985_v48  ;;  %v3986_v52 = vpack.c.bf16 %v3984_v49, %v3984_v49 }
0x1618   : > { %5165 = vmatpush3.bf16.msra.mxu0 %v5863_v19 }
0x1619   : > { %4224 = vmatprep.mubr.bf16.mxu1 %v3987_v51  ;;  %5166 = vmatprep.subr.bf16.mxu0 %v5864_v20 }
0x161a   : > { %4225 = vmatmul.mubr.bf16.vlgmr.msra.gmra.mrb[0].mxu1 %v3986_v52 }
0x161c   : > { %5167 = vmatpush3.bf16.msra.mxu0 %v5865_v22 }
0x161d   : > { %5168 = vmatprep.subr.bf16.mxu0 %v5866_v24 }
0x1620   : > { %5169 = vmatpush3.bf16.msra.mxu0 %v5867_v25 }
0x16ed   : > { %v4226_v56 = vpop.f32.mrb[0].mxu1 }
0x16ee   : > { %v4227_v57 = vadd.f32 %v4226_v56, %v4025_v54  ;;  %v4228_v58 = vpop.f32.mrb[1].mxu1 }
0x16ef   : > { %v4229_v27 = vadd.f32 %v4228_v58, %v4029_v55  ;;  %v4230_v59 = vpop.f32.mrb[2].mxu1 }
0x16f0   : > { %v4231_v60 = vpop.f32.mrb[3].mxu1 }
0x16f1   : > { %v4235_v62 = vadd.f32 %v4229_v27, %v4227_v57 }
0x16f3   : > { %4236 = vadd.xlane.f32.xlu1 %v4235_v62 }
0x1780   : > { %v4237_v5 = vpop.xlane.xlu1 %4236 }
0x1781   : > { %v4238_v6 = vmul.f32 0.00390625, %v4237_v5 }
0x1783   : > { %v4239_v7 = vsub.f32 %v4227_v57, %v4238_v6  ;;  %v4240_v8 = vsub.f32 %v4229_v27, %v4238_v6 }
0x1785   : > { %v4241_v9 = vmul.f32 %v4239_v7, %v4239_v7  ;;  %v4242_v10 = vmul.f32 %v4240_v8, %v4240_v8 }
0x1787   : > { %v4243_v11 = vadd.f32 %v4242_v10, %v4241_v9 }
0x1789   : > { %4244 = vadd.xlane.f32.xlu1 %v4243_v11 }
0x1816   : > { %v4245_v26 = vpop.xlane.xlu1 %4244 }
0x1817   : > { %v4246_v21 = vmul.f32 0.00390625, %v4245_v26 }
0x1819   : > { %v4247_v23 = vadd.f32 1e-05, %v4246_v21 }
0x181b   : > { %5870 = vrsqrt.f32 %v4247_v23 }
0x1825   : > { %v5871_v32 = vpop.eup %5870 }
0x1826   : > { %v4249_v33 = vmul.f32 %v5871_v32, %v4239_v7  ;;  %v4250_v34 = vmul.f32 %v5871_v32, %v4240_v8 }
0x1828   : > { %v4263_v37 = vmul.f32 %v4259_v31, %v4250_v34  ;;  %v4262_v38 = vmul.f32 %v4255_v30, %v4249_v33 }
0x182a   : > { %v4276_v39 = vadd.f32 %v4272_v36, %v4263_v37  ;;  %v4275_v40 = vadd.f32 %v4268_v35, %v4262_v38 }
0x182c   : > { %v4278_v41 = vmax.f32 %v4276_v39, 0.0  ;;  %v4277_v42 = vmax.f32 %v4275_v40, 0.0 }
0x182e   : > { %v4280_v43 = vpack.c.bf16 %v4278_v41, %v4278_v41  ;;  %v4279_v44 = vpack.c.bf16 %v4277_v42, %v4277_v42 }
0x1830   : > { %4448 = vmatprep.mubr.bf16.mxu0 %v4280_v43 }
0x1831   : > { %4449 = vmatmul.mubr.bf16.vlgmr.msra.gmra.mrb[4].mxu0 %v4279_v44 }
0x1904   : > { %v5170_v45 = vpop.f32.mrb[4].mxu0 }
0x1905   : > { %v5171_v50 = vpop.f32.mrb[5].mxu0 }
0x1906   : > { %v5172_v47 = vadd.f32 %v5171_v50, %v5170_v45  ;;  %v5173_v48 = vpop.f32.mrb[6].mxu0 }
0x1907   : > { %v5174_v49 = vpop.f32.mrb[7].mxu0 }
0x1908   : > { %v4451_v63 = vadd.f32 %v5172_v47, %v5064_v46 }
0x190a   : > { %v5081_v51 = vmul.f32 -1.442695, %v4451_v63 }
0x190c   : > { %5872 = vpow2.f32 %v5081_v51 }
0x190d   : > { %5874 = vtanh.f32 %v4451_v63 }
0x1916   : > { %v5873_v1 = vpop.eup %5872 }
0x1917   : > { %v4463_v52 = vadd.f32 1.0, %v5873_v1  ;;  %v5875_v54 = vpop.eup %5874 }
0x1919   : > { %5876 = vrcp.f32 %v4463_v52 }
0x1923   : > { %v5877_v55 = vpop.eup %5876 }
0x1924   : > { %v4466_v56 = vsel %vm4458_vm6, %v5875_v54, %v5877_v55 }
0x1925   : > { %4468 = vst.msk [vmem:[%s6949_s24] sm:$0xff] %vm4467_vm7, %v4466_v56 }
0x1926 PF: > { %s114_s7 = sadd.s32 1, %s6636_s7  }
0x1927   : > { %p111_p2 = scmp.ge.s32.totalorder %s114_s7, 8  }
0x1929   :  { %113 = sbr.rel (!%p111_p2) target bundleno = 95 (0x5f), region = 377 }
0x1930   :  { %4480 = vsyncpa [#allocation4], 1 }
0x1931   :  { %4482 = vsyncpa [#allocation4 + $0x1], 1 }
0x1932   :  { %4483 = vsyncpa [#allocation6], 1 }
0x1933   :  { %4484 = vsyncpa [#allocation9], 1 }
0x1934   :  { %4485 = vsyncpa [#allocation12], 1 }
0x1935   :  { %4486 = vsyncpa [#allocation15], 1 }
0x1936   :  { %4487 = vsyncpa [#allocation18], 1 }
0x1937   :  { %4488 = vsyncpa [#allocation21], 1 }
0x1938   :  { %4489 = vsyncpa [#allocation24], 1 }
0x1939   :  { %4490 = vsyncpa [#allocation27], 1 }
0x193a   :  { %4491 = vsyncpa [#allocation30], 1 }
0x193b   :  { %4492 = vsyncpa [#allocation33], 1 }
0x193c   :  { %4493 = vsyncpa [#allocation36], 1 }
0x193d   :  { %4494 = vsyncpa [#allocation39], 1 }

</bundles_post_ra>
